<compile_context>
chip_gen: v7x
topology: tpu7x:2x2x1
jax: 0.10.0
libtpu: 0.0.40
codegen_flags: <defaults>
</compile_context>

<pallas_src>
import functools

import jax
import jax.numpy as jnp
from jax.experimental import pallas as pl
from jax.experimental.pallas import tpu as pltpu

EPS = 1e-5
LANES = 128
SUBLANES = 8


def _round_up(x, m):
    return (x + m - 1) // m * m


def _largest_divisor_leq(h, cap):
    cap = max(1, min(cap, h))
    for t in range(cap, 0, -1):
        if h % t == 0:
            return t
    return 1


# --------------------------------------------------------------------------
# In-kernel helpers
# --------------------------------------------------------------------------
def _conv3x3_cat(z, w_ref, th, wd, cp):
    """3x3 stride-1 conv on one haloed tile via 3 wide-K MXU matmuls.

    z:     (th+2, wd, cp) bf16.  Rows 0 and th+1 are the dy halo rows; all
           out-of-image rows/columns already hold zeros.
    w_ref: (3, 3*cp, cp) bf16 ref, K laid out as [dx=0 | dx=1 | dx=2] x cp.
    Returns a (th*wd, cp) f32 accumulator.
    """
    zero_col = jnp.zeros((th + 2, 1, cp), z.dtype)
    left = jnp.concatenate([zero_col, z[:, :wd - 1, :]], axis=1)    # col j-1
    right = jnp.concatenate([z[:, 1:, :], zero_col], axis=1)        # col j+1
    # Lane-dim concat of cp-aligned pieces -> (th+2, wd, 3*cp): the dx taps
    # live in the contraction dim, so each dy is ONE K=3*cp matmul.
    zcat = jnp.concatenate([left, z, right], axis=-1)
    acc = jnp.zeros((th * wd, cp), jnp.float32)
    for dy in range(3):
        # wd % 8 == 0  ->  this reshape is a layout-preserving view.
        patch = zcat[dy:dy + th].reshape(th * wd, 3 * cp)
        acc = acc + jnp.dot(patch, w_ref[dy],
                            preferred_element_type=jnp.float32)
    return acc


def _partial_stats(acc2d):
    """Per-channel (sum, sum_sq) of a (rows, cp) f32 accumulator -> (2, cp)."""
    return jnp.concatenate(
        [jnp.sum(acc2d, axis=0, keepdims=True),
         jnp.sum(acc2d * acc2d, axis=0, keepdims=True)], axis=0)


def _mask_cols(v, true_w):
    """Zero columns >= true_w.  Only traced when the width is padded."""
    wd = v.shape[1]
    if wd == true_w:
        return v
    col = jax.lax.broadcasted_iota(jnp.int32, (1, wd, 1), 1)
    return jnp.where(col < true_w, v, 0.0)


# --------------------------------------------------------------------------
# Pass 1: conv1 + fused bn1 partial statistics
# --------------------------------------------------------------------------
def _conv1_kernel(top_ref, mid_ref, bot_ref, w_ref, y_ref, st_ref, *, true_w):
    ti = pl.program_id(1)
    n_t = pl.num_programs(1)
    th, wd, cp = mid_ref.shape

    # dy halo rows: real neighbour rows for interior tiles, zeros (= conv1's
    # zero padding) at the image top/bottom.  Only these two rows get masked.
    top = jnp.where(ti > 0, top_ref[...], jnp.zeros_like(top_ref[...]))
    bot = jnp.where(ti < n_t - 1, bot_ref[...], jnp.zeros_like(bot_ref[...]))
    z = jnp.concatenate([top, mid_ref[...], bot], axis=0)   # (th+2, wd, cp)

    acc = _conv3x3_cat(z, w_ref, th, wd, cp)
    y3 = _mask_cols(acc.reshape(th, wd, cp), true_w)
    y_ref[...] = y3.astype(y_ref.dtype)                      # bf16 to HBM
    st_ref[...] = _partial_stats(y3.reshape(th * wd, cp))    # f32 stats


# --------------------------------------------------------------------------
# Pass 2: bn1 + relu (fused scale/shift) + conv2 + fused bn2 partial stats
# --------------------------------------------------------------------------
def _bn1_conv2_kernel(top_ref, mid_ref, bot_ref, w_ref, sc_ref, sh_ref,
                      y_ref, st_ref, *, true_w):
    ti = pl.program_id(1)
    n_t = pl.num_programs(1)
    th, wd, cp = mid_ref.shape
    sc = sc_ref[...]
    sh = sh_ref[...]

    def bn_relu(v):
        return jnp.maximum(v.astype(jnp.float32) * sc + sh, 0.0)

    # bn1 + relu on the tile and its halo rows; halo rows are zeroed at the
    # image top/bottom (conv2's zero padding), NOT bn-shifted.
    top = jnp.where(ti > 0, bn_relu(top_ref[...]), 0.0)
    bot = jnp.where(ti < n_t - 1, bn_relu(bot_ref[...]), 0.0)
    z = jnp.concatenate([top, bn_relu(mid_ref[...]), bot], axis=0)
    # Width padding columns hold zeros in storage but bn shifts them; re-zero
    # so conv2 sees true zero padding (no-op when wd == true_w).
    z = _mask_cols(z, true_w)

    acc = _conv3x3_cat(z.astype(jnp.bfloat16), w_ref, th, wd, cp)
    y3 = _mask_cols(acc.reshape(th, wd, cp), true_w)
    y_ref[...] = y3.astype(y_ref.dtype)
    st_ref[...] = _partial_stats(y3.reshape(th * wd, cp))


# --------------------------------------------------------------------------
# Pass 3: bn2 + residual add + relu (elementwise, lane-dense blocks)
# --------------------------------------------------------------------------
def _bn2_add_relu_kernel(y_ref, id_ref, sc_ref, sh_ref, o_ref):
    o_ref[...] = jnp.maximum(
        y_ref[...].astype(jnp.float32) * sc_ref[...] + sh_ref[...]
        + id_ref[...].astype(jnp.float32), 0.0).astype(o_ref.dtype)


# --------------------------------------------------------------------------
# Host-side glue
# --------------------------------------------------------------------------
def _bn_scale_shift(stats, gamma, beta, count):
    """Finish training-mode BN from per-tile (sum, sum_sq) partials.

    Note: variance = E[x^2] - mean^2 in f32 (clamped at 0).  Adequate for
    ResNet-scale activations; a centered two-pass reduction would be needed
    only for very large-mean inputs.
    """
    s1 = jnp.sum(stats[:, :, 0, :], axis=(0, 1))
    s2 = jnp.sum(stats[:, :, 1, :], axis=(0, 1))
    mean = s1 / count
    var = jnp.maximum(s2 / count - mean * mean, 0.0)
    scale = gamma * jax.lax.rsqrt(var + EPS)
    shift = beta - mean * scale
    return scale.reshape(1, -1), shift.reshape(1, -1)


def _vmem_limit_bytes(tile_h, wd, cp):
    """Per-step working-set estimate instead of a blanket 48 MiB."""
    act_blk = (tile_h + 2) * wd * cp
    est = (2 * 2 * act_blk * 2      # input tile + halo rows, 2x buffered, bf16
           + 2 * act_blk * 2        # output tile, 2x buffered, bf16
           + 3 * 3 * cp * cp * 2    # weights
           + act_blk * 3 * 2        # zcat (bf16, 3*cp wide)
           + act_blk * 2 * 4)       # f32 accumulator / temporaries
    est = int(est * 1.5) + (2 << 20)
    return max(16 << 20, min(est, 32 << 20))


@functools.partial(jax.jit, static_argnames=("tile_h",))
def basic_block_forward(x_nchw, w1_oihw, w2_oihw, g1, b1, g2, b2, *, tile_h=32):
    """x_nchw: (N, C, H, W) float32 (PyTorch layout). Returns (N, C, H, W)."""
    n, cin, h, w_true = x_nchw.shape
    cout = w1_oihw.shape[0]
    # Residual add without downsample requires matching channel counts.
    assert cin == cout, "planes != inplanes needs a downsample branch"
    # TODO(synk): stride>1 / downsample branch not implemented (module
    # defaults are stride=1, downsample=None).

    # Tiling: largest divisor of H <= requested tile_h; keep >= 2 grid steps
    # so v7x's two TensorCores both get work.
    th = _largest_divisor_leq(h, tile_h)
    if n * (h // th) < 2 and h > 1:
        th = _largest_divisor_leq(h, max(1, h // 2))
    n_t = h // th

    cp = _round_up(max(cin, cout), LANES)     # lane-dense channels
    wd = _round_up(w_true, SUBLANES)          # sublane-aligned width

    # ---- layout glue: NCHW -> NHWC, channel/width zero pad, bf16 ----
    x_nhwc = jnp.transpose(x_nchw, (0, 2, 3, 1)).astype(jnp.float32)
    x_c = jnp.pad(x_nhwc, ((0, 0), (0, 0), (0, wd - w_true),
                           (0, cp - cin))).astype(jnp.bfloat16)

    def prep_w(w_oihw):
        # OIHW -> HWIO, pad channels, fold dx into K: (3, 3*cp, cp), bf16.
        hwio = jnp.transpose(w_oihw, (2, 3, 1, 0)).astype(jnp.float32)
        hwio = jnp.pad(hwio, ((0, 0), (0, 0),
                              (0, cp - hwio.shape[2]),
                              (0, cp - hwio.shape[3])))
        return hwio.reshape(3, 3 * cp, cp).astype(jnp.bfloat16)

    w1 = prep_w(w1_oihw)
    w2 = prep_w(w2_oihw)
    pad_c = (0, cp - cout)
    g1p = jnp.pad(g1.astype(jnp.float32), pad_c)
    b1p = jnp.pad(b1.astype(jnp.float32), pad_c)
    g2p = jnp.pad(g2.astype(jnp.float32), pad_c)
    b2p = jnp.pad(b2.astype(jnp.float32), pad_c)

    grid = (n, n_t)
    cparams = pltpu.CompilerParams(
        dimension_semantics=("parallel", "parallel"),
        vmem_limit_bytes=_vmem_limit_bytes(th, wd, cp))

    # Overlapping (haloed) reads are expressed directly as BlockSpecs: the
    # main tile plus one-row top/bottom halo blocks with clamped index maps.
    mid_spec = pl.BlockSpec((None, th, wd, cp), lambda ni, ti: (ni, ti, 0, 0))
    top_spec = pl.BlockSpec(
        (None, 1, wd, cp),
        lambda ni, ti: (ni, jnp.maximum(ti * th - 1, 0), 0, 0))
    bot_spec = pl.BlockSpec(
        (None, 1, wd, cp),
        lambda ni, ti: (ni, jnp.minimum(ti * th + th, h - 1), 0, 0))
    # Grid-invariant weight block (constant index map -> fetched once).
    w_spec = pl.BlockSpec((3, 3 * cp, cp), lambda ni, ti: (0, 0, 0))
    vec_spec = pl.BlockSpec((1, cp), lambda ni, ti: (0, 0))
    y_spec = pl.BlockSpec((None, th, wd, cp), lambda ni, ti: (ni, ti, 0, 0))
    st_spec = pl.BlockSpec((None, None, 2, cp), lambda ni, ti: (ni, ti, 0, 0))

    conv_flops = 2 * n * h * wd * 9 * cp * cp
    act_bytes = n * h * wd * cp * 2                  # bf16 activation tensor
    w_bytes = 3 * 3 * cp * cp * 2
    st_bytes = n * n_t * 2 * cp * 4

    # ---- pass 1: conv1 + bn1 partial statistics ----
    y1, st1 = pl.pallas_call(
        functools.partial(_conv1_kernel, true_w=w_true),
        grid=grid,
        in_specs=[top_spec, mid_spec, bot_spec, w_spec],
        out_specs=(y_spec, st_spec),
        out_shape=(jax.ShapeDtypeStruct((n, h, wd, cp), jnp.bfloat16),
                   jax.ShapeDtypeStruct((n, n_t, 2, cp), jnp.float32)),
        compiler_params=cparams,
        cost_estimate=pl.CostEstimate(
            flops=conv_flops, transcendentals=0,
            bytes_accessed=2 * act_bytes + w_bytes + st_bytes),
    )(x_c, x_c, x_c, w1)

    scale1, shift1 = _bn_scale_shift(st1, g1p, b1p, float(n * h * w_true))

    # ---- pass 2: bn1 + relu + conv2 + bn2 partial statistics ----
    y2, st2 = pl.pallas_call(
        functools.partial(_bn1_conv2_kernel, true_w=w_true),
        grid=grid,
        in_specs=[top_spec, mid_spec, bot_spec, w_spec, vec_spec, vec_spec],
        out_specs=(y_spec, st_spec),
        out_shape=(jax.ShapeDtypeStruct((n, h, wd, cp), jnp.bfloat16),
                   jax.ShapeDtypeStruct((n, n_t, 2, cp), jnp.float32)),
        compiler_params=cparams,
        cost_estimate=pl.CostEstimate(
            flops=conv_flops, transcendentals=0,
            bytes_accessed=2 * act_bytes + w_bytes + st_bytes),
    )(y1, y1, y1, w2, scale1, shift1)

    scale2, shift2 = _bn_scale_shift(st2, g2p, b2p, float(n * h * w_true))

    # ---- pass 3: bn2 + residual add + relu ----
    out = pl.pallas_call(
        _bn2_add_relu_kernel,
        grid=grid,
        in_specs=[y_spec, y_spec, vec_spec, vec_spec],
        out_specs=y_spec,
        out_shape=jax.ShapeDtypeStruct((n, h, wd, cp), jnp.float32),
        compiler_params=cparams,
        cost_estimate=pl.CostEstimate(
            flops=4 * n * h * wd * cp, transcendentals=0,
            bytes_accessed=2 * act_bytes + n * h * wd * cp * 4),
    )(y2, x_c, scale2, shift2)

    # drop width/channel padding, back to NCHW
    return jnp.transpose(out[:, :, :w_true, :cout], (0, 3, 1, 2))


# --------------------------------------------------------------------------
# Pure-JAX reference (matches PyTorch BasicBlock.forward, training-mode BN)
# --------------------------------------------------------------------------
def _reference_forward(x, w1, w2, g1, b1, g2, b2):
    def conv(z, w):
        return jax.lax.conv_general_dilated(
            z, w, window_strides=(1, 1), padding=[(1, 1), (1, 1)],
            dimension_numbers=("NCHW", "OIHW", "NCHW"))

    def bn(z, g, b):
        mean = z.mean(axis=(0, 2, 3), keepdims=True)
        var = ((z - mean) ** 2).mean(axis=(0, 2, 3), keepdims=True)
        return ((z - mean) * jax.lax.rsqrt(var + EPS)
                * g.reshape(1, -1, 1, 1) + b.reshape(1, -1, 1, 1))

    out = jnp.maximum(bn(conv(x, w1), g1, b1), 0.0)
    out = bn(conv(out, w2), g2, b2)
    return jnp.maximum(out + x, 0.0)


if __name__ == "__main__":
    # BasicBlock(inplanes=8, planes=8, stride=1, downsample=None)
    N, C, H, W = 2, 8, 16, 16
    key = jax.random.PRNGKey(0)
    kx, k1, k2, kg1, kb1, kg2, kb2 = jax.random.split(key, 7)

    x = jax.random.normal(kx, (N, C, H, W), jnp.float32)
    w1 = jax.random.normal(k1, (C, C, 3, 3), jnp.float32) * 0.1   # conv1 (OIHW)
    w2 = jax.random.normal(k2, (C, C, 3, 3), jnp.float32) * 0.1   # conv2 (OIHW)
    g1 = 1.0 + 0.1 * jax.random.normal(kg1, (C,), jnp.float32)    # bn1 weight
    b1 = 0.1 * jax.random.normal(kb1, (C,), jnp.float32)          # bn1 bias
    g2 = 1.0 + 0.1 * jax.random.normal(kg2, (C,), jnp.float32)    # bn2 weight
    b2 = 0.1 * jax.random.normal(kb2, (C,), jnp.float32)          # bn2 bias

    ref = _reference_forward(x, w1, w2, g1, b1, g2, b2)

    # Default tiling (one big H tile per image for H=16).
    out = basic_block_forward(x, w1, w2, g1, b1, g2, b2)
    out = jax.block_until_ready(out)
    assert out.shape == (N, C, H, W)
    # Tolerance accounts for bf16 MXU operands / bf16 intermediates.
    assert jnp.allclose(out, ref, atol=5e-2, rtol=5e-2), (
        float(jnp.max(jnp.abs(out - ref))))

    # Multi-tile path (exercises the in-kernel dy halo handling).
    out2 = basic_block_forward(x, w1, w2, g1, b1, g2, b2, tile_h=8)
    out2 = jax.block_until_ready(out2)
    assert jnp.allclose(out2, ref, atol=5e-2, rtol=5e-2), (
        float(jnp.max(jnp.abs(out2 - ref))))

    print("KERNEL_OK")
</pallas_src>

<mosaic_0001>
module attributes {stable_mosaic.version = 11 : i64} {
  func.func @_conv1_kernel(%arg0: i32, %arg1: i32, %arg2: memref<1x1x16x128xbf16, #tpu.memory_space<vmem>>, %arg3: memref<1x16x16x128xbf16, #tpu.memory_space<vmem>>, %arg4: memref<1x1x16x128xbf16, #tpu.memory_space<vmem>>, %arg5: memref<3x384x128xbf16, #tpu.memory_space<vmem>>, %arg6: memref<1x16x16x128xbf16, #tpu.memory_space<vmem>>, %arg7: memref<1x1x2x128xf32, #tpu.memory_space<vmem>>) attributes {dimension_semantics = [#tpu.dimension_semantics<parallel>, #tpu.dimension_semantics<parallel>], iteration_bounds = array<i64: 2, 1>, scalar_prefetch = 0 : i64, scratch_operands = 0 : i64, tpu.core_type = #tpu.core_type<tc>, window_params = [{transform_indices = @transform_0, window_bounds = array<i64: 1, 1, 16, 128>}, {transform_indices = @transform_1, window_bounds = array<i64: 1, 16, 16, 128>}, {transform_indices = @transform_2, window_bounds = array<i64: 1, 1, 16, 128>}, {pipeline_mode = #tpu.pipeline_mode<synchronous>, transform_indices = @transform_3, window_bounds = array<i64: 3, 384, 128>}, {transform_indices = @transform_4, window_bounds = array<i64: 1, 16, 16, 128>}, {transform_indices = @transform_5, window_bounds = array<i64: 1, 1, 2, 128>}]} {
    %c0_i32 = arith.constant 0 : i32
    %0 = arith.cmpi sgt, %arg1, %c0_i32 : i32
    %c0 = arith.constant 0 : index
    %c0_0 = arith.constant 0 : index
    %c0_1 = arith.constant 0 : index
    %c0_2 = arith.constant 0 : index
    %1 = vector.load %arg2[%c0, %c0_0, %c0_1, %c0_2] : memref<1x1x16x128xbf16, #tpu.memory_space<vmem>>, vector<1x1x16x128xbf16>
    %2 = vector.shape_cast %1 : vector<1x1x16x128xbf16> to vector<1x16x128xbf16>
    %cst = arith.constant 0.000000e+00 : bf16
    %3 = vector.broadcast %cst : bf16 to vector<1x16x128xbf16>
    %4 = arith.select %0, %2, %3 : vector<1x16x128xbf16>
    %c0_i32_3 = arith.constant 0 : i32
    %5 = arith.cmpi slt, %arg1, %c0_i32_3 : i32
    %c0_4 = arith.constant 0 : index
    %c0_5 = arith.constant 0 : index
    %c0_6 = arith.constant 0 : index
    %c0_7 = arith.constant 0 : index
    %6 = vector.load %arg4[%c0_4, %c0_5, %c0_6, %c0_7] : memref<1x1x16x128xbf16, #tpu.memory_space<vmem>>, vector<1x1x16x128xbf16>
    %7 = vector.shape_cast %6 : vector<1x1x16x128xbf16> to vector<1x16x128xbf16>
    %cst_8 = arith.constant 0.000000e+00 : bf16
    %8 = vector.broadcast %cst_8 : bf16 to vector<1x16x128xbf16>
    %9 = arith.select %5, %7, %8 : vector<1x16x128xbf16>
    %c0_9 = arith.constant 0 : index
    %c0_10 = arith.constant 0 : index
    %c0_11 = arith.constant 0 : index
    %c0_12 = arith.constant 0 : index
    %10 = vector.load %arg3[%c0_9, %c0_10, %c0_11, %c0_12] : memref<1x16x16x128xbf16, #tpu.memory_space<vmem>>, vector<1x16x16x128xbf16>
    %11 = vector.shape_cast %10 : vector<1x16x16x128xbf16> to vector<16x16x128xbf16>
    %12 = tpu.concatenate %4, %11, %9 in 0 : vector<1x16x128xbf16>, vector<16x16x128xbf16>, vector<1x16x128xbf16> -> vector<18x16x128xbf16>
    %cst_13 = arith.constant 0.000000e+00 : bf16
    %13 = vector.broadcast %cst_13 : bf16 to vector<18x1x128xbf16>
    %14 = vector.extract_strided_slice %12 {offsets = [0, 0, 0], sizes = [18, 15, 128], strides = [1, 1, 1]} : vector<18x16x128xbf16> to vector<18x15x128xbf16>
    %15 = tpu.concatenate %13, %14 in 1 : vector<18x1x128xbf16>, vector<18x15x128xbf16> -> vector<18x16x128xbf16>
    %16 = vector.extract_strided_slice %12 {offsets = [0, 1, 0], sizes = [18, 15, 128], strides = [1, 1, 1]} : vector<18x16x128xbf16> to vector<18x15x128xbf16>
    %17 = tpu.concatenate %16, %13 in 1 : vector<18x15x128xbf16>, vector<18x1x128xbf16> -> vector<18x16x128xbf16>
    %18 = tpu.concatenate %15, %12, %17 in 2 : vector<18x16x128xbf16>, vector<18x16x128xbf16>, vector<18x16x128xbf16> -> vector<18x16x384xbf16>
    %cst_14 = arith.constant 0.000000e+00 : f32
    %19 = vector.broadcast %cst_14 : f32 to vector<256x128xf32>
    %20 = vector.extract_strided_slice %18 {offsets = [0, 0, 0], sizes = [16, 16, 384], strides = [1, 1, 1]} : vector<18x16x384xbf16> to vector<16x16x384xbf16>
    %21 = vector.shape_cast %20 : vector<16x16x384xbf16> to vector<256x384xbf16>
    %c0_15 = arith.constant 0 : index
    %c0_16 = arith.constant 0 : index
    %c0_17 = arith.constant 0 : index
    %22 = vector.load %arg5[%c0_15, %c0_16, %c0_17] : memref<3x384x128xbf16, #tpu.memory_space<vmem>>, vector<1x384x128xbf16>
    %23 = vector.shape_cast %22 : vector<1x384x128xbf16> to vector<384x128xbf16>
    %cst_18 = arith.constant dense<0.000000e+00> : vector<256x128xf32>
    %24 = tpu.matmul %21, %23, %cst_18 {dimension_numbers = #tpu.dot_dimension_numbers<[1], [0], [0], [1], [0, 0, 1, 1], [], []>} : vector<256x384xbf16>, vector<384x128xbf16>, vector<256x128xf32> -> vector<256x128xf32>
    %25 = arith.addf %19, %24 : vector<256x128xf32>
    %26 = vector.extract_strided_slice %18 {offsets = [1, 0, 0], sizes = [16, 16, 384], strides = [1, 1, 1]} : vector<18x16x384xbf16> to vector<16x16x384xbf16>
    %27 = vector.shape_cast %26 : vector<16x16x384xbf16> to vector<256x384xbf16>
    %c1 = arith.constant 1 : index
    %c0_19 = arith.constant 0 : index
    %c0_20 = arith.constant 0 : index
    %28 = vector.load %arg5[%c1, %c0_19, %c0_20] : memref<3x384x128xbf16, #tpu.memory_space<vmem>>, vector<1x384x128xbf16>
    %29 = vector.shape_cast %28 : vector<1x384x128xbf16> to vector<384x128xbf16>
    %cst_21 = arith.constant dense<0.000000e+00> : vector<256x128xf32>
    %30 = tpu.matmul %27, %29, %cst_21 {dimension_numbers = #tpu.dot_dimension_numbers<[1], [0], [0], [1], [0, 0, 1, 1], [], []>} : vector<256x384xbf16>, vector<384x128xbf16>, vector<256x128xf32> -> vector<256x128xf32>
    %31 = arith.addf %25, %30 : vector<256x128xf32>
    %32 = vector.extract_strided_slice %18 {offsets = [2, 0, 0], sizes = [16, 16, 384], strides = [1, 1, 1]} : vector<18x16x384xbf16> to vector<16x16x384xbf16>
    %33 = vector.shape_cast %32 : vector<16x16x384xbf16> to vector<256x384xbf16>
    %c2 = arith.constant 2 : index
    %c0_22 = arith.constant 0 : index
    %c0_23 = arith.constant 0 : index
    %34 = vector.load %arg5[%c2, %c0_22, %c0_23] : memref<3x384x128xbf16, #tpu.memory_space<vmem>>, vector<1x384x128xbf16>
    %35 = vector.shape_cast %34 : vector<1x384x128xbf16> to vector<384x128xbf16>
    %cst_24 = arith.constant dense<0.000000e+00> : vector<256x128xf32>
    %36 = tpu.matmul %33, %35, %cst_24 {dimension_numbers = #tpu.dot_dimension_numbers<[1], [0], [0], [1], [0, 0, 1, 1], [], []>} : vector<256x384xbf16>, vector<384x128xbf16>, vector<256x128xf32> -> vector<256x128xf32>
    %37 = arith.addf %31, %36 : vector<256x128xf32>
    %38 = vector.shape_cast %37 : vector<256x128xf32> to vector<16x16x128xf32>
    %39 = arith.truncf %38 : vector<16x16x128xf32> to vector<16x16x128xbf16>
    %c0_25 = arith.constant 0 : index
    %c0_26 = arith.constant 0 : index
    %c0_27 = arith.constant 0 : index
    %c0_28 = arith.constant 0 : index
    %40 = vector.load %arg6[%c0_25, %c0_26, %c0_27, %c0_28] : memref<1x16x16x128xbf16, #tpu.memory_space<vmem>>, vector<1x16x16x128xbf16>
    %41 = vector.shape_cast %40 : vector<1x16x16x128xbf16> to vector<16x16x128xbf16>
    %42 = vector.shape_cast %39 : vector<16x16x128xbf16> to vector<1x16x16x128xbf16>
    tpu.vector_store %arg6[%c0_25, %c0_26, %c0_27, %c0_28], %42 {strides = array<i32>} : memref<1x16x16x128xbf16, #tpu.memory_space<vmem>>, vector<1x16x16x128xbf16>,
    %43 = vector.shape_cast %38 : vector<16x16x128xf32> to vector<256x128xf32>
    %cst_29 = arith.constant dense<0.000000e+00> : vector<128xf32>
    %44 = vector.multi_reduction <add>, %43, %cst_29 [0] : vector<256x128xf32> to vector<128xf32>
    %45 = vector.shape_cast %44 : vector<128xf32> to vector<1x128xf32>
    %46 = arith.mulf %43, %43 : vector<256x128xf32>
    %cst_30 = arith.constant dense<0.000000e+00> : vector<128xf32>
    %47 = vector.multi_reduction <add>, %46, %cst_30 [0] : vector<256x128xf32> to vector<128xf32>
    %48 = vector.shape_cast %47 : vector<128xf32> to vector<1x128xf32>
    %49 = tpu.concatenate %45, %48 in 0 : vector<1x128xf32>, vector<1x128xf32> -> vector<2x128xf32>
    %c0_31 = arith.constant 0 : index
    %c0_32 = arith.constant 0 : index
    %c0_33 = arith.constant 0 : index
    %c0_34 = arith.constant 0 : index
    %50 = vector.load %arg7[%c0_31, %c0_32, %c0_33, %c0_34] : memref<1x1x2x128xf32, #tpu.memory_space<vmem>>, vector<1x1x2x128xf32>
    %51 = vector.shape_cast %50 : vector<1x1x2x128xf32> to vector<2x128xf32>
    %52 = vector.shape_cast %49 : vector<2x128xf32> to vector<1x1x2x128xf32>
    tpu.vector_store %arg7[%c0_31, %c0_32, %c0_33, %c0_34], %52 {strides = array<i32>} : memref<1x1x2x128xf32, #tpu.memory_space<vmem>>, vector<1x1x2x128xf32>,
    return
  }
  func.func @transform_0(%arg0: i32, %arg1: i32) -> (i32, i32, i32, i32) {
    %c16_i32 = arith.constant 16 : i32
    %0 = arith.muli %arg1, %c16_i32 : i32
    %c1_i32 = arith.constant 1 : i32
    %1 = arith.subi %0, %c1_i32 : i32
    %c0_i32 = arith.constant 0 : i32
    %2 = arith.maxsi %1, %c0_i32 : i32
    %c0_i32_0 = arith.constant 0 : i32
    %c0_i32_1 = arith.constant 0 : i32
    %c0_i32_2 = arith.constant 0 : i32
    return %arg0, %2, %c0_i32_0, %c0_i32_1 : i32, i32, i32, i32
  }
  func.func @transform_1(%arg0: i32, %arg1: i32) -> (i32, i32, i32, i32) {
    %c0_i32 = arith.constant 0 : i32
    %c0_i32_0 = arith.constant 0 : i32
    %c0_i32_1 = arith.constant 0 : i32
    return %arg0, %arg1, %c0_i32, %c0_i32_0 : i32, i32, i32, i32
  }
  func.func @transform_2(%arg0: i32, %arg1: i32) -> (i32, i32, i32, i32) {
    %c16_i32 = arith.constant 16 : i32
    %0 = arith.muli %arg1, %c16_i32 : i32
    %c16_i32_0 = arith.constant 16 : i32
    %1 = arith.addi %0, %c16_i32_0 : i32
    %c15_i32 = arith.constant 15 : i32
    %2 = arith.minsi %1, %c15_i32 : i32
    %c0_i32 = arith.constant 0 : i32
    %c0_i32_1 = arith.constant 0 : i32
    %c0_i32_2 = arith.constant 0 : i32
    return %arg0, %2, %c0_i32, %c0_i32_1 : i32, i32, i32, i32
  }
  func.func @transform_3(%arg0: i32, %arg1: i32) -> (i32, i32, i32) {
    %c0_i32 = arith.constant 0 : i32
    %c0_i32_0 = arith.constant 0 : i32
    %c0_i32_1 = arith.constant 0 : i32
    %c0_i32_2 = arith.constant 0 : i32
    return %c0_i32, %c0_i32_0, %c0_i32_1 : i32, i32, i32
  }
  func.func @transform_4(%arg0: i32, %arg1: i32) -> (i32, i32, i32, i32) {
    %c0_i32 = arith.constant 0 : i32
    %c0_i32_0 = arith.constant 0 : i32
    %c0_i32_1 = arith.constant 0 : i32
    return %arg0, %arg1, %c0_i32, %c0_i32_0 : i32, i32, i32, i32
  }
  func.func @transform_5(%arg0: i32, %arg1: i32) -> (i32, i32, i32, i32) {
    %c0_i32 = arith.constant 0 : i32
    %c0_i32_0 = arith.constant 0 : i32
    %c0_i32_1 = arith.constant 0 : i32
    return %arg0, %arg1, %c0_i32, %c0_i32_0 : i32, i32, i32, i32
  }
}

module attributes {stable_mosaic.version = 11 : i64} {
  func.func @_bn2_add_relu_kernel(%arg0: i32, %arg1: i32, %arg2: memref<1x16x16x128xbf16, #tpu.memory_space<vmem>>, %arg3: memref<1x16x16x128xbf16, #tpu.memory_space<vmem>>, %arg4: memref<1x128xf32, #tpu.memory_space<vmem>>, %arg5: memref<1x128xf32, #tpu.memory_space<vmem>>, %arg6: memref<1x16x16x128xf32, #tpu.memory_space<vmem>>) attributes {dimension_semantics = [#tpu.dimension_semantics<parallel>, #tpu.dimension_semantics<parallel>], iteration_bounds = array<i64: 2, 1>, scalar_prefetch = 0 : i64, scratch_operands = 0 : i64, tpu.core_type = #tpu.core_type<tc>, window_params = [{transform_indices = @transform_0, window_bounds = array<i64: 1, 16, 16, 128>}, {transform_indices = @transform_1, window_bounds = array<i64: 1, 16, 16, 128>}, {pipeline_mode = #tpu.pipeline_mode<synchronous>, transform_indices = @transform_2, window_bounds = array<i64: 1, 128>}, {pipeline_mode = #tpu.pipeline_mode<synchronous>, transform_indices = @transform_3, window_bounds = array<i64: 1, 128>}, {transform_indices = @transform_4, window_bounds = array<i64: 1, 16, 16, 128>}]} {
    %c0 = arith.constant 0 : index
    %c0_0 = arith.constant 0 : index
    %c0_1 = arith.constant 0 : index
    %c0_2 = arith.constant 0 : index
    %0 = vector.load %arg2[%c0, %c0_0, %c0_1, %c0_2] : memref<1x16x16x128xbf16, #tpu.memory_space<vmem>>, vector<1x16x16x128xbf16>
    %1 = vector.shape_cast %0 : vector<1x16x16x128xbf16> to vector<16x16x128xbf16>
    %2 = arith.extf %1 : vector<16x16x128xbf16> to vector<16x16x128xf32>
    %c0_3 = arith.constant 0 : index
    %c0_4 = arith.constant 0 : index
    %3 = vector.load %arg4[%c0_3, %c0_4] : memref<1x128xf32, #tpu.memory_space<vmem>>, vector<1x128xf32>
    %4 = vector.shape_cast %3 : vector<1x128xf32> to vector<1x1x128xf32>
    %5 = vector.broadcast %4 : vector<1x1x128xf32> to vector<16x16x128xf32>
    %6 = arith.mulf %2, %5 : vector<16x16x128xf32>
    %c0_5 = arith.constant 0 : index
    %c0_6 = arith.constant 0 : index
    %7 = vector.load %arg5[%c0_5, %c0_6] : memref<1x128xf32, #tpu.memory_space<vmem>>, vector<1x128xf32>
    %8 = vector.shape_cast %7 : vector<1x128xf32> to vector<1x1x128xf32>
    %9 = vector.broadcast %8 : vector<1x1x128xf32> to vector<16x16x128xf32>
    %10 = arith.addf %6, %9 : vector<16x16x128xf32>
    %c0_7 = arith.constant 0 : index
    %c0_8 = arith.constant 0 : index
    %c0_9 = arith.constant 0 : index
    %c0_10 = arith.constant 0 : index
    %11 = vector.load %arg3[%c0_7, %c0_8, %c0_9, %c0_10] : memref<1x16x16x128xbf16, #tpu.memory_space<vmem>>, vector<1x16x16x128xbf16>
    %12 = vector.shape_cast %11 : vector<1x16x16x128xbf16> to vector<16x16x128xbf16>
    %13 = arith.extf %12 : vector<16x16x128xbf16> to vector<16x16x128xf32>
    %14 = arith.addf %10, %13 : vector<16x16x128xf32>
    %cst = arith.constant 0.000000e+00 : f32
    %15 = vector.broadcast %cst : f32 to vector<16x16x128xf32>
    %16 = arith.maximumf %14, %15 : vector<16x16x128xf32>
    %c0_11 = arith.constant 0 : index
    %c0_12 = arith.constant 0 : index
    %c0_13 = arith.constant 0 : index
    %c0_14 = arith.constant 0 : index
    %17 = vector.load %arg6[%c0_11, %c0_12, %c0_13, %c0_14] : memref<1x16x16x128xf32, #tpu.memory_space<vmem>>, vector<1x16x16x128xf32>
    %18 = vector.shape_cast %17 : vector<1x16x16x128xf32> to vector<16x16x128xf32>
    %19 = vector.shape_cast %16 : vector<16x16x128xf32> to vector<1x16x16x128xf32>
    tpu.vector_store %arg6[%c0_11, %c0_12, %c0_13, %c0_14], %19 {strides = array<i32>} : memref<1x16x16x128xf32, #tpu.memory_space<vmem>>, vector<1x16x16x128xf32>,
    return
  }
  func.func @transform_0(%arg0: i32, %arg1: i32) -> (i32, i32, i32, i32) {
    %c0_i32 = arith.constant 0 : i32
    %c0_i32_0 = arith.constant 0 : i32
    %c0_i32_1 = arith.constant 0 : i32
    return %arg0, %arg1, %c0_i32, %c0_i32_0 : i32, i32, i32, i32
  }
  func.func @transform_1(%arg0: i32, %arg1: i32) -> (i32, i32, i32, i32) {
    %c0_i32 = arith.constant 0 : i32
    %c0_i32_0 = arith.constant 0 : i32
    %c0_i32_1 = arith.constant 0 : i32
    return %arg0, %arg1, %c0_i32, %c0_i32_0 : i32, i32, i32, i32
  }
  func.func @transform_2(%arg0: i32, %arg1: i32) -> (i32, i32) {
    %c0_i32 = arith.constant 0 : i32
    %c0_i32_0 = arith.constant 0 : i32
    %c0_i32_1 = arith.constant 0 : i32
    return %c0_i32, %c0_i32_0 : i32, i32
  }
  func.func @transform_3(%arg0: i32, %arg1: i32) -> (i32, i32) {
    %c0_i32 = arith.constant 0 : i32
    %c0_i32_0 = arith.constant 0 : i32
    %c0_i32_1 = arith.constant 0 : i32
    return %c0_i32, %c0_i32_0 : i32, i32
  }
  func.func @transform_4(%arg0: i32, %arg1: i32) -> (i32, i32, i32, i32) {
    %c0_i32 = arith.constant 0 : i32
    %c0_i32_0 = arith.constant 0 : i32
    %c0_i32_1 = arith.constant 0 : i32
    return %arg0, %arg1, %c0_i32, %c0_i32_0 : i32, i32, i32, i32
  }
}

module attributes {stable_mosaic.version = 11 : i64} {
  func.func @_bn1_conv2_kernel(%arg0: i32, %arg1: i32, %arg2: memref<1x1x16x128xbf16, #tpu.memory_space<vmem>>, %arg3: memref<1x16x16x128xbf16, #tpu.memory_space<vmem>>, %arg4: memref<1x1x16x128xbf16, #tpu.memory_space<vmem>>, %arg5: memref<3x384x128xbf16, #tpu.memory_space<vmem>>, %arg6: memref<1x128xf32, #tpu.memory_space<vmem>>, %arg7: memref<1x128xf32, #tpu.memory_space<vmem>>, %arg8: memref<1x16x16x128xbf16, #tpu.memory_space<vmem>>, %arg9: memref<1x1x2x128xf32, #tpu.memory_space<vmem>>) attributes {dimension_semantics = [#tpu.dimension_semantics<parallel>, #tpu.dimension_semantics<parallel>], iteration_bounds = array<i64: 2, 1>, scalar_prefetch = 0 : i64, scratch_operands = 0 : i64, tpu.core_type = #tpu.core_type<tc>, window_params = [{transform_indices = @transform_0, window_bounds = array<i64: 1, 1, 16, 128>}, {transform_indices = @transform_1, window_bounds = array<i64: 1, 16, 16, 128>}, {transform_indices = @transform_2, window_bounds = array<i64: 1, 1, 16, 128>}, {pipeline_mode = #tpu.pipeline_mode<synchronous>, transform_indices = @transform_3, window_bounds = array<i64: 3, 384, 128>}, {pipeline_mode = #tpu.pipeline_mode<synchronous>, transform_indices = @transform_4, window_bounds = array<i64: 1, 128>}, {pipeline_mode = #tpu.pipeline_mode<synchronous>, transform_indices = @transform_5, window_bounds = array<i64: 1, 128>}, {transform_indices = @transform_6, window_bounds = array<i64: 1, 16, 16, 128>}, {transform_indices = @transform_7, window_bounds = array<i64: 1, 1, 2, 128>}]} {
    %c0 = arith.constant 0 : index
    %c0_0 = arith.constant 0 : index
    %0 = vector.load %arg6[%c0, %c0_0] : memref<1x128xf32, #tpu.memory_space<vmem>>, vector<1x128xf32>
    %c0_1 = arith.constant 0 : index
    %c0_2 = arith.constant 0 : index
    %1 = vector.load %arg7[%c0_1, %c0_2] : memref<1x128xf32, #tpu.memory_space<vmem>>, vector<1x128xf32>
    %c0_i32 = arith.constant 0 : i32
    %2 = arith.cmpi sgt, %arg1, %c0_i32 : i32
    %c0_3 = arith.constant 0 : index
    %c0_4 = arith.constant 0 : index
    %c0_5 = arith.constant 0 : index
    %c0_6 = arith.constant 0 : index
    %3 = vector.load %arg2[%c0_3, %c0_4, %c0_5, %c0_6] : memref<1x1x16x128xbf16, #tpu.memory_space<vmem>>, vector<1x1x16x128xbf16>
    %4 = vector.shape_cast %3 : vector<1x1x16x128xbf16> to vector<1x16x128xbf16>
    %5 = arith.extf %4 : vector<1x16x128xbf16> to vector<1x16x128xf32>
    %6 = vector.shape_cast %0 : vector<1x128xf32> to vector<1x1x128xf32>
    %7 = vector.broadcast %6 : vector<1x1x128xf32> to vector<1x16x128xf32>
    %8 = arith.mulf %5, %7 : vector<1x16x128xf32>
    %9 = vector.shape_cast %1 : vector<1x128xf32> to vector<1x1x128xf32>
    %10 = vector.broadcast %9 : vector<1x1x128xf32> to vector<1x16x128xf32>
    %11 = arith.addf %8, %10 : vector<1x16x128xf32>
    %cst = arith.constant 0.000000e+00 : f32
    %12 = vector.broadcast %cst : f32 to vector<1x16x128xf32>
    %13 = arith.maximumf %11, %12 : vector<1x16x128xf32>
    %cst_7 = arith.constant 0.000000e+00 : f32
    %14 = vector.broadcast %cst_7 : f32 to vector<1x16x128xf32>
    %15 = arith.select %2, %13, %14 : vector<1x16x128xf32>
    %c0_i32_8 = arith.constant 0 : i32
    %16 = arith.cmpi slt, %arg1, %c0_i32_8 : i32
    %c0_9 = arith.constant 0 : index
    %c0_10 = arith.constant 0 : index
    %c0_11 = arith.constant 0 : index
    %c0_12 = arith.constant 0 : index
    %17 = vector.load %arg4[%c0_9, %c0_10, %c0_11, %c0_12] : memref<1x1x16x128xbf16, #tpu.memory_space<vmem>>, vector<1x1x16x128xbf16>
    %18 = vector.shape_cast %17 : vector<1x1x16x128xbf16> to vector<1x16x128xbf16>
    %19 = arith.extf %18 : vector<1x16x128xbf16> to vector<1x16x128xf32>
    %20 = vector.shape_cast %0 : vector<1x128xf32> to vector<1x1x128xf32>
    %21 = vector.broadcast %20 : vector<1x1x128xf32> to vector<1x16x128xf32>
    %22 = arith.mulf %19, %21 : vector<1x16x128xf32>
    %23 = vector.shape_cast %1 : vector<1x128xf32> to vector<1x1x128xf32>
    %24 = vector.broadcast %23 : vector<1x1x128xf32> to vector<1x16x128xf32>
    %25 = arith.addf %22, %24 : vector<1x16x128xf32>
    %cst_13 = arith.constant 0.000000e+00 : f32
    %26 = vector.broadcast %cst_13 : f32 to vector<1x16x128xf32>
    %27 = arith.maximumf %25, %26 : vector<1x16x128xf32>
    %cst_14 = arith.constant 0.000000e+00 : f32
    %28 = vector.broadcast %cst_14 : f32 to vector<1x16x128xf32>
    %29 = arith.select %16, %27, %28 : vector<1x16x128xf32>
    %c0_15 = arith.constant 0 : index
    %c0_16 = arith.constant 0 : index
    %c0_17 = arith.constant 0 : index
    %c0_18 = arith.constant 0 : index
    %30 = vector.load %arg3[%c0_15, %c0_16, %c0_17, %c0_18] : memref<1x16x16x128xbf16, #tpu.memory_space<vmem>>, vector<1x16x16x128xbf16>
    %31 = vector.shape_cast %30 : vector<1x16x16x128xbf16> to vector<16x16x128xbf16>
    %32 = arith.extf %31 : vector<16x16x128xbf16> to vector<16x16x128xf32>
    %33 = vector.shape_cast %0 : vector<1x128xf32> to vector<1x1x128xf32>
    %34 = vector.broadcast %33 : vector<1x1x128xf32> to vector<16x16x128xf32>
    %35 = arith.mulf %32, %34 : vector<16x16x128xf32>
    %36 = vector.shape_cast %1 : vector<1x128xf32> to vector<1x1x128xf32>
    %37 = vector.broadcast %36 : vector<1x1x128xf32> to vector<16x16x128xf32>
    %38 = arith.addf %35, %37 : vector<16x16x128xf32>
    %cst_19 = arith.constant 0.000000e+00 : f32
    %39 = vector.broadcast %cst_19 : f32 to vector<16x16x128xf32>
    %40 = arith.maximumf %38, %39 : vector<16x16x128xf32>
    %41 = tpu.concatenate %15, %40, %29 in 0 : vector<1x16x128xf32>, vector<16x16x128xf32>, vector<1x16x128xf32> -> vector<18x16x128xf32>
    %42 = arith.truncf %41 : vector<18x16x128xf32> to vector<18x16x128xbf16>
    %cst_20 = arith.constant 0.000000e+00 : bf16
    %43 = vector.broadcast %cst_20 : bf16 to vector<18x1x128xbf16>
    %44 = vector.extract_strided_slice %42 {offsets = [0, 0, 0], sizes = [18, 15, 128], strides = [1, 1, 1]} : vector<18x16x128xbf16> to vector<18x15x128xbf16>
    %45 = tpu.concatenate %43, %44 in 1 : vector<18x1x128xbf16>, vector<18x15x128xbf16> -> vector<18x16x128xbf16>
    %46 = vector.extract_strided_slice %42 {offsets = [0, 1, 0], sizes = [18, 15, 128], strides = [1, 1, 1]} : vector<18x16x128xbf16> to vector<18x15x128xbf16>
    %47 = tpu.concatenate %46, %43 in 1 : vector<18x15x128xbf16>, vector<18x1x128xbf16> -> vector<18x16x128xbf16>
    %48 = tpu.concatenate %45, %42, %47 in 2 : vector<18x16x128xbf16>, vector<18x16x128xbf16>, vector<18x16x128xbf16> -> vector<18x16x384xbf16>
    %cst_21 = arith.constant 0.000000e+00 : f32
    %49 = vector.broadcast %cst_21 : f32 to vector<256x128xf32>
    %50 = vector.extract_strided_slice %48 {offsets = [0, 0, 0], sizes = [16, 16, 384], strides = [1, 1, 1]} : vector<18x16x384xbf16> to vector<16x16x384xbf16>
    %51 = vector.shape_cast %50 : vector<16x16x384xbf16> to vector<256x384xbf16>
    %c0_22 = arith.constant 0 : index
    %c0_23 = arith.constant 0 : index
    %c0_24 = arith.constant 0 : index
    %52 = vector.load %arg5[%c0_22, %c0_23, %c0_24] : memref<3x384x128xbf16, #tpu.memory_space<vmem>>, vector<1x384x128xbf16>
    %53 = vector.shape_cast %52 : vector<1x384x128xbf16> to vector<384x128xbf16>
    %cst_25 = arith.constant dense<0.000000e+00> : vector<256x128xf32>
    %54 = tpu.matmul %51, %53, %cst_25 {dimension_numbers = #tpu.dot_dimension_numbers<[1], [0], [0], [1], [0, 0, 1, 1], [], []>} : vector<256x384xbf16>, vector<384x128xbf16>, vector<256x128xf32> -> vector<256x128xf32>
    %55 = arith.addf %49, %54 : vector<256x128xf32>
    %56 = vector.extract_strided_slice %48 {offsets = [1, 0, 0], sizes = [16, 16, 384], strides = [1, 1, 1]} : vector<18x16x384xbf16> to vector<16x16x384xbf16>
    %57 = vector.shape_cast %56 : vector<16x16x384xbf16> to vector<256x384xbf16>
    %c1 = arith.constant 1 : index
    %c0_26 = arith.constant 0 : index
    %c0_27 = arith.constant 0 : index
    %58 = vector.load %arg5[%c1, %c0_26, %c0_27] : memref<3x384x128xbf16, #tpu.memory_space<vmem>>, vector<1x384x128xbf16>
    %59 = vector.shape_cast %58 : vector<1x384x128xbf16> to vector<384x128xbf16>
    %cst_28 = arith.constant dense<0.000000e+00> : vector<256x128xf32>
    %60 = tpu.matmul %57, %59, %cst_28 {dimension_numbers = #tpu.dot_dimension_numbers<[1], [0], [0], [1], [0, 0, 1, 1], [], []>} : vector<256x384xbf16>, vector<384x128xbf16>, vector<256x128xf32> -> vector<256x128xf32>
    %61 = arith.addf %55, %60 : vector<256x128xf32>
    %62 = vector.extract_strided_slice %48 {offsets = [2, 0, 0], sizes = [16, 16, 384], strides = [1, 1, 1]} : vector<18x16x384xbf16> to vector<16x16x384xbf16>
    %63 = vector.shape_cast %62 : vector<16x16x384xbf16> to vector<256x384xbf16>
    %c2 = arith.constant 2 : index
    %c0_29 = arith.constant 0 : index
    %c0_30 = arith.constant 0 : index
    %64 = vector.load %arg5[%c2, %c0_29, %c0_30] : memref<3x384x128xbf16, #tpu.memory_space<vmem>>, vector<1x384x128xbf16>
    %65 = vector.shape_cast %64 : vector<1x384x128xbf16> to vector<384x128xbf16>
    %cst_31 = arith.constant dense<0.000000e+00> : vector<256x128xf32>
    %66 = tpu.matmul %63, %65, %cst_31 {dimension_numbers = #tpu.dot_dimension_numbers<[1], [0], [0], [1], [0, 0, 1, 1], [], []>} : vector<256x384xbf16>, vector<384x128xbf16>, vector<256x128xf32> -> vector<256x128xf32>
    %67 = arith.addf %61, %66 : vector<256x128xf32>
    %68 = vector.shape_cast %67 : vector<256x128xf32> to vector<16x16x128xf32>
    %69 = arith.truncf %68 : vector<16x16x128xf32> to vector<16x16x128xbf16>
    %c0_32 = arith.constant 0 : index
    %c0_33 = arith.constant 0 : index
    %c0_34 = arith.constant 0 : index
    %c0_35 = arith.constant 0 : index
    %70 = vector.load %arg8[%c0_32, %c0_33, %c0_34, %c0_35] : memref<1x16x16x128xbf16, #tpu.memory_space<vmem>>, vector<1x16x16x128xbf16>
    %71 = vector.shape_cast %70 : vector<1x16x16x128xbf16> to vector<16x16x128xbf16>
    %72 = vector.shape_cast %69 : vector<16x16x128xbf16> to vector<1x16x16x128xbf16>
    tpu.vector_store %arg8[%c0_32, %c0_33, %c0_34, %c0_35], %72 {strides = array<i32>} : memref<1x16x16x128xbf16, #tpu.memory_space<vmem>>, vector<1x16x16x128xbf16>,
    %73 = vector.shape_cast %68 : vector<16x16x128xf32> to vector<256x128xf32>
    %cst_36 = arith.constant dense<0.000000e+00> : vector<128xf32>
    %74 = vector.multi_reduction <add>, %73, %cst_36 [0] : vector<256x128xf32> to vector<128xf32>
    %75 = vector.shape_cast %74 : vector<128xf32> to vector<1x128xf32>
    %76 = arith.mulf %73, %73 : vector<256x128xf32>
    %cst_37 = arith.constant dense<0.000000e+00> : vector<128xf32>
    %77 = vector.multi_reduction <add>, %76, %cst_37 [0] : vector<256x128xf32> to vector<128xf32>
    %78 = vector.shape_cast %77 : vector<128xf32> to vector<1x128xf32>
    %79 = tpu.concatenate %75, %78 in 0 : vector<1x128xf32>, vector<1x128xf32> -> vector<2x128xf32>
    %c0_38 = arith.constant 0 : index
    %c0_39 = arith.constant 0 : index
    %c0_40 = arith.constant 0 : index
    %c0_41 = arith.constant 0 : index
    %80 = vector.load %arg9[%c0_38, %c0_39, %c0_40, %c0_41] : memref<1x1x2x128xf32, #tpu.memory_space<vmem>>, vector<1x1x2x128xf32>
    %81 = vector.shape_cast %80 : vector<1x1x2x128xf32> to vector<2x128xf32>
    %82 = vector.shape_cast %79 : vector<2x128xf32> to vector<1x1x2x128xf32>
    tpu.vector_store %arg9[%c0_38, %c0_39, %c0_40, %c0_41], %82 {strides = array<i32>} : memref<1x1x2x128xf32, #tpu.memory_space<vmem>>, vector<1x1x2x128xf32>,
    return
  }
  func.func @transform_0(%arg0: i32, %arg1: i32) -> (i32, i32, i32, i32) {
    %c16_i32 = arith.constant 16 : i32
    %0 = arith.muli %arg1, %c16_i32 : i32
    %c1_i32 = arith.constant 1 : i32
    %1 = arith.subi %0, %c1_i32 : i32
    %c0_i32 = arith.constant 0 : i32
    %2 = arith.maxsi %1, %c0_i32 : i32
    %c0_i32_0 = arith.constant 0 : i32
    %c0_i32_1 = arith.constant 0 : i32
    %c0_i32_2 = arith.constant 0 : i32
    return %arg0, %2, %c0_i32_0, %c0_i32_1 : i32, i32, i32, i32
  }
  func.func @transform_1(%arg0: i32, %arg1: i32) -> (i32, i32, i32, i32) {
    %c0_i32 = arith.constant 0 : i32
    %c0_i32_0 = arith.constant 0 : i32
    %c0_i32_1 = arith.constant 0 : i32
    return %arg0, %arg1, %c0_i32, %c0_i32_0 : i32, i32, i32, i32
  }
  func.func @transform_2(%arg0: i32, %arg1: i32) -> (i32, i32, i32, i32) {
    %c16_i32 = arith.constant 16 : i32
    %0 = arith.muli %arg1, %c16_i32 : i32
    %c16_i32_0 = arith.constant 16 : i32
    %1 = arith.addi %0, %c16_i32_0 : i32
    %c15_i32 = arith.constant 15 : i32
    %2 = arith.minsi %1, %c15_i32 : i32
    %c0_i32 = arith.constant 0 : i32
    %c0_i32_1 = arith.constant 0 : i32
    %c0_i32_2 = arith.constant 0 : i32
    return %arg0, %2, %c0_i32, %c0_i32_1 : i32, i32, i32, i32
  }
  func.func @transform_3(%arg0: i32, %arg1: i32) -> (i32, i32, i32) {
    %c0_i32 = arith.constant 0 : i32
    %c0_i32_0 = arith.constant 0 : i32
    %c0_i32_1 = arith.constant 0 : i32
    %c0_i32_2 = arith.constant 0 : i32
    return %c0_i32, %c0_i32_0, %c0_i32_1 : i32, i32, i32
  }
  func.func @transform_4(%arg0: i32, %arg1: i32) -> (i32, i32) {
    %c0_i32 = arith.constant 0 : i32
    %c0_i32_0 = arith.constant 0 : i32
    %c0_i32_1 = arith.constant 0 : i32
    return %c0_i32, %c0_i32_0 : i32, i32
  }
  func.func @transform_5(%arg0: i32, %arg1: i32) -> (i32, i32) {
    %c0_i32 = arith.constant 0 : i32
    %c0_i32_0 = arith.constant 0 : i32
    %c0_i32_1 = arith.constant 0 : i32
    return %c0_i32, %c0_i32_0 : i32, i32
  }
  func.func @transform_6(%arg0: i32, %arg1: i32) -> (i32, i32, i32, i32) {
    %c0_i32 = arith.constant 0 : i32
    %c0_i32_0 = arith.constant 0 : i32
    %c0_i32_1 = arith.constant 0 : i32
    return %arg0, %arg1, %c0_i32, %c0_i32_0 : i32, i32, i32, i32
  }
  func.func @transform_7(%arg0: i32, %arg1: i32) -> (i32, i32, i32, i32) {
    %c0_i32 = arith.constant 0 : i32
    %c0_i32_0 = arith.constant 0 : i32
    %c0_i32_1 = arith.constant 0 : i32
    return %arg0, %arg1, %c0_i32, %c0_i32_0 : i32, i32, i32, i32
  }
}

</mosaic_0001>

<bundles_post_ra>
// kernel: basic_block_forward.5
= control target key start
LH: loop header
LB: loop body
LE: loop exit
PB: predicated region body
PF: predicated region fallthrough
CT: control target
= control target key end

     0   :  { %s949_s15 = smov 0   ;;  %s951_s16 = smov 0   ;;  %s1133_s0 = inlined_call_operand.vmem [shape: bf16[2,16,16,128], index: 0, kind: input, shape index: {}]   ;;  %s1134_s1 = inlined_call_operand.vmem [shape: bf16[2,16,16,128], index: 1, kind: input, shape index: {}]   ;;  %s1135_s2 = inlined_call_operand.vmem [shape: f32[1,128], index: 2, kind: input, shape index: {}]   ;;  %s1136_s3 = inlined_call_operand.vmem [shape: f32[1,128], index: 3, kind: input, shape index: {}]   ;;  %s1137_s4 = inlined_call_operand.vmem [shape: f32[2,16,16,128], index: 4, kind: output, shape index: {}]  }
   0x1   :  { %s953_s17 = smov 0  }
   0x2 LB: > { %s26_s18 = sadd.s32 1, %s918_s16  ;;  %p704_p0 = scmp.ge.s32.totalorder %s922_s17, 1  ;;  %s922_s17 = sphi %s953_s17, %s14_s17   ;;  %s918_s16 = sphi %s951_s16, %s1139_s16   ;;  %s914_s15 = sphi %s949_s15, %s1138_s15  }
   0x3   : > { %p28_p1 = scmp.ge.s32.totalorder %s26_s18, 2  ;;  %p202_p2 = scmp.lt.s32.totalorder %s922_s17, 3 }
   0x5   : > { %s1141_s18 = smov (%p28_p1, %s26_s18), 0  ;;  %p203_p3 = pnand %p704_p0, %p202_p2 }
   0x6   : > { %p249_p4 = scmp.lt.s32.totalorder (!%p203_p3), %s914_s15, 1  ;;  %v983_v0 = vld [vmem:[%s1135_s2] ss:$0 sm:$0xff] (!%p203_p3) }
   0x7   : > { %206 = sbr.rel (%p203_p3) target bundleno = 72 (0x48), region = 36  ;;  %v994_v11 = vld [vmem:[%s1136_s3] ss:$0 sm:$0xff] (!%p203_p3) }
   0xe   : > { %s1143_s15 = smov (!%p249_p4, %s914_s15), 1 }
   0xf   : > { %s715_s19 = sshll.u32 %s1143_s15, 7  ;;  %s717_s30 = sshll.u32 %s1143_s15, 8 }
  0x10   : > { %s973_s22 = scalar_lea.vmem %s1133_s0, %s715_s19  ;;  %s978_s25 = scalar_lea.vmem %s1134_s1, %s715_s19 }
  0x11   : > { %v719_v1 = vld [vmem:[%s973_s22] sm:$0xff]   ;;  %v846_v3 = vld [vmem:[%s973_s22 + $0x8] sm:$0xff]   ;;  %v847_v9 = vld [vmem:[%s973_s22 + $0x10] sm:$0xff]   ;;  %s1014_s7 = scalar_lea.vmem %s1137_s4, %s717_s30 }
  0x12   : > { %v783_v2 = vld [vmem:[%s978_s25] sm:$0xff]   ;;  %v720_v4 = vunpack.c.l.bf16 %v719_v1  ;;  %v721_v6 = vunpack.c.h.bf16 %v719_v1  ;;  %v861_v8 = vld [vmem:[%s978_s25 + $0x8] sm:$0xff]   ;;  %v862_v10 = vld [vmem:[%s978_s25 + $0x10] sm:$0xff]   ;;  %v724_v12 = vunpack.c.l.bf16 %v846_v3  ;;  %v725_v14 = vunpack.c.h.bf16 %v846_v3 }
  0x13   : > { %v784_v5 = vunpack.c.l.bf16 %v783_v2  ;;  %v785_v7 = vunpack.c.h.bf16 %v783_v2  ;;  %v788_v13 = vunpack.c.l.bf16 %v861_v8  ;;  %v789_v15 = vunpack.c.h.bf16 %v861_v8  ;;  %v848_v16 = vld [vmem:[%s973_s22 + $0x18] sm:$0xff]   ;;  %v849_v42 = vld [vmem:[%s973_s22 + $0x20] sm:$0xff]   ;;  %v850_v52 = vld [vmem:[%s973_s22 + $0x28] sm:$0xff]  }
  0x14   : > { %v352_v17 = vmul.f32 %v720_v4, %v983_v0  ;;  %v353_v18 = vmul.f32 %v721_v6, %v983_v0  ;;  %v728_v19 = vunpack.c.l.bf16 %v847_v9  ;;  %v792_v20 = vunpack.c.l.bf16 %v862_v10  ;;  %v863_v21 = vld [vmem:[%s978_s25 + $0x18] sm:$0xff]   ;;  %v864_v47 = vld [vmem:[%s978_s25 + $0x20] sm:$0xff]   ;;  %v865_v57 = vld [vmem:[%s978_s25 + $0x28] sm:$0xff]  }
  0x15   : > { %v354_v22 = vmul.f32 %v724_v12, %v983_v0  ;;  %v355_v23 = vmul.f32 %v725_v14, %v983_v0  ;;  %v729_v24 = vunpack.c.h.bf16 %v847_v9  ;;  %v793_v25 = vunpack.c.h.bf16 %v862_v10  ;;  %v851_v62 = vld [vmem:[%s973_s22 + $0x30] sm:$0xff]   ;;  %v852_v14 = vld [vmem:[%s973_s22 + $0x38] sm:$0xff]  }
  0x16   : > { %v391_v26 = vadd.f32 %v994_v11, %v352_v17  ;;  %v392_v27 = vadd.f32 %v994_v11, %v353_v18  ;;  %v356_v28 = vmul.f32 %v728_v19, %v983_v0  ;;  %v732_v29 = vunpack.c.l.bf16 %v848_v16  ;;  %v866_v4 = vld [vmem:[%s978_s25 + $0x30] sm:$0xff]  }
  0x17   : > { %v393_v30 = vadd.f32 %v994_v11, %v354_v22  ;;  %v394_v31 = vadd.f32 %v994_v11, %v355_v23  ;;  %v357_v32 = vmul.f32 %v729_v24, %v983_v0  ;;  %v796_v33 = vunpack.c.l.bf16 %v863_v21  ;;  %v867_v23 = vld [vmem:[%s978_s25 + $0x38] sm:$0xff]  }
  0x18   : > { %v487_v34 = vadd.f32 %v784_v5, %v391_v26  ;;  %v488_v35 = vadd.f32 %v785_v7, %v392_v27  ;;  %v395_v36 = vadd.f32 %v994_v11, %v356_v28  ;;  %v358_v37 = vmul.f32 %v732_v29, %v983_v0 }
  0x19   : > { %v489_v38 = vadd.f32 %v788_v13, %v393_v30  ;;  %v490_v39 = vadd.f32 %v789_v15, %v394_v31  ;;  %v396_v40 = vadd.f32 %v994_v11, %v357_v32  ;;  %v733_v41 = vunpack.c.h.bf16 %v848_v16  ;;  %v853_v32 = vld [vmem:[%s973_s22 + $0x40] sm:$0xff]  }
  0x1a   : > { %v519_v43 = vmax.f32 %v487_v34, 0.0  ;;  %v520_v44 = vmax.f32 %v488_v35, 0.0  ;;  %v491_v45 = vadd.f32 %v792_v20, %v395_v36  ;;  %v397_v46 = vadd.f32 %v994_v11, %v358_v37  ;;  %v868_v37 = vld [vmem:[%s978_s25 + $0x40] sm:$0xff]  }
  0x1b   : > { %v521_v48 = vmax.f32 %v489_v38, 0.0  ;;  %v522_v49 = vmax.f32 %v490_v39, 0.0  ;;  %v492_v50 = vadd.f32 %v793_v25, %v396_v40  ;;  %v359_v51 = vmul.f32 %v733_v41, %v983_v0 }
  0x1c   : > { %551 = vst [vmem:[%s1014_s7] sm:$0xff] %v519_v43  ;;  %552 = vst [vmem:[%s1014_s7 + $0x8] sm:$0xff] %v520_v44  ;;  %v523_v53 = vmax.f32 %v491_v45, 0.0  ;;  %v493_v54 = vadd.f32 %v796_v33, %v397_v46  ;;  %v797_v55 = vunpack.c.h.bf16 %v863_v21  ;;  %v736_v56 = vunpack.c.l.bf16 %v849_v42  ;;  %v854_v46 = vld [vmem:[%s973_s22 + $0x48] sm:$0xff]  }
  0x1d   : > { %553 = vst [vmem:[%s1014_s7 + $0x10] sm:$0xff] %v521_v48  ;;  %554 = vst [vmem:[%s1014_s7 + $0x18] sm:$0xff] %v522_v49  ;;  %v524_v58 = vmax.f32 %v492_v50, 0.0  ;;  %v398_v59 = vadd.f32 %v994_v11, %v359_v51  ;;  %v800_v60 = vunpack.c.l.bf16 %v864_v47  ;;  %v737_v61 = vunpack.c.h.bf16 %v849_v42 }
  0x1e   : > { %555 = vst [vmem:[%s1014_s7 + $0x20] sm:$0xff] %v523_v53  ;;  %v525_v63 = vmax.f32 %v493_v54, 0.0  ;;  %v360_v1 = vmul.f32 %v736_v56, %v983_v0  ;;  %v801_v2 = vunpack.c.h.bf16 %v864_v47  ;;  %v740_v3 = vunpack.c.l.bf16 %v850_v52  ;;  %v869_v47 = vld [vmem:[%s978_s25 + $0x48] sm:$0xff]   ;;  %v855_v56 = vld [vmem:[%s973_s22 + $0x50] sm:$0xff]  }
  0x1f   : > { %556 = vst [vmem:[%s1014_s7 + $0x28] sm:$0xff] %v524_v58  ;;  %v494_v5 = vadd.f32 %v797_v55, %v398_v59  ;;  %v361_v6 = vmul.f32 %v737_v61, %v983_v0  ;;  %v804_v7 = vunpack.c.l.bf16 %v865_v57  ;;  %v741_v8 = vunpack.c.h.bf16 %v850_v52  ;;  %v870_v61 = vld [vmem:[%s978_s25 + $0x50] sm:$0xff]  }
  0x20   : > { %557 = vst [vmem:[%s1014_s7 + $0x30] sm:$0xff] %v525_v63  ;;  %v399_v9 = vadd.f32 %v994_v11, %v360_v1  ;;  %v362_v10 = vmul.f32 %v740_v3, %v983_v0  ;;  %v805_v12 = vunpack.c.h.bf16 %v865_v57  ;;  %v744_v13 = vunpack.c.l.bf16 %v851_v62 }
  0x21   : > { %v526_v15 = vmax.f32 %v494_v5, 0.0  ;;  %v400_v16 = vadd.f32 %v994_v11, %v361_v6  ;;  %v363_v17 = vmul.f32 %v741_v8, %v983_v0  ;;  %v808_v18 = vunpack.c.l.bf16 %v866_v4 }
  0x22   : > { %v495_v19 = vadd.f32 %v800_v60, %v399_v9  ;;  %v401_v20 = vadd.f32 %v994_v11, %v362_v10  ;;  %v364_v21 = vmul.f32 %v744_v13, %v983_v0  ;;  %v745_v22 = vunpack.c.h.bf16 %v851_v62 }
  0x23   : > { %558 = vst [vmem:[%s1014_s7 + $0x38] sm:$0xff] %v526_v15  ;;  %v496_v24 = vadd.f32 %v801_v2, %v400_v16  ;;  %v402_v25 = vadd.f32 %v994_v11, %v363_v17  ;;  %v809_v26 = vunpack.c.h.bf16 %v866_v4  ;;  %v748_v27 = vunpack.c.l.bf16 %v852_v14  ;;  %v871_v17 = vld [vmem:[%s978_s25 + $0x58] sm:$0xff]  }
  0x24   : > { %v527_v28 = vmax.f32 %v495_v19, 0.0  ;;  %v497_v29 = vadd.f32 %v804_v7, %v401_v20  ;;  %v403_v30 = vadd.f32 %v994_v11, %v364_v21  ;;  %v365_v31 = vmul.f32 %v745_v22, %v983_v0 }
  0x25   : > { %v528_v33 = vmax.f32 %v496_v24, 0.0  ;;  %v498_v34 = vadd.f32 %v805_v12, %v402_v25  ;;  %v366_v35 = vmul.f32 %v748_v27, %v983_v0  ;;  %v812_v36 = vunpack.c.l.bf16 %v867_v23  ;;  %v856_v12 = vld [vmem:[%s973_s22 + $0x58] sm:$0xff]  }
  0x26   : > { %559 = vst [vmem:[%s1014_s7 + $0x40] sm:$0xff] %v527_v28  ;;  %v529_v38 = vmax.f32 %v497_v29, 0.0  ;;  %v499_v39 = vadd.f32 %v808_v18, %v403_v30  ;;  %v404_v40 = vadd.f32 %v994_v11, %v365_v31  ;;  %v749_v41 = vunpack.c.h.bf16 %v852_v14  ;;  %v872_v31 = vld [vmem:[%s978_s25 + $0x60] sm:$0xff]  }
  0x27   : > { %560 = vst [vmem:[%s1014_s7 + $0x48] sm:$0xff] %v528_v33  ;;  %v530_v42 = vmax.f32 %v498_v34, 0.0  ;;  %v405_v43 = vadd.f32 %v994_v11, %v366_v35  ;;  %v813_v44 = vunpack.c.h.bf16 %v867_v23  ;;  %v752_v45 = vunpack.c.l.bf16 %v853_v32 }
  0x28   : > { %561 = vst [vmem:[%s1014_s7 + $0x50] sm:$0xff] %v529_v38  ;;  %v531_v48 = vmax.f32 %v499_v39, 0.0  ;;  %v500_v49 = vadd.f32 %v809_v26, %v404_v40  ;;  %v367_v50 = vmul.f32 %v749_v41, %v983_v0  ;;  %v816_v51 = vunpack.c.l.bf16 %v868_v37  ;;  %v857_v26 = vld [vmem:[%s973_s22 + $0x60] sm:$0xff]   ;;  %v858_v40 = vld [vmem:[%s973_s22 + $0x68] sm:$0xff]  }
  0x29   : > { %562 = vst [vmem:[%s1014_s7 + $0x58] sm:$0xff] %v530_v42  ;;  %v501_v52 = vadd.f32 %v812_v36, %v405_v43  ;;  %v368_v53 = vmul.f32 %v752_v45, %v983_v0  ;;  %v753_v54 = vunpack.c.h.bf16 %v853_v32  ;;  %v817_v55 = vunpack.c.h.bf16 %v868_v37  ;;  %v873_v41 = vld [vmem:[%s978_s25 + $0x68] sm:$0xff]  }
  0x2a   : > { %563 = vst [vmem:[%s1014_s7 + $0x60] sm:$0xff] %v531_v48  ;;  %v532_v57 = vmax.f32 %v500_v49, 0.0  ;;  %v406_v58 = vadd.f32 %v994_v11, %v367_v50  ;;  %v756_v59 = vunpack.c.l.bf16 %v854_v46  ;;  %v820_v60 = vunpack.c.l.bf16 %v869_v47  ;;  %v859_v50 = vld [vmem:[%s973_s22 + $0x70] sm:$0xff]  }
  0x2b   : > { %v533_v62 = vmax.f32 %v501_v52, 0.0  ;;  %v407_v63 = vadd.f32 %v994_v11, %v368_v53  ;;  %v369_v1 = vmul.f32 %v753_v54, %v983_v0  ;;  %v757_v2 = vunpack.c.h.bf16 %v854_v46 }
  0x2c   : > { %564 = vst [vmem:[%s1014_s7 + $0x68] sm:$0xff] %v532_v57  ;;  %v502_v3 = vadd.f32 %v813_v44, %v406_v58  ;;  %v370_v4 = vmul.f32 %v756_v59, %v983_v0  ;;  %v821_v5 = vunpack.c.h.bf16 %v869_v47  ;;  %v760_v6 = vunpack.c.l.bf16 %v855_v56  ;;  %v874_v59 = vld [vmem:[%s978_s25 + $0x70] sm:$0xff]  }
  0x2d   : > { %565 = vst [vmem:[%s1014_s7 + $0x70] sm:$0xff] %v533_v62  ;;  %v503_v7 = vadd.f32 %v816_v51, %v407_v63  ;;  %v408_v8 = vadd.f32 %v994_v11, %v369_v1  ;;  %v371_v9 = vmul.f32 %v757_v2, %v983_v0  ;;  %v824_v10 = vunpack.c.l.bf16 %v870_v61 }
  0x2e   : > { %v534_v13 = vmax.f32 %v502_v3, 0.0  ;;  %v409_v14 = vadd.f32 %v994_v11, %v370_v4  ;;  %v372_v15 = vmul.f32 %v760_v6, %v983_v0  ;;  %v761_v16 = vunpack.c.h.bf16 %v855_v56 }
  0x2f   : > { %v535_v18 = vmax.f32 %v503_v7, 0.0  ;;  %v504_v19 = vadd.f32 %v817_v55, %v408_v8  ;;  %v410_v20 = vadd.f32 %v994_v11, %v371_v9  ;;  %v825_v21 = vunpack.c.h.bf16 %v870_v61 }
  0x30   : > { %566 = vst [vmem:[%s1014_s7 + $0x78] sm:$0xff] %v534_v13  ;;  %v505_v22 = vadd.f32 %v820_v60, %v409_v14  ;;  %v411_v23 = vadd.f32 %v994_v11, %v372_v15  ;;  %v373_v24 = vmul.f32 %v761_v16, %v983_v0  ;;  %v764_v25 = vunpack.c.l.bf16 %v856_v12 }
  0x31   : > { %567 = vst [vmem:[%s1014_s7 + $0x80] sm:$0xff] %v535_v18  ;;  %v536_v27 = vmax.f32 %v504_v19, 0.0  ;;  %v506_v28 = vadd.f32 %v821_v5, %v410_v20  ;;  %v828_v29 = vunpack.c.l.bf16 %v871_v17  ;;  %v765_v30 = vunpack.c.h.bf16 %v856_v12  ;;  %v860_v5 = vld [vmem:[%s973_s22 + $0x78] sm:$0xff]  }
  0x32   : > { %v537_v32 = vmax.f32 %v505_v22, 0.0  ;;  %v507_v33 = vadd.f32 %v824_v10, %v411_v23  ;;  %v412_v34 = vadd.f32 %v994_v11, %v373_v24  ;;  %v374_v35 = vmul.f32 %v764_v25, %v983_v0  ;;  %v875_v10 = vld [vmem:[%s978_s25 + $0x78] sm:$0xff]  }
  0x33   : > { %568 = vst [vmem:[%s1014_s7 + $0x88] sm:$0xff] %v536_v27  ;;  %v538_v36 = vmax.f32 %v506_v28, 0.0  ;;  %v375_v37 = vmul.f32 %v765_v30, %v983_v0  ;;  %v829_v38 = vunpack.c.h.bf16 %v871_v17  ;;  %v768_v39 = vunpack.c.l.bf16 %v857_v26 }
  0x34   : > { %569 = vst [vmem:[%s1014_s7 + $0x90] sm:$0xff] %v537_v32  ;;  %v539_v42 = vmax.f32 %v507_v33, 0.0  ;;  %v508_v43 = vadd.f32 %v825_v21, %v412_v34  ;;  %v413_v44 = vadd.f32 %v994_v11, %v374_v35  ;;  %v832_v45 = vunpack.c.l.bf16 %v872_v31 }
  0x35   : > { %570 = vst [vmem:[%s1014_s7 + $0x98] sm:$0xff] %v538_v36  ;;  %v414_v46 = vadd.f32 %v994_v11, %v375_v37  ;;  %v376_v47 = vmul.f32 %v768_v39, %v983_v0  ;;  %v769_v48 = vunpack.c.h.bf16 %v857_v26  ;;  %v833_v49 = vunpack.c.h.bf16 %v872_v31 }
  0x36   : > { %571 = vst [vmem:[%s1014_s7 + $0xa0] sm:$0xff] %v539_v42  ;;  %v540_v51 = vmax.f32 %v508_v43, 0.0  ;;  %v509_v52 = vadd.f32 %v828_v29, %v413_v44  ;;  %v772_v53 = vunpack.c.l.bf16 %v858_v40  ;;  %v836_v54 = vunpack.c.l.bf16 %v873_v41 }
  0x37   : > { %v510_v55 = vadd.f32 %v829_v38, %v414_v46  ;;  %v415_v56 = vadd.f32 %v994_v11, %v376_v47  ;;  %v377_v57 = vmul.f32 %v769_v48, %v983_v0  ;;  %v773_v58 = vunpack.c.h.bf16 %v858_v40 }
  0x38   : > { %572 = vst [vmem:[%s1014_s7 + $0xa8] sm:$0xff] %v540_v51  ;;  %v541_v60 = vmax.f32 %v509_v52, 0.0  ;;  %v378_v61 = vmul.f32 %v772_v53, %v983_v0  ;;  %v837_v62 = vunpack.c.h.bf16 %v873_v41  ;;  %v776_v63 = vunpack.c.l.bf16 %v859_v50 }
  0x39   : > { %v542_v1 = vmax.f32 %v510_v55, 0.0  ;;  %v511_v2 = vadd.f32 %v832_v45, %v415_v56  ;;  %v416_v3 = vadd.f32 %v994_v11, %v377_v57  ;;  %v379_v4 = vmul.f32 %v773_v58, %v983_v0 }
  0x3a   : > { %573 = vst [vmem:[%s1014_s7 + $0xb0] sm:$0xff] %v541_v60  ;;  %v417_v6 = vadd.f32 %v994_v11, %v378_v61  ;;  %v380_v7 = vmul.f32 %v776_v63, %v983_v0  ;;  %v840_v8 = vunpack.c.l.bf16 %v874_v59  ;;  %v777_v9 = vunpack.c.h.bf16 %v859_v50 }
  0x3b   : > { %574 = vst [vmem:[%s1014_s7 + $0xb8] sm:$0xff] %v542_v1  ;;  %v543_v12 = vmax.f32 %v511_v2, 0.0  ;;  %v512_v13 = vadd.f32 %v833_v49, %v416_v3  ;;  %v418_v14 = vadd.f32 %v994_v11, %v379_v4  ;;  %v841_v15 = vunpack.c.h.bf16 %v874_v59 }
  0x3c   : > { %v513_v16 = vadd.f32 %v836_v54, %v417_v6  ;;  %v419_v17 = vadd.f32 %v994_v11, %v380_v7  ;;  %v381_v18 = vmul.f32 %v777_v9, %v983_v0  ;;  %v780_v19 = vunpack.c.l.bf16 %v860_v5 }
  0x3d   : > { %575 = vst [vmem:[%s1014_s7 + $0xc0] sm:$0xff] %v543_v12  ;;  %v544_v20 = vmax.f32 %v512_v13, 0.0  ;;  %v514_v21 = vadd.f32 %v837_v62, %v418_v14  ;;  %v844_v22 = vunpack.c.l.bf16 %v875_v10  ;;  %v781_v23 = vunpack.c.h.bf16 %v860_v5 }
  0x3e   : > { %v545_v24 = vmax.f32 %v513_v16, 0.0  ;;  %v515_v25 = vadd.f32 %v840_v8, %v419_v17  ;;  %v420_v26 = vadd.f32 %v994_v11, %v381_v18  ;;  %v382_v27 = vmul.f32 %v780_v19, %v983_v0 }
  0x3f   : > { %576 = vst [vmem:[%s1014_s7 + $0xc8] sm:$0xff] %v544_v20  ;;  %v546_v28 = vmax.f32 %v514_v21, 0.0  ;;  %v383_v29 = vmul.f32 %v781_v23, %v983_v0  ;;  %v845_v30 = vunpack.c.h.bf16 %v875_v10 }
  0x40   : > { %577 = vst [vmem:[%s1014_s7 + $0xd0] sm:$0xff] %v545_v24  ;;  %v547_v31 = vmax.f32 %v515_v25, 0.0  ;;  %v516_v32 = vadd.f32 %v841_v15, %v420_v26  ;;  %v421_v33 = vadd.f32 %v994_v11, %v382_v27 }
  0x41   : > { %578 = vst [vmem:[%s1014_s7 + $0xd8] sm:$0xff] %v546_v28  ;;  %v422_v34 = vadd.f32 %v994_v11, %v383_v29 }
  0x42   : > { %579 = vst [vmem:[%s1014_s7 + $0xe0] sm:$0xff] %v547_v31  ;;  %v548_v35 = vmax.f32 %v516_v32, 0.0  ;;  %v517_v36 = vadd.f32 %v844_v22, %v421_v33 }
  0x43   : > { %v518_v37 = vadd.f32 %v845_v30, %v422_v34 }
  0x44   : > { %580 = vst [vmem:[%s1014_s7 + $0xe8] sm:$0xff] %v548_v35  ;;  %v549_v38 = vmax.f32 %v517_v36, 0.0 }
  0x45   : > { %v550_v39 = vmax.f32 %v518_v37, 0.0 }
  0x46   : > { %581 = vst [vmem:[%s1014_s7 + $0xf0] sm:$0xff] %v549_v38 }
  0x47   : > { %582 = vst [vmem:[%s1014_s7 + $0xf8] sm:$0xff] %v550_v39 }
  0x48 PF: > { %s14_s17 = sadd.s32 1, %s922_s17   ;;  %s1138_s15 = smov %s918_s16 }
  0x49   : > { %p11_p5 = scmp.ge.s32.totalorder %s14_s17, 4   ;;  %s1139_s16 = smov %s1141_s18 }
  0x4b   :  { %13 = sbr.rel (!%p11_p5) target bundleno = 2 (0x2), region = 69 }

// kernel: basic_block_forward.3
= control target key start
LH: loop header
LB: loop body
LE: loop exit
PB: predicated region body
PF: predicated region fallthrough
CT: control target
= control target key end

     0   :  { %s4097_s18 = smov 0   ;;  %s4099_s19 = smov 0   ;;  %s5194_s0 = inlined_call_operand.vmem [shape: bf16[2,16,16,128], index: 0, kind: input, shape index: {}, may-alias: {0,1,2}]   ;;  %s5195_s1 = inlined_call_operand.vmem [shape: bf16[2,16,16,128], index: 1, kind: input, shape index: {}, may-alias: {0,1,2}]   ;;  %s5196_s2 = inlined_call_operand.vmem [shape: bf16[2,16,16,128], index: 2, kind: input, shape index: {}, may-alias: {0,1,2}]   ;;  %s5197_s3 = inlined_call_operand.vmem [shape: bf16[3,384,128], index: 3, kind: input, shape index: {}]   ;;  %s5198_s4 = inlined_call_operand.vmem [shape: bf16[2,16,16,128], index: 4, kind: output, shape index: {0}]   ;;  %s5199_s5 = inlined_call_operand.vmem [shape: f32[2,1,2,128], index: 5, kind: output, shape index: {1}]  }
   0x1   :  { %s4101_s0 = smov 0  }
   0x2 LB: > { %s28_s2 = sadd.s32 1, %s4060_s19  ;;  %p2837_p0 = scmp.ge.s32.totalorder %s4064_s0, 1  ;;  %s4064_s0 = sphi %s4101_s0, %s16_s0   ;;  %s4060_s19 = sphi %s4099_s19, %s5219_s19   ;;  %s4056_s18 = sphi %s4097_s18, %s5218_s18  }
   0x3   : > { %p30_p1 = scmp.ge.s32.totalorder %s28_s2, 2  ;;  %p278_p2 = scmp.lt.s32.totalorder %s4064_s0, 3 }
   0x5   : > { %s5221_s2 = smov (%p30_p1, %s28_s2), 0  ;;  %p279_p3 = pnand %p2837_p0, %p278_p2 }
   0x7   : > { %282 = sbr.rel (%p279_p3) target bundleno = 570 (0x23a), region = 36 }
   0xe   : > { %v3952_v0 = vld [vmem:[%s5197_s3 + $0x100] sm:$0xff]   ;;  %v3955_v3 = vld [vmem:[%s5197_s3 + $0x108] sm:$0xff]   ;;  %v3958_v6 = vld [vmem:[%s5197_s3 + $0x110] sm:$0xff]   ;;  %p367_p4 = scmp.lt.s32.totalorder %s4056_s18, 1  ;;  %vm770_vm0 = vcmask 1047552   ;;  %vm695_vm1 = vcmask 1040384  }
   0xf   : > { %v4123_v1 = vld [vmem:[%s5197_s3 + $0x140] sm:$0xff]   ;;  %3199 = vmatprep.subr.bf16.mxu0 %v3952_v0  ;;  %v4136_v4 = vld [vmem:[%s5197_s3 + $0x148] sm:$0xff]   ;;  %v4148_v7 = vld [vmem:[%s5197_s3 + $0x150] sm:$0xff]   ;;  %vm771_vm2 = vsmask.f32 7424 }
  0x10   : > { %v3954_v2 = vld [vmem:[%s5197_s3 + $0xc0] sm:$0xff]   ;;  %3751 = vmatprep.subr.bf16.mxu1 %v4123_v1  ;;  %v3957_v5 = vld [vmem:[%s5197_s3 + $0xc8] sm:$0xff]   ;;  %v3960_v8 = vld [vmem:[%s5197_s3 + $0xd0] sm:$0xff]   ;;  %s5223_s18 = smov (!%p367_p4, %s4056_s18), 1  ;;  %vm696_vm3 = vsmask.f32 256 }
  0x11   : > { %3200 = vmatpush3.bf16.msra.mxu0 %v3954_v2  ;;  %3759 = vmatpush3.bf16.msra.mxu1 %v4123_v1  ;;  %v3961_v9 = vld [vmem:[%s5197_s3 + $0x118] sm:$0xff]   ;;  %v3964_v12 = vld [vmem:[%s5197_s3 + $0x120] sm:$0xff]   ;;  %v3967_v15 = vld [vmem:[%s5197_s3 + $0x128] sm:$0xff]   ;;  %s3068_s6 = sshll.u32 %s5223_s18, 7 }
  0x12   : > { %3201 = vmatprep.subr.bf16.mxu0 %v3955_v3  ;;  %3752 = vmatprep.subr.bf16.mxu1 %v4136_v4  ;;  %v4161_v10 = vld [vmem:[%s5197_s3 + $0x158] sm:$0xff]   ;;  %v4175_v13 = vld [vmem:[%s5197_s3 + $0x160] sm:$0xff]   ;;  %v4191_v16 = vld [vmem:[%s5197_s3 + $0x168] sm:$0xff]   ;;  %s4212_s15 = scalar_lea.vmem %s5195_s1, %s3068_s6  ;;  %s5118_s16 = scalar_lea.vmem %s5198_s4, %s3068_s6 }
  0x13   : > { %v3963_v11 = vld [vmem:[%s5197_s3 + $0xd8] sm:$0xff]   ;;  %v3966_v14 = vld [vmem:[%s5197_s3 + $0xe0] sm:$0xff]   ;;  %v3969_v17 = vld [vmem:[%s5197_s3 + $0xe8] sm:$0xff]   ;;  %s2846_s6 = sshll.u32 %s5223_s18, 1 }
  0x14   : > { %v3970_v18 = vld [vmem:[%s5197_s3 + $0x130] sm:$0xff]   ;;  %v3973_v21 = vld [vmem:[%s5197_s3 + $0x138] sm:$0xff]   ;;  %v4227_v23 = vld [vmem:[%s4212_s15] sm:$0xff]   ;;  %s411_s21 = scalar_lea.vmem %s5199_s5, %s2846_s6 }
  0x15   : > { %3202 = vmatpush3.bf16.msra.mxu0 %v3957_v5  ;;  %3760 = vmatpush3.bf16.msra.mxu1 %v4136_v4  ;;  %v4205_v19 = vld [vmem:[%s5197_s3 + $0x170] sm:$0xff]   ;;  %v4223_v22 = vld [vmem:[%s5197_s3 + $0x178] sm:$0xff]   ;;  %v4231_v24 = vld [vmem:[%s4212_s15 + $0x40] sm:$0xff]   ;;  %v559_v26 = vshrl.u32 %v4227_v23, 16  ;;  %v562_v27 = vshll.u32 %v4227_v23, 16  ;;  %v4066_v5 = vmov 0  }
  0x16   : > { %3203 = vmatprep.subr.bf16.mxu0 %v3958_v6  ;;  %3753 = vmatprep.subr.bf16.mxu1 %v4148_v7  ;;  %v3972_v20 = vld [vmem:[%s5197_s3 + $0xf0] sm:$0xff]   ;;  %v3975_v25 = vld [vmem:[%s5197_s3 + $0xf8] sm:$0xff]   ;;  %v615_v28 = vshrl.u32 %v4231_v24, 16  ;;  %v618_v29 = vshll.u32 %v4231_v24, 16  ;;  %vm4245_vm4 = vmand %vm695_vm1, %vm696_vm3  ;;  %v4340_v6 = vcombine.low %v4066_v5, %v4066_v5 }
  0x17   : > { %1082 = vmatprep.mubr.bf16.mxu0 %v4227_v23  ;;  %v561_v30 = vrot.slane %v559_v26, 7  ;;  %v4250_v32 = vld [vmem:[%s4212_s15 + $0x48] sm:$0xff]   ;;  %v3979_v34 = vld [vmem:[%s5197_s3 + $0x40] sm:$0xff]   ;;  %vm4260_vm5 = vmand %vm770_vm0, %vm771_vm2 }
  0x18   : > { %v734_v33 = vrot.slane %v618_v29, 1  ;;  %v622_v37 = vshrl.u32 %v4250_v32, 16  ;;  %v625_v38 = vshll.u32 %v4250_v32, 16  ;;  %v3980_v42 = vld [vmem:[%s5197_s3] sm:$0xff]   ;;  %v4281_v43 = vld [vmem:[%s4212_s15 + $0x8] sm:$0xff]   ;;  %v4292_v46 = vld [vmem:[%s4212_s15 + $0x50] sm:$0xff]  }
  0x19   : > { %3204 = vmatpush3.bf16.msra.mxu0 %v3960_v8  ;;  %3761 = vmatpush3.bf16.msra.mxu1 %v4148_v7  ;;  %v564_v36 = vor.u32 %v562_v27, %v561_v30  ;;  %v3981_v45 = vld [vmem:[%s5197_s3 + $0x48] sm:$0xff]   ;;  %v566_v48 = vshrl.u32 %v4281_v43, 16  ;;  %v569_v49 = vshll.u32 %v4281_v43, 16  ;;  %v629_v50 = vshrl.u32 %v4292_v46, 16  ;;  %v4309_v55 = vld [vmem:[%s4212_s15 + $0x58] sm:$0xff]   ;;  %v3986_v61 = vld [vmem:[%s5197_s3 + $0x50] sm:$0xff]  }
  0x1a   : > { %3205 = vmatprep.subr.bf16.mxu0 %v3961_v9  ;;  %3754 = vmatprep.subr.bf16.mxu1 %v4161_v10  ;;  %v735_v39 = vor.u32 %v734_v33, %v615_v28  ;;  %v736_v41 = vrot.slane %v625_v38, 1  ;;  %v632_v51 = vshll.u32 %v4292_v46, 16  ;;  %v3982_v57 = vld [vmem:[%s5197_s3 + $0x8] sm:$0xff]   ;;  %v636_v59 = vshrl.u32 %v4309_v55, 16  ;;  %v3987_v2 = vld [vmem:[%s5197_s3 + $0x10] sm:$0xff]   ;;  %v3988_v9 = vld [vmem:[%s5197_s3 + $0x58] sm:$0xff]  }
  0x1b   : > { %v4273_v40 = vsel %vm4245_vm4, 0, %v564_v36  ;;  %v568_v53 = vrot.slane %v566_v48, 7  ;;  %v720_v54 = vrot.slane %v569_v49, 1  ;;  %v639_v60 = vshll.u32 %v4309_v55, 16  ;;  %v4337_v3 = vld [vmem:[%s4212_s15 + $0x10] sm:$0xff]   ;;  %v3989_v30 = vld [vmem:[%s5197_s3 + $0x18] sm:$0xff]  }
  0x1c   : > { %v4285_v44 = vsel %vm4260_vm5, %v735_v39, 0  ;;  %v737_v47 = vor.u32 %v736_v41, %v622_v37  ;;  %v738_v56 = vrot.slane %v632_v51, 1  ;;  %v3993_v41 = vld [vmem:[%s5197_s3 + $0x60] sm:$0xff]   ;;  %v4430_v5 = vld [vmem:[%s4212_s15 + $0x78] sm:$0xff]   ;;  %v4033_v35 = vld [vmem:[%s5197_s3 + $0x208] sm:$0xff]  }
  0x1d   : > { %3206 = vmatpush3.bf16.msra.mxu0 %v3963_v11  ;;  %3762 = vmatpush3.bf16.msra.mxu1 %v4161_v10  ;;  %v571_v58 = vor.u32 %v569_v49, %v568_v53  ;;  %v4323_v62 = vor.u32 %v720_v54, %v566_v48  ;;  %v4350_v11 = vld [vmem:[%s4212_s15 + $0x60] sm:$0xff]   ;;  %v4400_v49 = vld [vmem:[%s4212_s15 + $0x18] sm:$0xff]   ;;  %v3995_v54 = vld [vmem:[%s5197_s3 + $0x68] sm:$0xff]  }
  0x1e   : > { %3207 = vmatprep.subr.bf16.mxu0 %v3964_v12  ;;  %3755 = vmatprep.subr.bf16.mxu1 %v4175_v13  ;;  %v4304_v52 = vsel %vm4260_vm5, %v737_v47, 0  ;;  %v739_v63 = vor.u32 %v738_v56, %v629_v50  ;;  %v5205_v12 = vshrl.u32 %v4337_v3, 16  ;;  %v3994_v48 = vld [vmem:[%s5197_s3 + $0x20] sm:$0xff]   ;;  %v4411_v56 = vld [vmem:[%s4212_s15 + $0x70] sm:$0xff]  }
  0x1f   : > { %3639 = vmatprep.mubr.bf16.mxu1 %v4285_v44  ;;  %v4329_v0 = vsel %vm4245_vm4, 0, %v571_v58  ;;  %v583_v58 = vshll.u32 %v4400_v49, 16  ;;  %v4699_v31 = vld [vmem:[%s5197_s3 + $0x200] sm:$0xff]  }
  0x20   : > { %v4344_v8 = vsel %vm4260_vm5, %v739_v63, 0  ;;  %v660_v63 = vshll.u32 %v4411_v56, 16 }
  0x21   : > { %3208 = vmatpush3.bf16.msra.mxu0 %v3966_v14  ;;  %3763 = vmatpush3.bf16.msra.mxu1 %v4175_v13  ;;  %v576_v14 = vshll.u32 %v4337_v3, 16 }
  0x22   : > { %3209 = vmatprep.subr.bf16.mxu0 %v3967_v15  ;;  %3756 = vmatprep.subr.bf16.mxu1 %v4191_v16  ;;  %v643_v15 = vshrl.u32 %v4350_v11, 16 }
  0x25   : > { %3210 = vmatpush3.bf16.msra.mxu0 %v3969_v17  ;;  %3764 = vmatpush3.bf16.msra.mxu1 %v4191_v16  ;;  %v646_v17 = vshll.u32 %v4350_v11, 16 }
  0x26   : > { %3211 = vmatprep.subr.bf16.mxu0 %v3970_v18  ;;  %3757 = vmatprep.subr.bf16.mxu1 %v4205_v19 }
  0x27   : > { %v742_v33 = vrot.slane %v646_v17, 1 }
  0x29   : > { %3212 = vmatpush3.bf16.msra.mxu0 %v3972_v20  ;;  %3765 = vmatpush3.bf16.msra.mxu1 %v4205_v19  ;;  %v575_v20 = vrot.slane %v5205_v12, 7  ;;  %v743_v39 = vor.u32 %v742_v33, %v643_v15  ;;  %v664_v33 = vshrl.u32 %v4430_v5, 16 }
  0x2a   : > { %3213 = vmatprep.subr.bf16.mxu0 %v3973_v21  ;;  %3758 = vmatprep.subr.bf16.mxu1 %v4223_v22  ;;  %v4369_v21 = vld [vmem:[%s4212_s15 + $0x68] sm:$0xff]  }
  0x2b   : > { %v650_v36 = vshrl.u32 %v4369_v21, 16  ;;  %v4405_v53 = vsel %vm4260_vm5, %v743_v39, 0  ;;  %v4000_v39 = vld [vmem:[%s5197_s3 + $0x70] sm:$0xff]  }
  0x2d   : > { %3214 = vmatpush3.bf16.msra.mxu0 %v3975_v25  ;;  %3766 = vmatpush3.bf16.msra.mxu1 %v4223_v22  ;;  %v5200_v25 = vshrl.u32 %v4340_v6, 16 }
  0x2e   : > { %3607 = vmatprep.subr.bf16.mxu0 %v4123_v1  ;;  %3335 = vmatprep.subr.bf16.mxu1 %v3979_v34  ;;  %v578_v34 = vor.u32 %v576_v14, %v575_v20  ;;  %v746_v20 = vrot.slane %v660_v63, 1 }
  0x30   : > { %1083 = vmatmul.mubr.bf16.vlgmr.msra.gmra.mrb[0].mxu0 %v4273_v40  ;;  %3640 = vmatmul.mubr.bf16.vlgmr.msra.gmra.mrb[0].mxu1 %v4304_v52 }
  0x31   : > { %3608 = vmatpush3.bf16.msra.mxu0 %v4123_v1  ;;  %1090 = vmatprep.mubr.bf16.mxu0 %v4281_v43  ;;  %v740_v1 = vrot.slane %v639_v60, 1 }
  0x32   : > { %3609 = vmatprep.subr.bf16.mxu0 %v4136_v4  ;;  %3336 = vmatpush3.bf16.msra.mxu1 %v3980_v42  ;;  %v5202_v42 = vshll.u32 %v4340_v6, 16 }
  0x33   : > { %3337 = vmatprep.subr.bf16.mxu1 %v3981_v45  ;;  %3643 = vmatprep.mubr.bf16.mxu1 %v4344_v8  ;;  %v4392_v45 = vsel %vm4245_vm4, 0, %v578_v34 }
  0x35   : > { %3610 = vmatpush3.bf16.msra.mxu0 %v4136_v4  ;;  %v741_v4 = vor.u32 %v740_v1, %v636_v59 }
  0x36   : > { %3611 = vmatprep.subr.bf16.mxu0 %v4148_v7  ;;  %3338 = vmatpush3.bf16.msra.mxu1 %v3982_v57 }
  0x37   : > { %3339 = vmatprep.subr.bf16.mxu1 %v3986_v61  ;;  %v4363_v18 = vsel %vm4260_vm5, %v741_v4, 0  ;;  %v657_v61 = vshrl.u32 %v4411_v56, 16  ;;  %v3996_v4 = vld [vmem:[%s5197_s3 + $0x28] sm:$0xff]  }
  0x38   : > { %1091 = vmatmul.mubr.bf16.gmra.mrb[4].mxu0 %v4329_v0  ;;  %3644 = vmatmul.mubr.bf16.gmra.mrb[4].mxu1 %v4363_v18 }
  0x39   : > { %1098 = vmatprep.mubr.bf16.mxu0 %v4337_v3  ;;  %3612 = vmatpush3.bf16.msra.mxu0 %v4148_v7  ;;  %v653_v7 = vshll.u32 %v4369_v21, 16  ;;  %v747_v34 = vor.u32 %v746_v20, %v657_v61 }
  0x3a   : > { %3613 = vmatprep.subr.bf16.mxu0 %v4161_v10  ;;  %3340 = vmatpush3.bf16.msra.mxu1 %v3987_v2 }
  0x3b   : > { %3341 = vmatprep.subr.bf16.mxu1 %v3988_v9  ;;  %v744_v47 = vrot.slane %v653_v7, 1  ;;  %3647 = vmatprep.mubr.bf16.mxu1 %v4405_v53  ;;  %v554_v9 = vrot.slane %v5200_v25, 7  ;;  %v4483_v25 = vld [vmem:[%s4212_s15 + $0x28] sm:$0xff]  }
  0x3d   : > { %3614 = vmatpush3.bf16.msra.mxu0 %v4161_v10  ;;  %v745_v57 = vor.u32 %v744_v47, %v650_v36  ;;  %v5203_v10 = vshrl.u32 %v4400_v49, 16 }
  0x3e   : > { %3615 = vmatprep.subr.bf16.mxu0 %v4175_v13  ;;  %3342 = vmatpush3.bf16.msra.mxu1 %v3989_v30 }
  0x3f   : > { %3343 = vmatprep.subr.bf16.mxu1 %v3993_v41  ;;  %v4424_v1 = vsel %vm4260_vm5, %v745_v57, 0  ;;  %v582_v2 = vrot.slane %v5203_v10, 7  ;;  %v617_v41 = vrot.slane %v615_v28, 7  ;;  %v4463_v57 = vld [vmem:[%s4212_s15 + $0x20] sm:$0xff]   ;;  %v4002_v28 = vld [vmem:[%s5197_s3 + $0x78] sm:$0xff]  }
  0x40   : > { %1099 = vmatmul.mubr.bf16.gmra.mrb[8].mxu0 %v4392_v45  ;;  %3648 = vmatmul.mubr.bf16.gmra.mrb[8].mxu1 %v4424_v1 }
  0x41   : > { %1106 = vmatprep.mubr.bf16.mxu0 %v4400_v49  ;;  %3616 = vmatpush3.bf16.msra.mxu0 %v4175_v13  ;;  %v585_v30 = vor.u32 %v583_v58, %v582_v2  ;;  %v667_v13 = vshll.u32 %v4430_v5, 16  ;;  %v4468_v2 = vsel %vm4260_vm5, %v747_v34, 0  ;;  %v620_v20 = vor.u32 %v618_v29, %v617_v41 }
  0x42   : > { %3617 = vmatprep.subr.bf16.mxu0 %v4191_v16  ;;  %3344 = vmatpush3.bf16.msra.mxu1 %v3994_v48  ;;  %v590_v34 = vshll.u32 %v4463_v57, 16 }
  0x43   : > { %3345 = vmatprep.subr.bf16.mxu1 %v3995_v54  ;;  %v4455_v47 = vsel %vm4245_vm4, 0, %v585_v30  ;;  %v748_v48 = vrot.slane %v667_v13, 1  ;;  %v4001_v54 = vld [vmem:[%s5197_s3 + $0x30] sm:$0xff]   ;;  %3651 = vmatprep.mubr.bf16.mxu1 %v4468_v2  ;;  %v5201_v30 = vshrl.u32 %v4463_v57, 16  ;;  %v4487_v29 = vsel %vm4245_vm4, 0, %v620_v20 }
  0x44   : > { %v5204_v20 = vshrl.u32 %v4483_v25, 16 }
  0x45   : > { %3618 = vmatpush3.bf16.msra.mxu0 %v4191_v16  ;;  %v749_v16 = vor.u32 %v748_v48, %v664_v33  ;;  %v589_v41 = vrot.slane %v5201_v30, 7  ;;  %v557_v48 = vor.u32 %v5202_v42, %v554_v9  ;;  %v4005_v30 = vld [vmem:[%s5197_s3 + $0x80] sm:$0xff]   ;;  %v597_v42 = vshll.u32 %v4483_v25, 16 }
  0x46   : > { %3619 = vmatprep.subr.bf16.mxu0 %v4205_v19  ;;  %3346 = vmatpush3.bf16.msra.mxu1 %v3996_v4  ;;  %v596_v9 = vrot.slane %v5204_v20, 7 }
  0x47   : > { %3347 = vmatprep.subr.bf16.mxu1 %v4000_v39  ;;  %v4491_v4 = vsel %vm4260_vm5, %v749_v16, 0  ;;  %v4003_v39 = vld [vmem:[%s5197_s3 + $0x38] sm:$0xff]   ;;  %v4505_v16 = vld [vmem:[%s4212_s15 + $0x30] sm:$0xff]  }
  0x48   : > { %1107 = vmatmul.mubr.bf16.gmra.mrb[12].mxu0 %v4455_v47  ;;  %3652 = vmatmul.mubr.bf16.gmra.mrb[12].mxu1 %v4491_v4  ;;  %v601_v20 = vshrl.u32 %v4505_v16, 16 }
  0x49   : > { %1114 = vmatprep.mubr.bf16.mxu0 %v4463_v57  ;;  %3620 = vmatpush3.bf16.msra.mxu0 %v4205_v19  ;;  %v592_v19 = vor.u32 %v590_v34, %v589_v41  ;;  %v631_v41 = vrot.slane %v629_v50, 7  ;;  %v599_v50 = vor.u32 %v597_v42, %v596_v9 }
  0x4a   : > { %3621 = vmatprep.subr.bf16.mxu0 %v4223_v22  ;;  %3348 = vmatpush3.bf16.msra.mxu1 %v4001_v54  ;;  %v624_v54 = vrot.slane %v622_v37, 7  ;;  %v638_v37 = vrot.slane %v636_v59, 7 }
  0x4b   : > { %1548 = vmatprep.mubr.bf16.mxu1 %v4340_v6  ;;  %3349 = vmatprep.subr.bf16.mxu1 %v4002_v28  ;;  %v4519_v10 = vsel %vm4245_vm4, 0, %v592_v19  ;;  %v4528_v28 = vsel %vm4245_vm4, 0, %v557_v48  ;;  %v634_v19 = vor.u32 %v632_v51, %v631_v41  ;;  %v604_v48 = vshll.u32 %v4505_v16, 16 }
  0x4c   : > { %v627_v12 = vor.u32 %v625_v38, %v624_v54  ;;  %v4008_v38 = vld [vmem:[%s5197_s3 + $0x88] sm:$0xff]   ;;  %v652_v51 = vrot.slane %v650_v36, 7  ;;  %v603_v36 = vrot.slane %v601_v20, 7  ;;  %v4563_v54 = vld [vmem:[%s4212_s15 + $0x38] sm:$0xff]  }
  0x4d   : > { %3622 = vmatpush3.bf16.msra.mxu0 %v4223_v22  ;;  %v645_v22 = vrot.slane %v643_v15, 7  ;;  %v4553_v15 = vsel %vm4245_vm4, 0, %v634_v19 }
  0x4e   : > { %3350 = vmatpush3.bf16.msra.mxu1 %v4003_v39  ;;  %v4549_v59 = vsel %vm4245_vm4, 0, %v627_v12  ;;  %v641_v39 = vor.u32 %v639_v60, %v638_v37  ;;  %v4010_v12 = vld [vmem:[%s5197_s3 + $0x90] sm:$0xff]   ;;  %v655_v41 = vor.u32 %v653_v7, %v652_v51  ;;  %v659_v60 = vrot.slane %v657_v61, 7 }
  0x4f   : > { %3655 = vmatprep.subr.bf16.mxu1 %v4005_v30  ;;  %v648_v9 = vor.u32 %v646_v17, %v645_v22  ;;  %v666_v37 = vrot.slane %v664_v33, 7  ;;  %v718_v7 = vrot.slane %v562_v27, 1  ;;  %v4587_v61 = vsel %vm4245_vm4, 0, %v599_v50  ;;  %v4015_v27 = vld [vmem:[%s5197_s3 + $0x1c0] sm:$0xff]  }
  0x50   : > { %1115 = vmatmul.mubr.bf16.gmra.mrb[16].mxu0 %v4519_v10  ;;  %v4575_v17 = vsel %vm4245_vm4, 0, %v641_v39  ;;  %v662_v22 = vor.u32 %v660_v63, %v659_v60  ;;  %v4598_v51 = vsel %vm4260_vm5, %v4323_v62, 0  ;;  %3471 = vmatprep.subr.bf16.mxu0 %v4015_v27  ;;  %v608_v63 = vshrl.u32 %v4563_v54, 16  ;;  %v4011_v62 = vld [vmem:[%s5197_s3 + $0x98] sm:$0xff]  }
  0x51   : > { %1122 = vmatprep.mubr.bf16.mxu0 %v4483_v25  ;;  %1549 = vmatmul.mubr.bf16.vlgmr.msra.gmra.mrb[16].mxu1 %v4528_v28  ;;  %v4579_v19 = vsel %vm4245_vm4, 0, %v648_v9  ;;  %v669_v33 = vor.u32 %v667_v13, %v666_v37  ;;  %v719_v50 = vor.u32 %v718_v7, %v559_v26  ;;  %v722_v26 = vrot.slane %v576_v14, 1 }
  0x52   : > { %3656 = vmatpush3.bf16.msra.mxu1 %v4005_v30  ;;  %1556 = vmatprep.mubr.bf16.mxu1 %v4227_v23  ;;  %v4591_v30 = vsel %vm4245_vm4, 0, %v655_v41  ;;  %v4609_v39 = vsel %vm4245_vm4, 0, %v662_v22  ;;  %v724_v13 = vrot.slane %v583_v58, 1  ;;  %v726_v41 = vrot.slane %v590_v34, 1 }
  0x53   : > { %3657 = vmatprep.subr.bf16.mxu1 %v4008_v38  ;;  %v4617_v9 = vsel %vm4245_vm4, 0, %v669_v33  ;;  %v4621_v23 = vsel %vm4260_vm5, %v719_v50, 0  ;;  %v5210_v60 = vshrl.u32 %v4337_v3, 16  ;;  %v5211_v7 = vshrl.u32 %v4400_v49, 16 }
  0x54   : > { %v728_v27 = vrot.slane %v597_v42, 1  ;;  %v611_v14 = vshll.u32 %v4563_v54, 16  ;;  %v5212_v58 = vshrl.u32 %v4463_v57, 16  ;;  %v730_v33 = vrot.slane %v604_v48, 1 }
  0x55   : > { %v723_v37 = vor.u32 %v722_v26, %v5210_v60  ;;  %v725_v22 = vor.u32 %v724_v13, %v5211_v7  ;;  %v610_v50 = vrot.slane %v608_v63, 7 }
  0x56   : > { %3658 = vmatpush3.bf16.msra.mxu1 %v4008_v38  ;;  %v606_v38 = vor.u32 %v604_v48, %v603_v36  ;;  %v727_v36 = vor.u32 %v726_v41, %v5212_v58  ;;  %v731_v41 = vor.u32 %v730_v33, %v601_v20  ;;  %v732_v20 = vrot.slane %v611_v14, 1  ;;  %v4020_v33 = vld [vmem:[%s5197_s3 + $0x190] sm:$0xff]  }
  0x57   : > { %3659 = vmatprep.subr.bf16.mxu1 %v4010_v12  ;;  %v4645_v34 = vsel %vm4260_vm5, %v723_v37, 0  ;;  %v4649_v42 = vsel %vm4260_vm5, %v725_v22, 0  ;;  %v613_v7 = vor.u32 %v611_v14, %v610_v50  ;;  %v4014_v22 = vld [vmem:[%s5197_s3 + $0xb0] sm:$0xff]   ;;  %v4018_v14 = vld [vmem:[%s5197_s3 + $0x188] sm:$0xff]   ;;  %v4021_v50 = vld [vmem:[%s5197_s3 + $0x1d8] sm:$0xff]  }
  0x58   : > { %1123 = vmatmul.mubr.bf16.gmra.mrb[20].mxu0 %v4587_v61  ;;  %v4655_v48 = vsel %vm4245_vm4, 0, %v606_v38  ;;  %v4659_v13 = vsel %vm4260_vm5, %v727_v36, 0  ;;  %v4013_v38 = vld [vmem:[%s5197_s3 + $0xa8] sm:$0xff]   ;;  %v4673_v37 = vsel %vm4260_vm5, %v731_v41, 0  ;;  %v4019_v36 = vld [vmem:[%s5197_s3 + $0x1d0] sm:$0xff]  }
  0x59   : > { %1130 = vmatprep.mubr.bf16.mxu0 %v4505_v16  ;;  %1557 = vmatmul.mubr.bf16.gmra.mrb[20].mxu1 %v4273_v40  ;;  %v4012_v40 = vld [vmem:[%s5197_s3 + $0xa0] sm:$0xff]   ;;  %v4026_v41 = vld [vmem:[%s5197_s3 + $0x1e8] sm:$0xff]  }
  0x5a   : > { %1564 = vmatprep.mubr.bf16.mxu1 %v4281_v43  ;;  %3660 = vmatpush3.bf16.msra.mxu1 %v4010_v12  ;;  %v5213_v12 = vshrl.u32 %v4483_v25, 16 }
  0x5b   : > { %3661 = vmatprep.subr.bf16.mxu1 %v4011_v62 }
  0x5c   : > { %v729_v26 = vor.u32 %v728_v27, %v5213_v12  ;;  %v4683_v27 = vsel %vm4245_vm4, 0, %v613_v7  ;;  %v4024_v12 = vld [vmem:[%s5197_s3 + $0x1e0] sm:$0xff]  }
  0x5e   : > { %v4665_v60 = vsel %vm4260_vm5, %v729_v26, 0  ;;  %3662 = vmatpush3.bf16.msra.mxu1 %v4011_v62  ;;  %v733_v62 = vor.u32 %v732_v20, %v608_v63  ;;  %v4023_v63 = vld [vmem:[%s5197_s3 + $0xb8] sm:$0xff]   ;;  %v4025_v26 = vld [vmem:[%s5197_s3 + $0x1a0] sm:$0xff]   ;;  %v4027_v20 = vld [vmem:[%s5197_s3 + $0x1a8] sm:$0xff]  }
  0x5f   : > { %3663 = vmatprep.subr.bf16.mxu1 %v4012_v40 }
  0x60   : > { %1131 = vmatmul.mubr.bf16.gmra.mrb[24].mxu0 %v4655_v48  ;;  %v4687_v58 = vsel %vm4260_vm5, %v733_v62, 0  ;;  %v4028_v62 = vld [vmem:[%s5197_s3 + $0x1f0] sm:$0xff]  }
  0x61   : > { %1138 = vmatprep.mubr.bf16.mxu0 %v4563_v54  ;;  %1565 = vmatmul.mubr.bf16.gmra.mrb[24].mxu1 %v4329_v0 }
  0x62   : > { %1572 = vmatprep.mubr.bf16.mxu1 %v4337_v3  ;;  %3664 = vmatpush3.bf16.msra.mxu1 %v4012_v40  ;;  %v4022_v40 = vld [vmem:[%s5197_s3 + $0x198] sm:$0xff]  }
  0x63   : > { %3665 = vmatprep.subr.bf16.mxu1 %v4013_v38 }
  0x66   : > { %3666 = vmatpush3.bf16.msra.mxu1 %v4013_v38  ;;  %v5214_v38 = vshll.u32 %v4340_v6, 16 }
  0x67   : > { %3667 = vmatprep.subr.bf16.mxu1 %v4014_v22 }
  0x68   : > { %1139 = vmatmul.mubr.bf16.gmra.mrb[28].mxu0 %v4683_v27  ;;  %v716_v7 = vrot.slane %v5214_v38, 1 }
  0x69   : > { %1146 = vmatprep.mubr.bf16.mxu0 %v4231_v24  ;;  %1573 = vmatmul.mubr.bf16.gmra.mrb[28].mxu1 %v4392_v45 }
  0x6a   : > { %1580 = vmatprep.mubr.bf16.mxu1 %v4400_v49  ;;  %3668 = vmatpush3.bf16.msra.mxu1 %v4014_v22  ;;  %v5215_v22 = vshrl.u32 %v4340_v6, 16 }
  0x6b   : > { %3669 = vmatprep.subr.bf16.mxu1 %v4023_v63 }
  0x6e   : > { %3670 = vmatpush3.bf16.msra.mxu1 %v4023_v63  ;;  %v717_v63 = vor.u32 %v716_v7, %v5215_v22 }
  0x6f   : > { %3703 = vmatprep.subr.bf16.mxu1 %v4699_v31 }
  0x70   : > { %1147 = vmatmul.mubr.bf16.gmra.mrb[32].mxu0 %v4487_v29 }
  0x71   : > { %1154 = vmatprep.mubr.bf16.mxu0 %v4250_v32  ;;  %1581 = vmatmul.mubr.bf16.gmra.mrb[32].mxu1 %v4455_v47 }
  0x72   : > { %1588 = vmatprep.mubr.bf16.mxu1 %v4463_v57 }
  0x78   : > { %1155 = vmatmul.mubr.bf16.gmra.mrb[36].mxu0 %v4549_v59 }
  0x79   : > { %1162 = vmatprep.mubr.bf16.mxu0 %v4292_v46  ;;  %1589 = vmatmul.mubr.bf16.gmra.mrb[36].mxu1 %v4519_v10 }
  0x7a   : > { %1596 = vmatprep.mubr.bf16.mxu1 %v4483_v25 }
  0x80   : > { %1163 = vmatmul.mubr.bf16.gmra.mrb[40].mxu0 %v4553_v15 }
  0x81   : > { %1170 = vmatprep.mubr.bf16.mxu0 %v4309_v55  ;;  %1597 = vmatmul.mubr.bf16.gmra.mrb[40].mxu1 %v4587_v61 }
  0x82   : > { %1604 = vmatprep.mubr.bf16.mxu1 %v4505_v16 }
  0x88   : > { %1171 = vmatmul.mubr.bf16.gmra.mrb[44].mxu0 %v4575_v17 }
  0x89   : > { %1178 = vmatprep.mubr.bf16.mxu0 %v4350_v11  ;;  %1605 = vmatmul.mubr.bf16.gmra.mrb[44].mxu1 %v4655_v48 }
  0x8a   : > { %1612 = vmatprep.mubr.bf16.mxu1 %v4563_v54 }
  0x90   : > { %1179 = vmatmul.mubr.bf16.gmra.mrb[48].mxu0 %v4579_v19 }
  0x91   : > { %1186 = vmatprep.mubr.bf16.mxu0 %v4369_v21  ;;  %1613 = vmatmul.mubr.bf16.gmra.mrb[48].mxu1 %v4683_v27 }
  0x92   : > { %1620 = vmatprep.mubr.bf16.mxu1 %v4231_v24  ;;  %v4016_v24 = vld [vmem:[%s5197_s3 + $0x180] sm:$0xff]  }
  0x98   : > { %1187 = vmatmul.mubr.bf16.gmra.mrb[52].mxu0 %v4591_v30 }
  0x99   : > { %1194 = vmatprep.mubr.bf16.mxu0 %v4411_v56  ;;  %1621 = vmatmul.mubr.bf16.gmra.mrb[52].mxu1 %v4487_v29 }
  0x9a   : > { %1628 = vmatprep.mubr.bf16.mxu1 %v4250_v32  ;;  %v4017_v32 = vld [vmem:[%s5197_s3 + $0x1c8] sm:$0xff]  }
  0xa0   : > { %1195 = vmatmul.mubr.bf16.gmra.mrb[56].mxu0 %v4609_v39 }
  0xa1   : > { %1202 = vmatprep.mubr.bf16.mxu0 %v4430_v5  ;;  %1629 = vmatmul.mubr.bf16.gmra.mrb[56].mxu1 %v4549_v59 }
  0xa2   : > { %1636 = vmatprep.mubr.bf16.mxu1 %v4292_v46 }
  0xa8   : > { %1203 = vmatmul.mubr.bf16.gmra.mrb[60].mxu0 %v4617_v9 }
  0xa9   : > { %3623 = vmatprep.mubr.bf16.mxu0 %v4621_v23  ;;  %1637 = vmatmul.mubr.bf16.gmra.mrb[60].mxu1 %v4553_v15 }
  0xaa   : > { %1644 = vmatprep.mubr.bf16.mxu1 %v4309_v55 }
  0xb0   : > { %3624 = vmatmul.mubr.bf16.vlgmr.msra.gmra.mrb[64].mxu0 %v4598_v51 }
  0xb1   : > { %3472 = vmatpush3.bf16.msra.mxu0 %v4016_v24  ;;  %3627 = vmatprep.mubr.bf16.mxu0 %v4645_v34  ;;  %v4029_v24 = vld [vmem:[%s5197_s3 + $0x1b0] sm:$0xff]  }
  0xb2   : > { %1645 = vmatmul.mubr.bf16.gmra.mrb[64].mxu1 %v4575_v17  ;;  %3473 = vmatprep.subr.bf16.mxu0 %v4017_v32  ;;  %v4030_v32 = vld [vmem:[%s5197_s3 + $0x1f8] sm:$0xff]  }
  0xb3   : > { %1652 = vmatprep.mubr.bf16.mxu1 %v4350_v11 }
  0xb5   : > { %3474 = vmatpush3.bf16.msra.mxu0 %v4018_v14  ;;  %v4795_v14 = vsel %vm4260_vm5, %v717_v63, 0 }
  0xb6   : > { %3475 = vmatprep.subr.bf16.mxu0 %v4019_v36  ;;  %v4031_v36 = vld [vmem:[%s5197_s3 + $0x1b8] sm:$0xff]  }
  0xb8   : > { %3628 = vmatmul.mubr.bf16.gmra.mrb[68].mxu0 %v4649_v42 }
  0xb9   : > { %3476 = vmatpush3.bf16.msra.mxu0 %v4020_v33  ;;  %3631 = vmatprep.mubr.bf16.mxu0 %v4659_v13 }
  0xba   : > { %1653 = vmatmul.mubr.bf16.gmra.mrb[68].mxu1 %v4579_v19  ;;  %3477 = vmatprep.subr.bf16.mxu0 %v4021_v50 }
  0xbb   : > { %1660 = vmatprep.mubr.bf16.mxu1 %v4369_v21 }
  0xbd   : > { %3478 = vmatpush3.bf16.msra.mxu0 %v4022_v40 }
  0xbe   : > { %3479 = vmatprep.subr.bf16.mxu0 %v4024_v12 }
  0xc0   : > { %3632 = vmatmul.mubr.bf16.gmra.mrb[72].mxu0 %v4665_v60 }
  0xc1   : > { %3480 = vmatpush3.bf16.msra.mxu0 %v4025_v26  ;;  %3635 = vmatprep.mubr.bf16.mxu0 %v4673_v37 }
  0xc2   : > { %1661 = vmatmul.mubr.bf16.gmra.mrb[72].mxu1 %v4591_v30  ;;  %3481 = vmatprep.subr.bf16.mxu0 %v4026_v41 }
  0xc3   : > { %1668 = vmatprep.mubr.bf16.mxu1 %v4411_v56 }
  0xc5   : > { %3482 = vmatpush3.bf16.msra.mxu0 %v4027_v20 }
  0xc6   : > { %3483 = vmatprep.subr.bf16.mxu0 %v4028_v62 }
  0xc8   : > { %3636 = vmatmul.mubr.bf16.gmra.mrb[76].mxu0 %v4687_v58 }
  0xc9   : > { %3484 = vmatpush3.bf16.msra.mxu0 %v4029_v24  ;;  %2063 = vmatprep.mubr.bf16.mxu0 %v4281_v43  ;;  %v4034_v43 = vld [vmem:[%s5197_s3 + $0x210] sm:$0xff]  }
  0xca   : > { %1669 = vmatmul.mubr.bf16.gmra.mrb[76].mxu1 %v4609_v39  ;;  %3485 = vmatprep.subr.bf16.mxu0 %v4030_v32 }
  0xcb   : > { %3671 = vmatprep.mubr.bf16.mxu1 %v4795_v14 }
  0xcd   : > { %3486 = vmatpush3.bf16.msra.mxu0 %v4031_v36 }
  0xd0   : > { %2064 = vmatmul.mubr.bf16.vlgmr.msra.gmra.mrb[80].mxu0 %v4329_v0  ;;  %v4035_v0 = vld [vmem:[%s5197_s3 + $0x218] sm:$0xff]  }
  0xd1   : > { %2071 = vmatprep.mubr.bf16.mxu0 %v4337_v3  ;;  %v4036_v3 = vld [vmem:[%s5197_s3 + $0x220] sm:$0xff]  }
  0xd2   : > { %3672 = vmatmul.mubr.bf16.vlgmr.msra.gmra.mrb[80].mxu1 %v4621_v23 }
  0xd3   : > { %3704 = vmatpush3.bf16.msra.mxu1 %v4699_v31  ;;  %3675 = vmatprep.mubr.bf16.mxu1 %v4598_v51 }
  0xd4   : > { %3705 = vmatprep.subr.bf16.mxu1 %v4033_v35 }
  0xd7   : > { %3706 = vmatpush3.bf16.msra.mxu1 %v4033_v35 }
  0xd8   : > { %2072 = vmatmul.mubr.bf16.gmra.mrb[84].mxu0 %v4392_v45  ;;  %3707 = vmatprep.subr.bf16.mxu1 %v4034_v43  ;;  %v4037_v45 = vld [vmem:[%s5197_s3 + $0x228] sm:$0xff]  }
  0xd9   : > { %2079 = vmatprep.mubr.bf16.mxu0 %v4400_v49  ;;  %v4038_v49 = vld [vmem:[%s5197_s3 + $0x230] sm:$0xff]  }
  0xda   : > { %3676 = vmatmul.mubr.bf16.gmra.mrb[84].mxu1 %v4645_v34 }
  0xdb   : > { %3679 = vmatprep.mubr.bf16.mxu1 %v4649_v42  ;;  %3708 = vmatpush3.bf16.msra.mxu1 %v4034_v43 }
  0xdc   : > { %3709 = vmatprep.subr.bf16.mxu1 %v4035_v0 }
  0xdf   : > { %3710 = vmatpush3.bf16.msra.mxu1 %v4035_v0 }
  0xe0   : > { %2080 = vmatmul.mubr.bf16.gmra.mrb[88].mxu0 %v4455_v47  ;;  %3711 = vmatprep.subr.bf16.mxu1 %v4036_v3  ;;  %v4039_v47 = vld [vmem:[%s5197_s3 + $0x238] sm:$0xff]  }
  0xe1   : > { %2087 = vmatprep.mubr.bf16.mxu0 %v4463_v57 }
  0xe2   : > { %3680 = vmatmul.mubr.bf16.gmra.mrb[88].mxu1 %v4659_v13 }
  0xe3   : > { %3683 = vmatprep.mubr.bf16.mxu1 %v4665_v60  ;;  %3712 = vmatpush3.bf16.msra.mxu1 %v4036_v3 }
  0xe4   : > { %3713 = vmatprep.subr.bf16.mxu1 %v4037_v45 }
  0xe7   : > { %3714 = vmatpush3.bf16.msra.mxu1 %v4037_v45 }
  0xe8   : > { %2088 = vmatmul.mubr.bf16.gmra.mrb[92].mxu0 %v4519_v10  ;;  %3715 = vmatprep.subr.bf16.mxu1 %v4038_v49 }
  0xe9   : > { %2095 = vmatprep.mubr.bf16.mxu0 %v4483_v25  ;;  %v4040_v25 = vld [vmem:[%s4212_s15 + $0x40] sm:$0xff]  }
  0xea   : > { %3684 = vmatmul.mubr.bf16.gmra.mrb[92].mxu1 %v4673_v37 }
  0xeb   : > { %3687 = vmatprep.mubr.bf16.mxu1 %v4687_v58  ;;  %3716 = vmatpush3.bf16.msra.mxu1 %v4038_v49 }
  0xec   : > { %3717 = vmatprep.subr.bf16.mxu1 %v4039_v47 }
  0xef   : > { %3718 = vmatpush3.bf16.msra.mxu1 %v4039_v47 }
  0xf0   : > { %2096 = vmatmul.mubr.bf16.gmra.mrb[96].mxu0 %v4587_v61 }
  0xf1   : > { %2103 = vmatprep.mubr.bf16.mxu0 %v4505_v16 }
  0xf2   : > { %3688 = vmatmul.mubr.bf16.gmra.mrb[0].mxu1 %v4285_v44 }
  0xf3   : > { %3691 = vmatprep.mubr.bf16.mxu1 %v4304_v52 }
  0xf8   : > { %2104 = vmatmul.mubr.bf16.gmra.mrb[100].mxu0 %v4655_v48 }
  0xf9   : > { %2111 = vmatprep.mubr.bf16.mxu0 %v4563_v54  ;;  %v4041_v54 = vld [vmem:[%s4212_s15 + $0x48] sm:$0xff]  }
  0xfa   : > { %3692 = vmatmul.mubr.bf16.gmra.mrb[4].mxu1 %v4344_v8 }
  0xfb   : > { %3695 = vmatprep.mubr.bf16.mxu1 %v4363_v18 }
 0x100   : > { %2112 = vmatmul.mubr.bf16.gmra.mrb[104].mxu0 %v4683_v27 }
 0x101   : > { %2119 = vmatprep.mubr.bf16.mxu0 %v4040_v25 }
 0x102   : > { %3696 = vmatmul.mubr.bf16.gmra.mrb[8].mxu1 %v4405_v53 }
 0x103   : > { %v3215_v10 = vpop.f32.mrb[0].mxu0  ;;  %3699 = vmatprep.mubr.bf16.mxu1 %v4424_v1 }
 0x104   : > { %v3216_v57 = vpop.f32.mrb[1].mxu0 }
 0x105   : > { %v4853_v16 = vadd.f32 %v3216_v57, %v3215_v10  ;;  %v3218_v61 = vpop.f32.mrb[2].mxu0 }
 0x106   : > { %v3219_v23 = vpop.f32.mrb[3].mxu0 }
 0x107   : > { %v4855_v48 = vadd.f32 %v3219_v23, %v3218_v61 }
 0x108   : > { %2120 = vmatmul.mubr.bf16.gmra.mrb[108].mxu0 %v4487_v29 }
 0x109   : > { %2127 = vmatprep.mubr.bf16.mxu0 %v4041_v54 }
 0x10a   : > { %3700 = vmatmul.mubr.bf16.gmra.mrb[12].mxu1 %v4468_v2 }
 0x10b   : > { %v3221_v27 = vpop.f32.mrb[4].mxu0  ;;  %3719 = vmatprep.mubr.bf16.mxu1 %v4598_v51 }
 0x10c   : > { %v3222_v31 = vpop.f32.mrb[5].mxu0 }
 0x10d   : > { %v4861_v33 = vadd.f32 %v3222_v31, %v3221_v27  ;;  %v3224_v50 = vpop.f32.mrb[6].mxu0 }
 0x10e   : > { %v3225_v40 = vpop.f32.mrb[7].mxu0 }
 0x10f   : > { %v4863_v12 = vadd.f32 %v3225_v40, %v3224_v50 }
 0x110   : > { %2128 = vmatmul.mubr.bf16.gmra.mrb[112].mxu0 %v4549_v59 }
 0x111   : > { %2135 = vmatprep.mubr.bf16.mxu0 %v4292_v46 }
 0x112   : > { %3720 = vmatmul.mubr.bf16.vlgmr.msra.gmra.mrb[80].mxu1 %v4645_v34 }
 0x113   : > { %v3227_v29 = vpop.f32.mrb[8].mxu0  ;;  %3723 = vmatprep.mubr.bf16.mxu1 %v4649_v42 }
 0x114   : > { %v3228_v26 = vpop.f32.mrb[9].mxu0 }
 0x115   : > { %v4869_v41 = vadd.f32 %v3228_v26, %v3227_v29  ;;  %v3230_v51 = vpop.f32.mrb[10].mxu0 }
 0x116   : > { %v3231_v38 = vpop.f32.mrb[11].mxu0 }
 0x117   : > { %v4871_v7 = vadd.f32 %v3231_v38, %v3230_v51 }
 0x118   : > { %2136 = vmatmul.mubr.bf16.gmra.mrb[116].mxu0 %v4553_v15 }
 0x119   : > { %2143 = vmatprep.mubr.bf16.mxu0 %v4309_v55 }
 0x11a   : > { %3724 = vmatmul.mubr.bf16.gmra.mrb[84].mxu1 %v4659_v13 }
 0x11b   : > { %v3233_v59 = vpop.f32.mrb[12].mxu0  ;;  %3727 = vmatprep.mubr.bf16.mxu1 %v4665_v60 }
 0x11c   : > { %v3234_v46 = vpop.f32.mrb[13].mxu0 }
 0x11d   : > { %v4877_v34 = vadd.f32 %v3234_v46, %v3233_v59  ;;  %v3236_v42 = vpop.f32.mrb[14].mxu0 }
 0x11e   : > { %v3237_v20 = vpop.f32.mrb[15].mxu0 }
 0x11f   : > { %v4879_v62 = vadd.f32 %v3237_v20, %v3236_v42 }
 0x120   : > { %2144 = vmatmul.mubr.bf16.gmra.mrb[120].mxu0 %v4575_v17 }
 0x121   : > { %2151 = vmatprep.mubr.bf16.mxu0 %v4350_v11 }
 0x122   : > { %3728 = vmatmul.mubr.bf16.gmra.mrb[88].mxu1 %v4673_v37 }
 0x123   : > { %v3239_v15 = vpop.f32.mrb[16].mxu0  ;;  %3731 = vmatprep.mubr.bf16.mxu1 %v4687_v58 }
 0x124   : > { %v3240_v55 = vpop.f32.mrb[17].mxu0  ;;  %v3351_v13 = vpop.f32.mrb[16].mxu1 }
 0x125   : > { %v4885_v22 = vadd.f32 %v3240_v55, %v3239_v15  ;;  %v3242_v60 = vpop.f32.mrb[18].mxu0  ;;  %v3352_v63 = vpop.f32.mrb[17].mxu1 }
 0x126   : > { %v3243_v24 = vpop.f32.mrb[19].mxu0  ;;  %v4887_v32 = vadd.f32 %v3352_v63, %v3351_v13  ;;  %v3354_v36 = vpop.f32.mrb[18].mxu1 }
 0x127   : > { %v4889_v35 = vadd.f32 %v3243_v24, %v3242_v60  ;;  %v3355_v17 = vpop.f32.mrb[19].mxu1 }
 0x128   : > { %2152 = vmatmul.mubr.bf16.gmra.mrb[124].mxu0 %v4579_v19  ;;  %v4892_v11 = vadd.f32 %v3355_v17, %v3354_v36 }
 0x129   : > { %2159 = vmatprep.mubr.bf16.mxu0 %v4369_v21 }
 0x12a   : > { %3732 = vmatmul.mubr.bf16.gmra.mrb[92].mxu1 %v4285_v44 }
 0x12b   : > { %v3245_v37 = vpop.f32.mrb[20].mxu0  ;;  %3735 = vmatprep.mubr.bf16.mxu1 %v4304_v52 }
 0x12c   : > { %v3246_v58 = vpop.f32.mrb[21].mxu0  ;;  %v3357_v43 = vpop.f32.mrb[20].mxu1 }
 0x12d   : > { %v4897_v0 = vadd.f32 %v3246_v58, %v3245_v37  ;;  %v3248_v3 = vpop.f32.mrb[22].mxu0  ;;  %v3358_v45 = vpop.f32.mrb[21].mxu1 }
 0x12e   : > { %v3249_v49 = vpop.f32.mrb[23].mxu0  ;;  %v4899_v47 = vadd.f32 %v3358_v45, %v3357_v43  ;;  %v3360_v25 = vpop.f32.mrb[22].mxu1 }
 0x12f   : > { %v4901_v19 = vadd.f32 %v3249_v49, %v3248_v3  ;;  %v3361_v10 = vpop.f32.mrb[23].mxu1 }
 0x130   : > { %2160 = vmatmul.mubr.bf16.gmra.mrb[128].mxu0 %v4591_v30  ;;  %v4904_v21 = vadd.f32 %v3361_v10, %v3360_v25 }
 0x131   : > { %2167 = vmatprep.mubr.bf16.mxu0 %v4411_v56 }
 0x132   : > { %3736 = vmatmul.mubr.bf16.gmra.mrb[0].mxu1 %v4344_v8 }
 0x133   : > { %v3251_v44 = vpop.f32.mrb[24].mxu0  ;;  %3739 = vmatprep.mubr.bf16.mxu1 %v4363_v18 }
 0x134   : > { %v3252_v52 = vpop.f32.mrb[25].mxu0  ;;  %v3363_v57 = vpop.f32.mrb[24].mxu1 }
 0x135   : > { %v4909_v61 = vadd.f32 %v3252_v52, %v3251_v44  ;;  %v3254_v23 = vpop.f32.mrb[26].mxu0  ;;  %v3364_v54 = vpop.f32.mrb[25].mxu1 }
 0x136   : > { %v3255_v27 = vpop.f32.mrb[27].mxu0  ;;  %v4911_v31 = vadd.f32 %v3364_v54, %v3363_v57  ;;  %v3366_v50 = vpop.f32.mrb[26].mxu1 }
 0x137   : > { %v4913_v30 = vadd.f32 %v3255_v27, %v3254_v23  ;;  %v3367_v40 = vpop.f32.mrb[27].mxu1 }
 0x138   : > { %2168 = vmatmul.mubr.bf16.gmra.mrb[132].mxu0 %v4609_v39  ;;  %v4916_v56 = vadd.f32 %v3367_v40, %v3366_v50 }
 0x139   : > { %2175 = vmatprep.mubr.bf16.mxu0 %v4430_v5 }
 0x13a   : > { %3740 = vmatmul.mubr.bf16.gmra.mrb[4].mxu1 %v4405_v53 }
 0x13b   : > { %v3257_v8 = vpop.f32.mrb[28].mxu0  ;;  %3743 = vmatprep.mubr.bf16.mxu1 %v4424_v1 }
 0x13c   : > { %v3258_v18 = vpop.f32.mrb[29].mxu0  ;;  %v3369_v29 = vpop.f32.mrb[28].mxu1 }
 0x13d   : > { %v4921_v26 = vadd.f32 %v3258_v18, %v3257_v8  ;;  %v3260_v51 = vpop.f32.mrb[30].mxu0  ;;  %v3370_v38 = vpop.f32.mrb[29].mxu1 }
 0x13e   : > { %v3261_v59 = vpop.f32.mrb[31].mxu0  ;;  %v4923_v46 = vadd.f32 %v3370_v38, %v3369_v29  ;;  %v3372_v42 = vpop.f32.mrb[30].mxu1 }
 0x13f   : > { %v4925_v39 = vadd.f32 %v3261_v59, %v3260_v51  ;;  %v3373_v20 = vpop.f32.mrb[31].mxu1 }
 0x140   : > { %2176 = vmatmul.mubr.bf16.gmra.mrb[136].mxu0 %v4617_v9  ;;  %v4928_v5 = vadd.f32 %v3373_v20, %v3372_v42 }
 0x141   : > { %2183 = vmatprep.mubr.bf16.mxu0 %v4340_v6 }
 0x142   : > { %3744 = vmatmul.mubr.bf16.gmra.mrb[8].mxu1 %v4468_v2 }
 0x143   : > { %v3263_v53 = vpop.f32.mrb[32].mxu0  ;;  %3747 = vmatprep.mubr.bf16.mxu1 %v4491_v4 }
 0x144   : > { %v3264_v1 = vpop.f32.mrb[33].mxu0  ;;  %v3375_v15 = vpop.f32.mrb[32].mxu1 }
 0x145   : > { %v3265_v55 = vadd.f32 %v3264_v1, %v3263_v53  ;;  %v3266_v13 = vpop.f32.mrb[34].mxu0  ;;  %v3376_v60 = vpop.f32.mrb[33].mxu1 }
 0x146   : > { %v3267_v63 = vpop.f32.mrb[35].mxu0  ;;  %v4933_v24 = vadd.f32 %v3376_v60, %v3375_v15  ;;  %v3378_v36 = vpop.f32.mrb[34].mxu1 }
 0x147   : > { %v3268_v17 = vadd.f32 %v3267_v63, %v3266_v13  ;;  %v3379_v9 = vpop.f32.mrb[35].mxu1 }
 0x148   : > { %2184 = vmatmul.mubr.bf16.gmra.mrb[140].mxu0 %v4528_v28  ;;  %v4936_v37 = vadd.f32 %v3379_v9, %v3378_v36 }
 0x14a   : > { %3748 = vmatmul.mubr.bf16.gmra.mrb[12].mxu1 %v4795_v14 }
 0x14b   : > { %v3269_v6 = vpop.f32.mrb[36].mxu0 }
 0x14c   : > { %v3270_v2 = vpop.f32.mrb[37].mxu0  ;;  %v3381_v4 = vpop.f32.mrb[36].mxu1 }
 0x14d   : > { %v3271_v58 = vadd.f32 %v3270_v2, %v3269_v6  ;;  %v3272_v43 = vpop.f32.mrb[38].mxu0  ;;  %v3382_v3 = vpop.f32.mrb[37].mxu1 }
 0x14e   : > { %v3273_v45 = vpop.f32.mrb[39].mxu0  ;;  %v4939_v49 = vadd.f32 %v3382_v3, %v3381_v4  ;;  %v3384_v25 = vpop.f32.mrb[38].mxu1 }
 0x14f   : > { %v3274_v10 = vadd.f32 %v3273_v45, %v3272_v43  ;;  %v3385_v44 = vpop.f32.mrb[39].mxu1 }
 0x150   : > { %v4941_v52 = vadd.f32 %v3385_v44, %v3384_v25 }
 0x153   : > { %v3275_v57 = vpop.f32.mrb[40].mxu0 }
 0x154   : > { %v3276_v28 = vpop.f32.mrb[41].mxu0  ;;  %v3387_v23 = vpop.f32.mrb[40].mxu1 }
 0x155   : > { %v3277_v54 = vadd.f32 %v3276_v28, %v3275_v57  ;;  %v3278_v27 = vpop.f32.mrb[42].mxu0  ;;  %v3388_v14 = vpop.f32.mrb[41].mxu1 }
 0x156   : > { %v3279_v50 = vpop.f32.mrb[43].mxu0  ;;  %v4943_v40 = vadd.f32 %v3388_v14, %v3387_v23  ;;  %v3390_v8 = vpop.f32.mrb[42].mxu1 }
 0x157   : > { %v3280_v18 = vadd.f32 %v3279_v50, %v3278_v27  ;;  %v3391_v29 = vpop.f32.mrb[43].mxu1 }
 0x158   : > { %v4945_v51 = vadd.f32 %v3391_v29, %v3390_v8 }
 0x15b   : > { %v3281_v38 = vpop.f32.mrb[44].mxu0 }
 0x15c   : > { %v3282_v59 = vpop.f32.mrb[45].mxu0  ;;  %v3393_v42 = vpop.f32.mrb[44].mxu1 }
 0x15d   : > { %v3283_v20 = vadd.f32 %v3282_v59, %v3281_v38  ;;  %v3284_v53 = vpop.f32.mrb[46].mxu0  ;;  %v3394_v1 = vpop.f32.mrb[45].mxu1 }
 0x15e   : > { %v3285_v15 = vpop.f32.mrb[47].mxu0  ;;  %v4947_v13 = vadd.f32 %v3394_v1, %v3393_v42  ;;  %v3396_v60 = vpop.f32.mrb[46].mxu1 }
 0x15f   : > { %v3286_v63 = vadd.f32 %v3285_v15, %v3284_v53  ;;  %v3397_v36 = vpop.f32.mrb[47].mxu1 }
 0x160   : > { %v4949_v9 = vadd.f32 %v3397_v36, %v3396_v60 }
 0x163   : > { %v3287_v6 = vpop.f32.mrb[48].mxu0 }
 0x164   : > { %v3288_v2 = vpop.f32.mrb[49].mxu0  ;;  %v3399_v4 = vpop.f32.mrb[48].mxu1 }
 0x165   : > { %v4951_v43 = vadd.f32 %v3288_v2, %v3287_v6  ;;  %v3290_v3 = vpop.f32.mrb[50].mxu0  ;;  %v3400_v45 = vpop.f32.mrb[49].mxu1 }
 0x166   : > { %v3291_v25 = vpop.f32.mrb[51].mxu0  ;;  %v3401_v44 = vadd.f32 %v3400_v45, %v3399_v4  ;;  %v3402_v57 = vpop.f32.mrb[50].mxu1 }
 0x167   : > { %v4953_v28 = vadd.f32 %v3291_v25, %v3290_v3  ;;  %v3403_v23 = vpop.f32.mrb[51].mxu1 }
 0x168   : > { %v4955_v27 = vadd.f32 %v3401_v44, %v3265_v55  ;;  %v3404_v14 = vadd.f32 %v3403_v23, %v3402_v57 }
 0x16a   : > { %v4957_v50 = vadd.f32 %v3404_v14, %v3268_v17 }
 0x16b   : > { %v3293_v8 = vpop.f32.mrb[52].mxu0 }
 0x16c   : > { %v3294_v29 = vpop.f32.mrb[53].mxu0  ;;  %v3405_v38 = vpop.f32.mrb[52].mxu1 }
 0x16d   : > { %v4959_v59 = vadd.f32 %v3294_v29, %v3293_v8  ;;  %v3296_v42 = vpop.f32.mrb[54].mxu0  ;;  %v3406_v53 = vpop.f32.mrb[53].mxu1 }
 0x16e   : > { %v3297_v1 = vpop.f32.mrb[55].mxu0  ;;  %v3407_v15 = vadd.f32 %v3406_v53, %v3405_v38  ;;  %v3408_v60 = vpop.f32.mrb[54].mxu1 }
 0x16f   : > { %v4961_v36 = vadd.f32 %v3297_v1, %v3296_v42  ;;  %v3409_v6 = vpop.f32.mrb[55].mxu1 }
 0x170   : > { %v4963_v2 = vadd.f32 %v3407_v15, %v3271_v58  ;;  %v3410_v55 = vadd.f32 %v3409_v6, %v3408_v60 }
 0x172   : > { %v4965_v4 = vadd.f32 %v3410_v55, %v3274_v10 }
 0x173   : > { %v3299_v17 = vpop.f32.mrb[56].mxu0 }
 0x174   : > { %5216 = vst [vmem:[#allocation2_spill] sm:$0xff] %v4965_v4  ;;  %v3300_v3 = vpop.f32.mrb[57].mxu0  ;;  %v3411_v45 = vpop.f32.mrb[56].mxu1 }
 0x175   : > { %v4967_v25 = vadd.f32 %v3300_v3, %v3299_v17  ;;  %v3302_v44 = vpop.f32.mrb[58].mxu0  ;;  %v3412_v57 = vpop.f32.mrb[57].mxu1 }
 0x176   : > { %v3303_v23 = vpop.f32.mrb[59].mxu0  ;;  %v3413_v14 = vadd.f32 %v3412_v57, %v3411_v45  ;;  %v3414_v8 = vpop.f32.mrb[58].mxu1 }
 0x177   : > { %v4969_v29 = vadd.f32 %v3303_v23, %v3302_v44  ;;  %v3415_v38 = vpop.f32.mrb[59].mxu1 }
 0x178   : > { %v4971_v42 = vadd.f32 %v3413_v14, %v3277_v54  ;;  %v3416_v58 = vadd.f32 %v3415_v38, %v3414_v8 }
 0x17a   : > { %v4973_v53 = vadd.f32 %v3416_v58, %v3280_v18 }
 0x17b   : > { %v3305_v10 = vpop.f32.mrb[60].mxu0 }
 0x17c   : > { %v3306_v1 = vpop.f32.mrb[61].mxu0  ;;  %v3417_v15 = vpop.f32.mrb[60].mxu1 }
 0x17d   : > { %v4975_v60 = vadd.f32 %v3306_v1, %v3305_v10  ;;  %v3308_v6 = vpop.f32.mrb[62].mxu0  ;;  %v3418_v55 = vpop.f32.mrb[61].mxu1 }
 0x17e   : > { %v3309_v17 = vpop.f32.mrb[63].mxu0  ;;  %v3419_v3 = vadd.f32 %v3418_v55, %v3417_v15  ;;  %v3420_v4 = vpop.f32.mrb[62].mxu1 }
 0x17f   : > { %v4977_v45 = vadd.f32 %v3309_v17, %v3308_v6  ;;  %v3421_v44 = vpop.f32.mrb[63].mxu1 }
 0x180   : > { %v4979_v57 = vadd.f32 %v3419_v3, %v3283_v20  ;;  %v3422_v54 = vadd.f32 %v3421_v44, %v3420_v4 }
 0x182   : > { %v4981_v23 = vadd.f32 %v3422_v54, %v3286_v63 }
 0x183   : > { %v3625_v18 = vpop.f32.mrb[64].mxu0 }
 0x184   : > { %v1254_v14 = vadd.f32 %v3625_v18, %v4861_v33  ;;  %v1245_v8 = vpop.f32.mrb[65].mxu0 }
 0x185   : > { %v3423_v38 = vpop.f32.mrb[64].mxu1  ;;  %v1246_v58 = vadd.f32 %v4853_v16, %v1245_v8  ;;  %v3626_v10 = vpop.f32.mrb[66].mxu0 }
 0x186   : > { %v4986_v1 = vadd.f32 %v4899_v47, %v1254_v14  ;;  %v3424_v15 = vpop.f32.mrb[65].mxu1  ;;  %v1257_v6 = vadd.f32 %v3626_v10, %v4863_v12  ;;  %v1248_v55 = vpop.f32.mrb[67].mxu0 }
 0x187   : > { %v4990_v20 = vadd.f32 %v4887_v32, %v1246_v58  ;;  %v3425_v63 = vadd.f32 %v3424_v15, %v3423_v38  ;;  %v3426_v4 = vpop.f32.mrb[66].mxu1  ;;  %v1249_v17 = vadd.f32 %v4855_v48, %v1248_v55 }
 0x188   : > { %v4994_v33 = vadd.f32 %v4904_v21, %v1257_v6  ;;  %v3427_v3 = vpop.f32.mrb[67].mxu1 }
 0x189   : > { %v4997_v16 = vadd.f32 %v3425_v63, %v4951_v43  ;;  %v5000_v47 = vadd.f32 %v4892_v11, %v1249_v17  ;;  %v3428_v44 = vadd.f32 %v3427_v3, %v3426_v4 }
 0x18b   : > { %v5003_v12 = vadd.f32 %v3428_v44, %v4953_v28  ;;  %v3629_v32 = vpop.f32.mrb[68].mxu0 }
 0x18c   : > { %v1270_v54 = vadd.f32 %v3629_v32, %v4877_v34  ;;  %v1261_v18 = vpop.f32.mrb[69].mxu0 }
 0x18d   : > { %v3429_v14 = vpop.f32.mrb[68].mxu1  ;;  %v1262_v48 = vadd.f32 %v4869_v41, %v1261_v18  ;;  %v3630_v21 = vpop.f32.mrb[70].mxu0 }
 0x18e   : > { %v5008_v8 = vadd.f32 %v4923_v46, %v1270_v54  ;;  %v3430_v43 = vpop.f32.mrb[69].mxu1  ;;  %v1273_v38 = vadd.f32 %v3630_v21, %v4879_v62  ;;  %v1264_v11 = vpop.f32.mrb[71].mxu0 }
 0x18f   : > { %v5012_v58 = vadd.f32 %v4911_v31, %v1262_v48  ;;  %v3431_v28 = vadd.f32 %v3430_v43, %v3429_v14  ;;  %v3432_v10 = vpop.f32.mrb[70].mxu1  ;;  %v1265_v15 = vadd.f32 %v4871_v7, %v1264_v11 }
 0x190   : > { %v5016_v34 = vadd.f32 %v4928_v5, %v1273_v38  ;;  %v3433_v6 = vpop.f32.mrb[71].mxu1 }
 0x191   : > { %v5019_v41 = vadd.f32 %v3431_v28, %v4959_v59  ;;  %v5022_v46 = vadd.f32 %v4916_v56, %v1265_v15  ;;  %v3434_v55 = vadd.f32 %v3433_v6, %v3432_v10 }
 0x193   : > { %v5025_v62 = vadd.f32 %v3434_v55, %v4961_v36  ;;  %v3633_v31 = vpop.f32.mrb[72].mxu0 }
 0x194   : > { %v1286_v63 = vadd.f32 %v3633_v31, %v4897_v0  ;;  %v1277_v4 = vpop.f32.mrb[73].mxu0 }
 0x195   : > { %v3435_v17 = vpop.f32.mrb[72].mxu1  ;;  %v1278_v7 = vadd.f32 %v4885_v22, %v1277_v4  ;;  %v3634_v5 = vpop.f32.mrb[74].mxu0 }
 0x196   : > { %v5030_v3 = vadd.f32 %v4939_v49, %v1286_v63  ;;  %v3436_v59 = vpop.f32.mrb[73].mxu1  ;;  %v1289_v44 = vadd.f32 %v3634_v5, %v4901_v19  ;;  %v1280_v56 = vpop.f32.mrb[75].mxu0 }
 0x197   : > { %v5034_v32 = vadd.f32 %v4933_v24, %v1278_v7  ;;  %v3437_v36 = vadd.f32 %v3436_v59, %v3435_v17  ;;  %v3438_v54 = vpop.f32.mrb[74].mxu1  ;;  %v1281_v18 = vadd.f32 %v4889_v35, %v1280_v56 }
 0x198   : > { %v5038_v0 = vadd.f32 %v4941_v52, %v1289_v44  ;;  %v3439_v14 = vpop.f32.mrb[75].mxu1 }
 0x199   : > { %v5041_v22 = vadd.f32 %v3437_v36, %v4967_v25  ;;  %v1586_v49 = vadd.f32 %v4936_v37, %v1281_v18  ;;  %v3440_v48 = vadd.f32 %v3439_v14, %v3438_v54 }
 0x19b   : > { %v5045_v19 = vadd.f32 %v3440_v48, %v4969_v29  ;;  %v3637_v21 = vpop.f32.mrb[76].mxu0 }
 0x19c   : > { %v1302_v24 = vadd.f32 %v3637_v21, %v4921_v26  ;;  %v1293_v43 = vpop.f32.mrb[77].mxu0 }
 0x19d   : > { %v3441_v38 = vpop.f32.mrb[76].mxu1  ;;  %v1294_v35 = vadd.f32 %v4909_v61, %v1293_v43  ;;  %v3638_v11 = vpop.f32.mrb[78].mxu0 }
 0x19e   : > { %v5050_v52 = vadd.f32 %v4947_v13, %v1302_v24  ;;  %v3442_v28 = vpop.f32.mrb[77].mxu1  ;;  %v1305_v25 = vadd.f32 %v3638_v11, %v4925_v39  ;;  %v1296_v10 = vpop.f32.mrb[79].mxu0 }
 0x19f   : > { %v5054_v37 = vadd.f32 %v4943_v40, %v1294_v35  ;;  %v3443_v29 = vadd.f32 %v3442_v28, %v3441_v38  ;;  %v3444_v15 = vpop.f32.mrb[78].mxu1  ;;  %v1297_v6 = vadd.f32 %v4913_v30, %v1296_v10 }
 0x1a0   : > { %v5058_v26 = vadd.f32 %v4949_v9, %v1305_v25  ;;  %v3445_v55 = vpop.f32.mrb[79].mxu1 }
 0x1a1   : > { %v5061_v61 = vadd.f32 %v3443_v29, %v4975_v60  ;;  %v1602_v13 = vadd.f32 %v4945_v51, %v1297_v6  ;;  %v3446_v31 = vadd.f32 %v3445_v55, %v3444_v15 }
 0x1a3   : > { %v5065_v39 = vadd.f32 %v3446_v31, %v4977_v45  ;;  %v3487_v63 = vpop.f32.mrb[80].mxu0 }
 0x1a4   : > { %v3488_v40 = vpop.f32.mrb[81].mxu0 }
 0x1a5   : > { %v3489_v4 = vadd.f32 %v3488_v40, %v3487_v63  ;;  %v3490_v17 = vpop.f32.mrb[82].mxu0 }
 0x1a6   : > { %v3491_v7 = vpop.f32.mrb[83].mxu0 }
 0x1a7   : > { %v3492_v5 = vadd.f32 %v3491_v7, %v3490_v17  ;;  %v5068_v30 = vadd.f32 %v3489_v4, %v4990_v20 }
 0x1a9   : > { %v5071_v9 = vadd.f32 %v3492_v5, %v5000_v47 }
 0x1ab   : > { %v3493_v60 = vpop.f32.mrb[84].mxu0 }
 0x1ac   : > { %v3494_v59 = vpop.f32.mrb[85].mxu0 }
 0x1ad   : > { %v3495_v44 = vadd.f32 %v3494_v59, %v3493_v60  ;;  %v3496_v51 = vpop.f32.mrb[86].mxu0 }
 0x1ae   : > { %v3497_v56 = vpop.f32.mrb[87].mxu0 }
 0x1af   : > { %v3498_v36 = vadd.f32 %v3497_v56, %v3496_v51  ;;  %v3769_v45 = vadd.f32 %v3495_v44, %v4986_v1 }
 0x1b1   : > { %v3777_v54 = vadd.f32 %v3498_v36, %v4994_v33 }
 0x1b3   : > { %v3499_v18 = vpop.f32.mrb[88].mxu0 }
 0x1b4   : > { %v3500_v14 = vpop.f32.mrb[89].mxu0 }
 0x1b5   : > { %v3501_v48 = vadd.f32 %v3500_v14, %v3499_v18  ;;  %v3502_v21 = vpop.f32.mrb[90].mxu0 }
 0x1b6   : > { %v3503_v24 = vpop.f32.mrb[91].mxu0 }
 0x1b7   : > { %v3504_v20 = vadd.f32 %v3503_v24, %v3502_v21  ;;  %v5076_v43 = vadd.f32 %v3501_v48, %v5012_v58 }
 0x1b9   : > { %v5079_v47 = vadd.f32 %v3504_v20, %v5022_v46 }
 0x1bb   : > { %v3505_v38 = vpop.f32.mrb[92].mxu0 }
 0x1bc   : > { %v3506_v35 = vpop.f32.mrb[93].mxu0 }
 0x1bd   : > { %v3507_v11 = vadd.f32 %v3506_v35, %v3505_v38  ;;  %v3508_v28 = vpop.f32.mrb[94].mxu0 }
 0x1be   : > { %v3509_v25 = vpop.f32.mrb[95].mxu0 }
 0x1bf   : > { %v3510_v1 = vadd.f32 %v3509_v25, %v3508_v28  ;;  %v5082_v33 = vadd.f32 %v3507_v11, %v5008_v8 }
 0x1c1   : > { %v5085_v10 = vadd.f32 %v3510_v1, %v5016_v34 }
 0x1c3   : > { %v3511_v29 = vpop.f32.mrb[96].mxu0 }
 0x1c4   : > { %v3512_v15 = vpop.f32.mrb[97].mxu0 }
 0x1c5   : > { %v3513_v6 = vadd.f32 %v3512_v15, %v3511_v29  ;;  %v3514_v58 = vpop.f32.mrb[98].mxu0 }
 0x1c6   : > { %v3515_v55 = vpop.f32.mrb[99].mxu0 }
 0x1c7   : > { %v3516_v31 = vadd.f32 %v3515_v55, %v3514_v58  ;;  %v5088_v46 = vadd.f32 %v3513_v6, %v5034_v32 }
 0x1c9   : > { %v5090_v63 = vadd.f32 %v3516_v31, %v1586_v49 }
 0x1cb   : > { %v3517_v40 = vpop.f32.mrb[100].mxu0 }
 0x1cc   : > { %v3518_v4 = vpop.f32.mrb[101].mxu0 }
 0x1cd   : > { %v3519_v17 = vadd.f32 %v3518_v4, %v3517_v40  ;;  %v3520_v7 = vpop.f32.mrb[102].mxu0 }
 0x1ce   : > { %v3521_v8 = vpop.f32.mrb[103].mxu0 }
 0x1cf   : > { %v3522_v5 = vadd.f32 %v3521_v8, %v3520_v7  ;;  %v5093_v34 = vadd.f32 %v3519_v17, %v5030_v3 }
 0x1d1   : > { %v5096_v60 = vadd.f32 %v3522_v5, %v5038_v0 }
 0x1d3   : > { %v3523_v59 = vpop.f32.mrb[104].mxu0 }
 0x1d4   : > { %v3524_v44 = vpop.f32.mrb[105].mxu0 }
 0x1d5   : > { %v3525_v51 = vadd.f32 %v3524_v44, %v3523_v59  ;;  %v3526_v56 = vpop.f32.mrb[106].mxu0 }
 0x1d6   : > { %v3527_v32 = vpop.f32.mrb[107].mxu0 }
 0x1d7   : > { %v3528_v36 = vadd.f32 %v3527_v32, %v3526_v56  ;;  %v5099_v49 = vadd.f32 %v3525_v51, %v5054_v37 }
 0x1d9   : > { %v5101_v18 = vadd.f32 %v3528_v36, %v1602_v13 }
 0x1db   : > { %v3529_v14 = vpop.f32.mrb[108].mxu0 }
 0x1dc   : > { %v3530_v48 = vpop.f32.mrb[109].mxu0 }
 0x1dd   : > { %v3531_v21 = vadd.f32 %v3530_v48, %v3529_v14  ;;  %v3532_v24 = vpop.f32.mrb[110].mxu0 }
 0x1de   : > { %v3533_v3 = vpop.f32.mrb[111].mxu0 }
 0x1df   : > { %v3534_v20 = vadd.f32 %v3533_v3, %v3532_v24  ;;  %v5104_v0 = vadd.f32 %v3531_v21, %v5050_v52 }
 0x1e1   : > { %v5107_v38 = vadd.f32 %v3534_v20, %v5058_v26 }
 0x1e3   : > { %v3535_v35 = vpop.f32.mrb[112].mxu0 }
 0x1e4   : > { %v3536_v11 = vpop.f32.mrb[113].mxu0 }
 0x1e5   : > { %v3721_v28 = vpop.f32.mrb[80].mxu1  ;;  %v3537_v37 = vadd.f32 %v3536_v11, %v3535_v35  ;;  %v3538_v25 = vpop.f32.mrb[114].mxu0 }
 0x1e6   : > { %v3770_v13 = vadd.f32 %v3769_v45, %v3721_v28  ;;  %v2226_v1 = vpop.f32.mrb[81].mxu1  ;;  %v3539_v29 = vpop.f32.mrb[115].mxu0 }
 0x1e7   : > { %v3774_v15 = vadd.f32 %v5068_v30, %v2226_v1  ;;  %v3722_v6 = vpop.f32.mrb[82].mxu1  ;;  %v3540_v58 = vadd.f32 %v3539_v29, %v3538_v25  ;;  %v5111_v55 = vadd.f32 %v4955_v27, %v3537_v37  ;;  %v5217_v1 = vld [vmem:[#allocation2_spill] sm:$0xff] }
 0x1e8   : > { %v3778_v52 = vadd.f32 %v3777_v54, %v3722_v6  ;;  %v2229_v31 = vpop.f32.mrb[83].mxu1  ;;  %v2584_v8 = vmul.f32 %v3770_v13, %v3770_v13 }
 0x1e9   : > { %v3782_v26 = vadd.f32 %v5071_v9, %v2229_v31  ;;  %v5122_v45 = vadd.f32 %v4957_v50, %v3540_v58  ;;  %v2582_v40 = vmul.f32 %v3774_v15, %v3774_v15 }
 0x1ea   : > { %v3112_v30 = vpack.c.bf16 %v3778_v52, %v3770_v13  ;;  %v2585_v32 = vmul.f32 %v3778_v52, %v3778_v52 }
 0x1eb   : > { %v3107_v4 = vpack.c.bf16 %v3782_v26, %v3774_v15  ;;  %v2545_v27 = vadd.f32 %v3782_v26, %v3774_v15  ;;  %v2583_v17 = vmul.f32 %v3782_v26, %v3782_v26  ;;  %v3541_v54 = vpop.f32.mrb[116].mxu0 }
 0x1ec   : > { %3184 = vst [vmem:[%s5118_s16 + $0x8] sm:$0xff] %v3112_v30   ;;  %v3542_v7 = vpop.f32.mrb[117].mxu0 }
 0x1ed   : > { %3108 = vst [vmem:[%s5118_s16] sm:$0xff] %v3107_v4   ;;  %v2546_v5 = vadd.f32 %v3770_v13, %v2545_v27  ;;  %v2614_v59 = vadd.f32 %v2583_v17, %v2582_v40  ;;  %v3725_v44 = vpop.f32.mrb[84].mxu1  ;;  %v3543_v51 = vadd.f32 %v3542_v7, %v3541_v54  ;;  %v3544_v56 = vpop.f32.mrb[118].mxu0 }
 0x1ee   : > { %v3786_v9 = vadd.f32 %v5082_v33, %v3725_v44  ;;  %v2242_v50 = vpop.f32.mrb[85].mxu1  ;;  %v3545_v36 = vpop.f32.mrb[119].mxu0 }
 0x1ef   : > { %v2615_v14 = vadd.f32 %v2614_v59, %v2584_v8  ;;  %v3790_v48 = vadd.f32 %v5076_v43, %v2242_v50  ;;  %v2547_v21 = vadd.f32 %v3778_v52, %v2546_v5  ;;  %v3726_v24 = vpop.f32.mrb[86].mxu1  ;;  %v3546_v3 = vadd.f32 %v3545_v36, %v3544_v56 }
 0x1f0   : > { %v3794_v20 = vadd.f32 %v5085_v10, %v3726_v24  ;;  %v2245_v35 = vpop.f32.mrb[87].mxu1  ;;  %v5130_v11 = vadd.f32 %v4963_v2, %v3543_v51  ;;  %v2588_v31 = vmul.f32 %v3786_v9, %v3786_v9 }
 0x1f1   : > { %v2548_v28 = vadd.f32 %v3790_v48, %v2547_v21  ;;  %v2586_v37 = vmul.f32 %v3790_v48, %v3790_v48  ;;  %v2616_v25 = vadd.f32 %v2615_v14, %v2585_v32  ;;  %v3798_v33 = vadd.f32 %v5079_v47, %v2245_v35 }
 0x1f2   : > { %v3122_v13 = vpack.c.bf16 %v3794_v20, %v3786_v9  ;;  %v5134_v29 = vadd.f32 %v5217_v1, %v3546_v3  ;;  %v2589_v27 = vmul.f32 %v3794_v20, %v3794_v20 }
 0x1f3   : > { %v2617_v43 = vadd.f32 %v2616_v25, %v2586_v37  ;;  %v3117_v15 = vpack.c.bf16 %v3798_v33, %v3790_v48  ;;  %v2549_v6 = vadd.f32 %v3798_v33, %v2548_v28  ;;  %v2587_v58 = vmul.f32 %v3798_v33, %v3798_v33  ;;  %v3547_v52 = vpop.f32.mrb[120].mxu0 }
 0x1f4   : > { %3186 = vst [vmem:[%s5118_s16 + $0x18] sm:$0xff] %v3122_v13   ;;  %v3548_v10 = vpop.f32.mrb[121].mxu0 }
 0x1f5   : > { %3185 = vst [vmem:[%s5118_s16 + $0x10] sm:$0xff] %v3117_v15   ;;  %v2550_v2 = vadd.f32 %v3786_v9, %v2549_v6  ;;  %v2618_v26 = vadd.f32 %v2617_v43, %v2587_v58  ;;  %v3729_v30 = vpop.f32.mrb[88].mxu1  ;;  %v3549_v40 = vadd.f32 %v3548_v10, %v3547_v52  ;;  %v3550_v4 = vpop.f32.mrb[122].mxu0 }
 0x1f6   : > { %v3802_v47 = vadd.f32 %v5093_v34, %v3729_v30  ;;  %v2258_v17 = vpop.f32.mrb[89].mxu1  ;;  %v3551_v54 = vpop.f32.mrb[123].mxu0 }
 0x1f7   : > { %v2619_v7 = vadd.f32 %v2618_v26, %v2588_v31  ;;  %v3806_v8 = vadd.f32 %v5088_v46, %v2258_v17  ;;  %v2551_v5 = vadd.f32 %v3794_v20, %v2550_v2  ;;  %v3730_v59 = vpop.f32.mrb[90].mxu1  ;;  %v3552_v44 = vadd.f32 %v3551_v54, %v3550_v4 }
 0x1f8   : > { %v3810_v51 = vadd.f32 %v5096_v60, %v3730_v59  ;;  %v2261_v56 = vpop.f32.mrb[91].mxu1  ;;  %v5142_v32 = vadd.f32 %v4971_v42, %v3549_v40  ;;  %v2592_v35 = vmul.f32 %v3802_v47, %v3802_v47 }
 0x1f9   : > { %v2552_v9 = vadd.f32 %v3806_v8, %v2551_v5  ;;  %v2590_v50 = vmul.f32 %v3806_v8, %v3806_v8  ;;  %v2620_v36 = vadd.f32 %v2619_v7, %v2589_v27  ;;  %v3814_v34 = vadd.f32 %v5090_v63, %v2261_v56 }
 0x1fa   : > { %v3132_v14 = vpack.c.bf16 %v3810_v51, %v3802_v47  ;;  %v5146_v48 = vadd.f32 %v4973_v53, %v3552_v44  ;;  %v2593_v13 = vmul.f32 %v3810_v51, %v3810_v51 }
 0x1fb   : > { %v2621_v46 = vadd.f32 %v2620_v36, %v2590_v50  ;;  %v3127_v21 = vpack.c.bf16 %v3814_v34, %v3806_v8  ;;  %v2553_v24 = vadd.f32 %v3814_v34, %v2552_v9  ;;  %v2591_v3 = vmul.f32 %v3814_v34, %v3814_v34  ;;  %v3553_v20 = vpop.f32.mrb[124].mxu0 }
 0x1fc   : > { %3188 = vst [vmem:[%s5118_s16 + $0x28] sm:$0xff] %v3132_v14   ;;  %v3554_v60 = vpop.f32.mrb[125].mxu0 }
 0x1fd   : > { %3187 = vst [vmem:[%s5118_s16 + $0x20] sm:$0xff] %v3127_v21   ;;  %v2554_v42 = vadd.f32 %v3802_v47, %v2553_v24  ;;  %v2622_v28 = vadd.f32 %v2621_v46, %v2591_v3  ;;  %v3733_v37 = vpop.f32.mrb[92].mxu1  ;;  %v3555_v25 = vadd.f32 %v3554_v60, %v3553_v20  ;;  %v3556_v33 = vpop.f32.mrb[126].mxu0 }
 0x1fe   : > { %v3818_v63 = vadd.f32 %v5104_v0, %v3733_v37  ;;  %v2274_v1 = vpop.f32.mrb[93].mxu1  ;;  %v3557_v53 = vpop.f32.mrb[127].mxu0 }
 0x1ff   : > { %v2623_v43 = vadd.f32 %v2622_v28, %v2592_v35  ;;  %v3822_v15 = vadd.f32 %v5099_v49, %v2274_v1  ;;  %v2555_v6 = vadd.f32 %v3810_v51, %v2554_v42  ;;  %v3734_v58 = vpop.f32.mrb[94].mxu1  ;;  %v3558_v52 = vadd.f32 %v3557_v53, %v3556_v33 }
 0x200   : > { %v3826_v10 = vadd.f32 %v5107_v38, %v3734_v58  ;;  %v2277_v31 = vpop.f32.mrb[95].mxu1  ;;  %v3844_v2 = vadd.f32 %v4979_v57, %v3555_v25  ;;  %v2596_v38 = vmul.f32 %v3818_v63, %v3818_v63 }
 0x201   : > { %v2556_v26 = vadd.f32 %v3822_v15, %v2555_v6  ;;  %v2594_v30 = vmul.f32 %v3822_v15, %v3822_v15  ;;  %v2624_v40 = vadd.f32 %v2623_v43, %v2593_v13  ;;  %v3830_v0 = vadd.f32 %v5101_v18, %v2277_v31 }
 0x202   : > { %v3142_v4 = vpack.c.bf16 %v3826_v10, %v3818_v63  ;;  %v3850_v27 = vadd.f32 %v4981_v23, %v3558_v52  ;;  %v2597_v56 = vmul.f32 %v3826_v10, %v3826_v10 }
 0x203   : > { %v2625_v47 = vadd.f32 %v2624_v40, %v2594_v30  ;;  %v3137_v49 = vpack.c.bf16 %v3830_v0, %v3822_v15  ;;  %v2557_v17 = vadd.f32 %v3830_v0, %v2556_v26  ;;  %v2595_v54 = vmul.f32 %v3830_v0, %v3830_v0  ;;  %v3559_v7 = vpop.f32.mrb[128].mxu0 }
 0x204   : > { %3190 = vst [vmem:[%s5118_s16 + $0x38] sm:$0xff] %v3142_v4   ;;  %v3560_v8 = vpop.f32.mrb[129].mxu0 }
 0x205   : > { %3189 = vst [vmem:[%s5118_s16 + $0x30] sm:$0xff] %v3137_v49   ;;  %v2558_v5 = vadd.f32 %v3818_v63, %v2557_v17  ;;  %v2626_v59 = vadd.f32 %v2625_v47, %v2595_v54  ;;  %v3737_v57 = vpop.f32.mrb[0].mxu1  ;;  %v3561_v44 = vadd.f32 %v3560_v8, %v3559_v7  ;;  %v3562_v51 = vpop.f32.mrb[130].mxu0 }
 0x206   : > { %v3833_v18 = vadd.f32 %v5130_v11, %v3737_v57  ;;  %v2290_v9 = vpop.f32.mrb[1].mxu1  ;;  %v3563_v50 = vpop.f32.mrb[131].mxu0 }
 0x207   : > { %v2627_v23 = vadd.f32 %v2626_v59, %v2596_v38  ;;  %v3836_v36 = vadd.f32 %v5111_v55, %v2290_v9  ;;  %v2559_v34 = vadd.f32 %v3826_v10, %v2558_v5  ;;  %v3738_v14 = vpop.f32.mrb[2].mxu1  ;;  %v3564_v46 = vadd.f32 %v3563_v50, %v3562_v51 }
 0x208   : > { %v3839_v21 = vadd.f32 %v5134_v29, %v3738_v14  ;;  %v2293_v24 = vpop.f32.mrb[3].mxu1  ;;  %v3859_v3 = vadd.f32 %v4997_v16, %v3561_v44  ;;  %v2600_v29 = vmul.f32 %v3833_v18, %v3833_v18 }
 0x209   : > { %v2560_v20 = vadd.f32 %v3836_v36, %v2559_v34  ;;  %v2598_v60 = vmul.f32 %v3836_v36, %v3836_v36  ;;  %v2628_v35 = vadd.f32 %v2627_v23, %v2597_v56  ;;  %v3842_v11 = vadd.f32 %v5122_v45, %v2293_v24 }
 0x20a   : > { %v3152_v42 = vpack.c.bf16 %v3839_v21, %v3833_v18  ;;  %v3865_v28 = vadd.f32 %v5003_v12, %v3564_v46  ;;  %v2601_v6 = vmul.f32 %v3839_v21, %v3839_v21 }
 0x20b   : > { %v2629_v37 = vadd.f32 %v2628_v35, %v2598_v60  ;;  %v3147_v55 = vpack.c.bf16 %v3842_v11, %v3836_v36  ;;  %v2561_v25 = vadd.f32 %v3842_v11, %v2560_v20  ;;  %v2599_v33 = vmul.f32 %v3842_v11, %v3842_v11  ;;  %v3565_v13 = vpop.f32.mrb[132].mxu0 }
 0x20c   : > { %3192 = vst [vmem:[%s5118_s16 + $0x48] sm:$0xff] %v3152_v42   ;;  %v3566_v63 = vpop.f32.mrb[133].mxu0 }
 0x20d   : > { %3191 = vst [vmem:[%s5118_s16 + $0x40] sm:$0xff] %v3147_v55   ;;  %v2562_v1 = vadd.f32 %v3833_v18, %v2561_v25  ;;  %v2630_v53 = vadd.f32 %v2629_v37, %v2599_v33  ;;  %v3741_v16 = vpop.f32.mrb[4].mxu1  ;;  %v3567_v43 = vadd.f32 %v3566_v63, %v3565_v13  ;;  %v3568_v15 = vpop.f32.mrb[134].mxu0 }
 0x20e   : > { %v3845_v58 = vadd.f32 %v3844_v2, %v3741_v16  ;;  %v2306_v45 = vpop.f32.mrb[5].mxu1  ;;  %v3569_v52 = vpop.f32.mrb[135].mxu0 }
 0x20f   : > { %v2631_v10 = vadd.f32 %v2630_v53, %v2600_v29  ;;  %v3848_v12 = vadd.f32 %v5142_v32, %v2306_v45  ;;  %v2563_v31 = vadd.f32 %v3839_v21, %v2562_v1  ;;  %v3742_v26 = vpop.f32.mrb[6].mxu1  ;;  %v3570_v30 = vadd.f32 %v3569_v52, %v3568_v15 }
 0x210   : > { %v3851_v40 = vadd.f32 %v3850_v27, %v3742_v26  ;;  %v2309_v0 = vpop.f32.mrb[7].mxu1  ;;  %v3856_v4 = vadd.f32 %v5019_v41, %v3567_v43  ;;  %v2604_v27 = vmul.f32 %v3845_v58, %v3845_v58 }
 0x211   : > { %v2564_v47 = vadd.f32 %v3848_v12, %v2563_v31  ;;  %v2602_v49 = vmul.f32 %v3848_v12, %v3848_v12  ;;  %v2632_v17 = vadd.f32 %v2631_v10, %v2601_v6  ;;  %v3854_v54 = vadd.f32 %v5146_v48, %v2309_v0 }
 0x212   : > { %v3162_v2 = vpack.c.bf16 %v3851_v40, %v3845_v58  ;;  %v3862_v7 = vadd.f32 %v5025_v62, %v3570_v30  ;;  %v2605_v9 = vmul.f32 %v3851_v40, %v3851_v40 }
 0x213   : > { %v2633_v8 = vadd.f32 %v2632_v17, %v2602_v49  ;;  %v3157_v38 = vpack.c.bf16 %v3854_v54, %v3848_v12  ;;  %v2565_v32 = vadd.f32 %v3854_v54, %v2564_v47  ;;  %v2603_v5 = vmul.f32 %v3854_v54, %v3854_v54  ;;  %v3571_v59 = vpop.f32.mrb[136].mxu0 }
 0x214   : > { %3194 = vst [vmem:[%s5118_s16 + $0x58] sm:$0xff] %v3162_v2   ;;  %v3572_v57 = vpop.f32.mrb[137].mxu0 }
 0x215   : > { %3193 = vst [vmem:[%s5118_s16 + $0x50] sm:$0xff] %v3157_v38   ;;  %v2566_v44 = vadd.f32 %v3845_v58, %v2565_v32  ;;  %v2634_v51 = vadd.f32 %v2633_v8, %v2603_v5  ;;  %v3745_v41 = vpop.f32.mrb[8].mxu1  ;;  %v3573_v56 = vadd.f32 %v3572_v57, %v3571_v59  ;;  %v3574_v18 = vpop.f32.mrb[138].mxu0 }
 0x216   : > { %v3857_v50 = vadd.f32 %v3856_v4, %v3745_v41  ;;  %v2322_v48 = vpop.f32.mrb[9].mxu1  ;;  %v3575_v23 = vpop.f32.mrb[139].mxu0 }
 0x217   : > { %v2635_v36 = vadd.f32 %v2634_v51, %v2604_v27  ;;  %v3860_v62 = vadd.f32 %v3859_v3, %v2322_v48  ;;  %v2567_v34 = vadd.f32 %v3851_v40, %v2566_v44  ;;  %v3746_v14 = vpop.f32.mrb[10].mxu1  ;;  %v3576_v46 = vadd.f32 %v3575_v23, %v3574_v18 }
 0x218   : > { %v3863_v21 = vadd.f32 %v3862_v7, %v3746_v14  ;;  %v2325_v24 = vpop.f32.mrb[11].mxu1  ;;  %v3871_v20 = vadd.f32 %v5041_v22, %v3573_v56  ;;  %v2608_v1 = vmul.f32 %v3857_v50, %v3857_v50 }
 0x219   : > { %v2568_v60 = vadd.f32 %v3860_v62, %v2567_v34  ;;  %v2606_v35 = vmul.f32 %v3860_v62, %v3860_v62  ;;  %v2636_v11 = vadd.f32 %v2635_v36, %v2605_v9  ;;  %v3866_v42 = vadd.f32 %v3865_v28, %v2325_v24 }
 0x21a   : > { %v3172_v37 = vpack.c.bf16 %v3863_v21, %v3857_v50  ;;  %v3877_v55 = vadd.f32 %v5045_v19, %v3576_v46  ;;  %v2609_v6 = vmul.f32 %v3863_v21, %v3863_v21 }
 0x21b   : > { %v2637_v25 = vadd.f32 %v2636_v11, %v2606_v35  ;;  %v3167_v33 = vpack.c.bf16 %v3866_v42, %v3860_v62  ;;  %v2569_v13 = vadd.f32 %v3866_v42, %v2568_v60  ;;  %v2607_v3 = vmul.f32 %v3866_v42, %v3866_v42  ;;  %v3577_v63 = vpop.f32.mrb[140].mxu0 }
 0x21c   : > { %3196 = vst [vmem:[%s5118_s16 + $0x68] sm:$0xff] %v3172_v37   ;;  %v3578_v29 = vpop.f32.mrb[141].mxu0 }
 0x21d   : > { %3195 = vst [vmem:[%s5118_s16 + $0x60] sm:$0xff] %v3167_v33   ;;  %v2570_v53 = vadd.f32 %v3857_v50, %v2569_v13  ;;  %v2638_v16 = vadd.f32 %v2637_v25, %v2607_v3  ;;  %v3749_v43 = vpop.f32.mrb[12].mxu1  ;;  %v3579_v22 = vadd.f32 %v3578_v29, %v3577_v63  ;;  %v3580_v15 = vpop.f32.mrb[142].mxu0 }
 0x21e   : > { %v2338_v58 = vpop.f32.mrb[13].mxu1  ;;  %v3581_v28 = vpop.f32.mrb[143].mxu0 }
 0x21f   : > { %v2639_v45 = vadd.f32 %v2638_v16, %v2608_v1  ;;  %v3868_v19 = vadd.f32 %v5061_v61, %v3579_v22  ;;  %v3872_v52 = vadd.f32 %v3871_v20, %v2338_v58  ;;  %v2571_v10 = vadd.f32 %v3863_v21, %v2570_v53  ;;  %v3750_v12 = vpop.f32.mrb[14].mxu1 }
 0x220   : > { %v3582_v31 = vadd.f32 %v3581_v28, %v3580_v15  ;;  %v2341_v26 = vpop.f32.mrb[15].mxu1 }
 0x221   : > { %v3869_v30 = vadd.f32 %v3868_v19, %v3749_v43  ;;  %v2572_v40 = vadd.f32 %v3872_v52, %v2571_v10  ;;  %v2610_v0 = vmul.f32 %v3872_v52, %v3872_v52  ;;  %v2640_v4 = vadd.f32 %v2639_v45, %v2609_v6 }
 0x222   : > { %v3874_v47 = vadd.f32 %v5065_v39, %v3582_v31  ;;  %v3878_v49 = vadd.f32 %v3877_v55, %v2341_v26 }
 0x223   : > { %v2612_v17 = vmul.f32 %v3869_v30, %v3869_v30  ;;  %v2641_v54 = vadd.f32 %v2640_v4, %v2610_v0 }
 0x224   : > { %v3875_v2 = vadd.f32 %v3874_v47, %v3750_v12  ;;  %v3177_v7 = vpack.c.bf16 %v3878_v49, %v3872_v52  ;;  %v2573_v8 = vadd.f32 %v3878_v49, %v2572_v40  ;;  %v2611_v61 = vmul.f32 %v3878_v49, %v3878_v49 }
 0x226   : > { %v3182_v38 = vpack.c.bf16 %v3875_v2, %v3869_v30  ;;  %v2613_v32 = vmul.f32 %v3875_v2, %v3875_v2  ;;  %3197 = vst [vmem:[%s5118_s16 + $0x70] sm:$0xff] %v3177_v7   ;;  %v2574_v5 = vadd.f32 %v3869_v30, %v2573_v8  ;;  %v2642_v59 = vadd.f32 %v2641_v54, %v2611_v61 }
 0x228   : > { %3198 = vst [vmem:[%s5118_s16 + $0x78] sm:$0xff] %v3182_v38   ;;  %v2575_v57 = vadd.f32 %v3875_v2, %v2574_v5  ;;  %v2643_v27 = vadd.f32 %v2642_v59, %v2612_v17 }
 0x22a   : > { %v2576_v44 = vrot.slane %v2575_v57, 4  ;;  %v2644_v51 = vadd.f32 %v2643_v27, %v2613_v32 }
 0x22c   : > { %v2577_v41 = vadd.f32 %v2576_v44, %v2575_v57  ;;  %v2645_v39 = vrot.slane %v2644_v51, 4 }
 0x22e   : > { %v2578_v56 = vrot.slane %v2577_v41, 2  ;;  %v2646_v18 = vadd.f32 %v2645_v39, %v2644_v51 }
 0x230   : > { %v2579_v9 = vadd.f32 %v2578_v56, %v2577_v41  ;;  %v2647_v50 = vrot.slane %v2646_v18, 2 }
 0x232   : > { %v2580_v48 = vrot.slane %v2579_v9, 1  ;;  %v2648_v23 = vadd.f32 %v2647_v50, %v2646_v18 }
 0x234   : > { %v2649_v36 = vrot.slane %v2648_v23, 1  ;;  %v2581_v62 = vadd.f32 %v2580_v48, %v2579_v9 }
 0x236   : > { %v2650_v34 = vadd.f32 %v2649_v36, %v2648_v23 }
 0x238   : > { %v2652_v14 = vsel %vm695_vm1, %v2581_v62, %v2650_v34 }
 0x239   : > { %2653 = vst [vmem:[%s411_s21] sm:$0x3] %v2652_v14 }
 0x23a PF: > { %s16_s0 = sadd.s32 1, %s4064_s0   ;;  %s5218_s18 = smov %s4060_s19 }
 0x23b   : > { %p13_p5 = scmp.ge.s32.totalorder %s16_s0, 4   ;;  %s5219_s19 = smov %s5221_s2 }
 0x23d   :  { %15 = sbr.rel (!%p13_p5) target bundleno = 2 (0x2), region = 86 }

// kernel: basic_block_forward.4
= control target key start
LH: loop header
LB: loop body
LE: loop exit
PB: predicated region body
PF: predicated region fallthrough
CT: control target
= control target key end

     0   :  { %s4276_s23 = smov 0   ;;  %s4278_s24 = smov 0   ;;  %s5465_s0 = inlined_call_operand.vmem [shape: bf16[2,16,16,128], index: 0, kind: input, shape index: {}, may-alias: {0,1,2}]   ;;  %s5466_s1 = inlined_call_operand.vmem [shape: bf16[2,16,16,128], index: 1, kind: input, shape index: {}, may-alias: {0,1,2}]   ;;  %s5467_s2 = inlined_call_operand.vmem [shape: bf16[2,16,16,128], index: 2, kind: input, shape index: {}, may-alias: {0,1,2}]   ;;  %s5468_s3 = inlined_call_operand.vmem [shape: bf16[3,384,128], index: 3, kind: input, shape index: {}]   ;;  %s5469_s4 = inlined_call_operand.vmem [shape: f32[1,128], index: 4, kind: input, shape index: {}]   ;;  %s5470_s5 = inlined_call_operand.vmem [shape: f32[1,128], index: 5, kind: input, shape index: {}]   ;;  %s5471_s6 = inlined_call_operand.vmem [shape: bf16[2,16,16,128], index: 6, kind: output, shape index: {0}]   ;;  %s5472_s7 = inlined_call_operand.vmem [shape: f32[2,1,2,128], index: 7, kind: output, shape index: {1}]  }
   0x1   :  { %s4280_s2 = smov 0  }
   0x2 LB: > { %s30_s25 = sadd.s32 1, %s4228_s24  ;;  %p2959_p0 = scmp.ge.s32.totalorder %s4232_s2, 1  ;;  %s4232_s2 = sphi %s4280_s2, %s18_s2   ;;  %s4228_s24 = sphi %s4278_s24, %s5500_s24   ;;  %s4224_s23 = sphi %s4276_s23, %s5499_s23  }
   0x3   : > { %p32_p1 = scmp.ge.s32.totalorder %s30_s25, 2  ;;  %p328_p2 = scmp.lt.s32.totalorder %s4232_s2, 3 }
   0x5   : > { %s5502_s25 = smov (%p32_p1, %s30_s25), 0  ;;  %p329_p3 = pnand %p2959_p0, %p328_p2 }
   0x6   : > { %v4138_v0 = vld [vmem:[%s5468_s3 + $0x100] sm:$0xff] (!%p329_p3)   ;;  %v4141_v3 = vld [vmem:[%s5468_s3 + $0x108] sm:$0xff] (!%p329_p3)   ;;  %v4144_v6 = vld [vmem:[%s5468_s3 + $0x110] sm:$0xff] (!%p329_p3)   ;;  %p421_p4 = scmp.lt.s32.totalorder (!%p329_p3), %s4224_s23, 1  ;;  %vm835_vm0 = vcmask (!%p329_p3), 1040384   ;;  %v5473_v29 = vmov (!%p329_p3), 0  }
   0x7   : > { %332 = sbr.rel (%p329_p3) target bundleno = 569 (0x239), region = 44  ;;  %v4302_v1 = vld [vmem:[%s5468_s3 + $0x140] sm:$0xff] (!%p329_p3)   ;;  %3384 = vmatprep.subr.bf16.mxu0 (!%p329_p3), %v4138_v0  ;;  %v4315_v4 = vld [vmem:[%s5468_s3 + $0x148] sm:$0xff] (!%p329_p3)   ;;  %v4327_v7 = vld [vmem:[%s5468_s3 + $0x150] sm:$0xff] (!%p329_p3)   ;;  %vm836_vm1 = vsmask.f32 (!%p329_p3), 256 }
   0x8   : > { %v4140_v2 = vld [vmem:[%s5468_s3 + $0xc0] sm:$0xff] (!%p329_p3)   ;;  %3936 = vmatprep.subr.bf16.mxu1 (!%p329_p3), %v4302_v1  ;;  %v4143_v5 = vld [vmem:[%s5468_s3 + $0xc8] sm:$0xff] (!%p329_p3)   ;;  %v4146_v8 = vld [vmem:[%s5468_s3 + $0xd0] sm:$0xff] (!%p329_p3)   ;;  %v694_v30 = vrot.slane (!%p329_p3), %v5473_v29, 7  ;;  %vm910_vm2 = vcmask (!%p329_p3), 1047552  }
   0x9   : > { %3385 = vmatpush3.bf16.msra.mxu0 (!%p329_p3), %v4140_v2  ;;  %3944 = vmatpush3.bf16.msra.mxu1 (!%p329_p3), %v4302_v1  ;;  %v4147_v9 = vld [vmem:[%s5468_s3 + $0x118] sm:$0xff] (!%p329_p3)   ;;  %v4150_v12 = vld [vmem:[%s5468_s3 + $0x120] sm:$0xff] (!%p329_p3)   ;;  %v4153_v15 = vld [vmem:[%s5468_s3 + $0x128] sm:$0xff] (!%p329_p3)   ;;  %vm911_vm3 = vsmask.f32 (!%p329_p3), 7424 }
   0xa   : > { %3386 = vmatprep.subr.bf16.mxu0 (!%p329_p3), %v4141_v3  ;;  %3937 = vmatprep.subr.bf16.mxu1 (!%p329_p3), %v4315_v4  ;;  %v4340_v10 = vld [vmem:[%s5468_s3 + $0x158] sm:$0xff] (!%p329_p3)   ;;  %v4354_v13 = vld [vmem:[%s5468_s3 + $0x160] sm:$0xff] (!%p329_p3)   ;;  %v4370_v16 = vld [vmem:[%s5468_s3 + $0x168] sm:$0xff] (!%p329_p3)  }
   0xb   : > { %v4149_v11 = vld [vmem:[%s5468_s3 + $0xd8] sm:$0xff] (!%p329_p3)   ;;  %v4152_v14 = vld [vmem:[%s5468_s3 + $0xe0] sm:$0xff] (!%p329_p3)   ;;  %v4155_v17 = vld [vmem:[%s5468_s3 + $0xe8] sm:$0xff] (!%p329_p3)  }
   0xc   : > { %v4156_v18 = vld [vmem:[%s5468_s3 + $0x130] sm:$0xff] (!%p329_p3)   ;;  %v4159_v21 = vld [vmem:[%s5468_s3 + $0x138] sm:$0xff] (!%p329_p3)   ;;  %v4403_v22 = vld [vmem:[%s5469_s4] ss:$0 sm:$0xff] (!%p329_p3) }
   0xd   : > { %3387 = vmatpush3.bf16.msra.mxu0 (!%p329_p3), %v4143_v5  ;;  %3945 = vmatpush3.bf16.msra.mxu1 (!%p329_p3), %v4315_v4  ;;  %v4384_v19 = vld [vmem:[%s5468_s3 + $0x170] sm:$0xff] (!%p329_p3)   ;;  %v4410_v24 = vld [vmem:[%s5468_s3 + $0x178] sm:$0xff] (!%p329_p3)   ;;  %v4418_v31 = vld [vmem:[%s5470_s5] ss:$0 sm:$0xff] (!%p329_p3) }
   0xe   : > { %3388 = vmatprep.subr.bf16.mxu0 %v4144_v6  ;;  %3938 = vmatprep.subr.bf16.mxu1 %v4327_v7  ;;  %s5504_s23 = smov (!%p421_p4, %s4224_s23), 1  ;;  %v4158_v20 = vld [vmem:[%s5468_s3 + $0xf0] sm:$0xff]   ;;  %v4161_v36 = vld [vmem:[%s5468_s3 + $0xf8] sm:$0xff]   ;;  %vm4430_vm4 = vmand %vm835_vm0, %vm836_vm1 }
   0xf   : > { %s3174_s16 = sshll.u32 %s5504_s23, 7  ;;  %v4162_v46 = vld [vmem:[%s5468_s3 + $0x40] sm:$0xff]   ;;  %v4448_v51 = vsel %vm4430_vm4, 0, %v694_v30  ;;  %vm4481_vm5 = vmand %vm910_vm2, %vm911_vm3  ;;  %v4176_v29 = vld [vmem:[%s5468_s3 + $0x78] sm:$0xff]  }
  0x10   : > { %s4391_s27 = scalar_lea.vmem %s5466_s1, %s3174_s16  ;;  %v4955_v41 = vld [vmem:[%s5468_s3 + $0x200] sm:$0xff]   ;;  %s5383_s17 = scalar_lea.vmem %s5471_s6, %s3174_s16 }
  0x11   : > { %3389 = vmatpush3.bf16.msra.mxu0 %v4146_v8  ;;  %3946 = vmatpush3.bf16.msra.mxu1 %v4327_v7  ;;  %v3211_v23 = vld [vmem:[%s4391_s27] sm:$0xff]   ;;  %v3362_v28 = vld [vmem:[%s4391_s27 + $0x48] sm:$0xff]   ;;  %v3363_v56 = vld [vmem:[%s4391_s27 + $0x50] sm:$0xff]   ;;  %s2968_s16 = sshll.u32 %s5504_s23, 1 }
  0x12   : > { %3390 = vmatprep.subr.bf16.mxu0 %v4147_v9  ;;  %3939 = vmatprep.subr.bf16.mxu1 %v4340_v10  ;;  %v3212_v25 = vunpack.c.l.bf16 %v3211_v23  ;;  %v3213_v26 = vunpack.c.h.bf16 %v3211_v23  ;;  %v3361_v27 = vld [vmem:[%s4391_s27 + $0x40] sm:$0xff]   ;;  %v3248_v34 = vunpack.c.l.bf16 %v3362_v28  ;;  %v3249_v35 = vunpack.c.h.bf16 %v3362_v28  ;;  %v3354_v50 = vld [vmem:[%s4391_s27 + $0x8] sm:$0xff]   ;;  %v3364_v57 = vld [vmem:[%s4391_s27 + $0x58] sm:$0xff]   ;;  %s465_s20 = scalar_lea.vmem %s5472_s7, %s2968_s16 }
  0x13   : > { %v3244_v32 = vunpack.c.l.bf16 %v3361_v27  ;;  %v3245_v33 = vunpack.c.h.bf16 %v3361_v27  ;;  %v3216_v55 = vunpack.c.l.bf16 %v3354_v50  ;;  %v3217_v61 = vunpack.c.h.bf16 %v3354_v50  ;;  %v4164_v50 = vld [vmem:[%s5468_s3 + $0x48] sm:$0xff]  }
  0x14   : > { %v577_v37 = vmul.f32 %v3212_v25, %v4403_v22  ;;  %v578_v38 = vmul.f32 %v3213_v26, %v4403_v22  ;;  %v595_v42 = vmul.f32 %v3248_v34, %v4403_v22  ;;  %v596_v45 = vmul.f32 %v3249_v35, %v4403_v22 }
  0x15   : > { %3391 = vmatpush3.bf16.msra.mxu0 %v4149_v11  ;;  %3947 = vmatpush3.bf16.msra.mxu1 %v4340_v10  ;;  %v593_v39 = vmul.f32 %v3244_v32, %v4403_v22  ;;  %v594_v40 = vmul.f32 %v3245_v33, %v4403_v22  ;;  %v579_v0 = vmul.f32 %v3216_v55, %v4403_v22  ;;  %v3252_v2 = vunpack.c.l.bf16 %v3363_v56  ;;  %v3365_v55 = vld [vmem:[%s4391_s27 + $0x60] sm:$0xff]   ;;  %v4204_v33 = vld [vmem:[%s5468_s3 + $0x210] sm:$0xff]  }
  0x16   : > { %3392 = vmatprep.subr.bf16.mxu0 %v4150_v12  ;;  %3940 = vmatprep.subr.bf16.mxu1 %v4354_v13  ;;  %v609_v43 = vadd.f32 %v4418_v31, %v577_v37  ;;  %v610_v44 = vadd.f32 %v4418_v31, %v578_v38  ;;  %v627_v49 = vadd.f32 %v4418_v31, %v595_v42  ;;  %v3253_v6 = vunpack.c.h.bf16 %v3363_v56 }
  0x17   : > { %v625_v47 = vadd.f32 %v4418_v31, %v593_v39  ;;  %v626_v48 = vadd.f32 %v4418_v31, %v594_v40  ;;  %v628_v54 = vadd.f32 %v4418_v31, %v596_v45  ;;  %v580_v5 = vmul.f32 %v3217_v61, %v4403_v22 }
  0x18   : > { %v641_v52 = vmax.f32 %v609_v43, 0.0  ;;  %v642_v53 = vmax.f32 %v610_v44, 0.0  ;;  %v659_v60 = vmax.f32 %v627_v49, 0.0  ;;  %v3256_v8 = vunpack.c.l.bf16 %v3364_v57  ;;  %v3355_v43 = vld [vmem:[%s4391_s27 + $0x10] sm:$0xff]  }
  0x19   : > { %3393 = vmatpush3.bf16.msra.mxu0 %v4152_v14  ;;  %3948 = vmatpush3.bf16.msra.mxu1 %v4354_v13  ;;  %v657_v58 = vmax.f32 %v625_v47, 0.0  ;;  %v658_v59 = vmax.f32 %v626_v48, 0.0  ;;  %v660_v63 = vmax.f32 %v628_v54, 0.0  ;;  %v611_v14 = vadd.f32 %v4418_v31, %v579_v0 }
  0x1a   : > { %3394 = vmatprep.subr.bf16.mxu0 %v4153_v15  ;;  %3941 = vmatprep.subr.bf16.mxu1 %v4370_v16  ;;  %v4454_v62 = vpack.c.bf16 %v642_v53, %v641_v52  ;;  %v598_v30 = vmul.f32 %v3253_v6, %v4403_v22  ;;  %v599_v37 = vmul.f32 %v3256_v8, %v4403_v22  ;;  %v3221_v0 = vunpack.c.h.bf16 %v3355_v43  ;;  %v3366_v8 = vld [vmem:[%s4391_s27 + $0x68] sm:$0xff]  }
  0x1b   : > { %v4458_v3 = vpack.c.bf16 %v658_v59, %v657_v58  ;;  %v4464_v12 = vpack.c.bf16 %v660_v63, %v659_v60  ;;  %v643_v26 = vmax.f32 %v611_v14, 0.0  ;;  %v3220_v59 = vunpack.c.l.bf16 %v3355_v43  ;;  %v4165_v60 = vld [vmem:[%s5468_s3 + $0x8] sm:$0xff]  }
  0x1c   : > { %1204 = vmatprep.mubr.bf16.mxu0 %v4454_v62  ;;  %v5476_v9 = vshrl.u32 %v4454_v62, 16  ;;  %v5480_v11 = vshll.u32 %v4454_v62, 16  ;;  %v630_v40 = vadd.f32 %v4418_v31, %v598_v30  ;;  %v631_v48 = vadd.f32 %v4418_v31, %v599_v37 }
  0x1d   : > { %3395 = vmatpush3.bf16.msra.mxu0 %v4155_v17  ;;  %3949 = vmatpush3.bf16.msra.mxu1 %v4370_v16  ;;  %v755_v15 = vshrl.u32 %v4458_v3, 16  ;;  %v758_v17 = vshll.u32 %v4458_v3, 16  ;;  %v762_v23 = vshrl.u32 %v4464_v12, 16  ;;  %v765_v25 = vshll.u32 %v4464_v12, 16 }
  0x1e   : > { %3396 = vmatprep.subr.bf16.mxu0 %v4156_v18  ;;  %3942 = vmatprep.subr.bf16.mxu1 %v4384_v19  ;;  %v612_v18 = vadd.f32 %v4418_v31, %v580_v5  ;;  %v662_v52 = vmax.f32 %v630_v40, 0.0  ;;  %v663_v58 = vmax.f32 %v631_v48, 0.0  ;;  %v3260_v5 = vunpack.c.l.bf16 %v3365_v55 }
  0x1f   : > { %v874_v27 = vrot.slane %v758_v17, 1  ;;  %v876_v35 = vrot.slane %v765_v25, 1  ;;  %v3261_v6 = vunpack.c.h.bf16 %v3365_v55 }
  0x20   : > { %v644_v28 = vmax.f32 %v612_v18, 0.0  ;;  %v601_v30 = vmul.f32 %v3260_v5, %v4403_v22 }
  0x21   : > { %3397 = vmatpush3.bf16.msra.mxu0 %v4158_v20  ;;  %3950 = vmatpush3.bf16.msra.mxu1 %v4384_v19  ;;  %v597_v20 = vmul.f32 %v3252_v2, %v4403_v22  ;;  %v875_v38 = vor.u32 %v874_v27, %v755_v15  ;;  %v877_v45 = vor.u32 %v876_v35, %v762_v23 }
  0x22   : > { %3398 = vmatprep.subr.bf16.mxu0 %v4159_v21  ;;  %3943 = vmatprep.subr.bf16.mxu1 %v4410_v24  ;;  %v701_v21 = vrot.slane %v5476_v9, 7  ;;  %v4492_v39 = vpack.c.bf16 %v644_v28, %v643_v26  ;;  %v581_v2 = vmul.f32 %v3220_v59, %v4403_v22  ;;  %v582_v26 = vmul.f32 %v3221_v0, %v4403_v22  ;;  %v3360_v9 = vld [vmem:[%s4391_s27 + $0x38] sm:$0xff]  }
  0x23   : > { %v629_v32 = vadd.f32 %v4418_v31, %v597_v20  ;;  %v4509_v49 = vsel %vm4481_vm5, %v875_v38, 0  ;;  %v4521_v56 = vsel %vm4481_vm5, %v877_v45, 0  ;;  %v3264_v38 = vunpack.c.l.bf16 %v3366_v8 }
  0x24   : > { %v704_v34 = vor.u32 %v5480_v11, %v701_v21  ;;  %v5479_v53 = vshrl.u32 %v4492_v39, 16  ;;  %v709_v54 = vshll.u32 %v4492_v39, 16  ;;  %3824 = vmatprep.mubr.bf16.mxu1 %v4509_v49  ;;  %v4166_v21 = vld [vmem:[%s5468_s3 + $0x50] sm:$0xff]   ;;  %v613_v28 = vadd.f32 %v4418_v31, %v581_v2 }
  0x25   : > { %3399 = vmatpush3.bf16.msra.mxu0 %v4161_v36  ;;  %3951 = vmatpush3.bf16.msra.mxu1 %v4410_v24  ;;  %v3257_v36 = vunpack.c.h.bf16 %v3364_v57  ;;  %v661_v42 = vmax.f32 %v629_v32, 0.0  ;;  %v602_v32 = vmul.f32 %v3261_v6, %v4403_v22  ;;  %v614_v37 = vadd.f32 %v4418_v31, %v582_v26  ;;  %v4170_v6 = vld [vmem:[%s5468_s3 + $0x60] sm:$0xff]  }
  0x26   : > { %3792 = vmatprep.subr.bf16.mxu0 %v4302_v1  ;;  %3520 = vmatprep.subr.bf16.mxu1 %v4162_v46  ;;  %v4498_v44 = vsel %vm4430_vm4, 0, %v704_v34  ;;  %v4163_v46 = vld [vmem:[%s5468_s3] sm:$0xff]   ;;  %v708_v63 = vrot.slane %v5479_v53, 7  ;;  %v3356_v34 = vld [vmem:[%s4391_s27 + $0x18] sm:$0xff]   ;;  %v645_v43 = vmax.f32 %v613_v28, 0.0  ;;  %v633_v45 = vadd.f32 %v4418_v31, %v601_v30 }
  0x27   : > { %v600_v47 = vmul.f32 %v3257_v36, %v4403_v22  ;;  %v4530_v61 = vpack.c.bf16 %v662_v52, %v661_v42  ;;  %v646_v48 = vmax.f32 %v614_v37, 0.0  ;;  %v3265_v52 = vunpack.c.h.bf16 %v3366_v8 }
  0x28   : > { %1205 = vmatmul.mubr.bf16.vlgmr.msra.gmra.mrb[0].mxu0 %v4498_v44  ;;  %3825 = vmatmul.mubr.bf16.vlgmr.msra.gmra.mrb[0].mxu1 %v4521_v56  ;;  %v711_v20 = vor.u32 %v709_v54, %v708_v63  ;;  %v603_v59 = vmul.f32 %v3264_v38, %v4403_v22  ;;  %v3225_v8 = vunpack.c.h.bf16 %v3356_v34  ;;  %v4171_v38 = vld [vmem:[%s5468_s3 + $0x20] sm:$0xff]  }
  0x29   : > { %3793 = vmatpush3.bf16.msra.mxu0 %v4302_v1  ;;  %v632_v57 = vadd.f32 %v4418_v31, %v600_v47  ;;  %1212 = vmatprep.mubr.bf16.mxu0 %v4492_v39  ;;  %v769_v14 = vshrl.u32 %v4530_v61, 16  ;;  %v772_v18 = vshll.u32 %v4530_v61, 16  ;;  %v4168_v47 = vld [vmem:[%s5468_s3 + $0x58] sm:$0xff]   ;;  %v4584_v0 = vpack.c.bf16 %v646_v48, %v645_v43 }
  0x2a   : > { %3521 = vmatpush3.bf16.msra.mxu1 %v4163_v46  ;;  %3794 = vmatprep.subr.bf16.mxu0 %v4315_v4  ;;  %v4556_v36 = vsel %vm4430_vm4, 0, %v711_v20  ;;  %v604_v2 = vmul.f32 %v3265_v52, %v4403_v22 }
  0x2b   : > { %v664_v1 = vmax.f32 %v632_v57, 0.0  ;;  %3522 = vmatprep.subr.bf16.mxu1 %v4164_v50  ;;  %v878_v35 = vrot.slane %v772_v18, 1  ;;  %v634_v50 = vadd.f32 %v4418_v31, %v602_v32  ;;  %v4169_v57 = vld [vmem:[%s5468_s3 + $0x18] sm:$0xff]   ;;  %v5474_v26 = vshrl.u32 %v4584_v0, 16  ;;  %v3367_v32 = vld [vmem:[%s4391_s27 + $0x70] sm:$0xff]  }
  0x2c   : > { %v5477_v28 = vshll.u32 %v4584_v0, 16  ;;  %v636_v30 = vadd.f32 %v4418_v31, %v604_v2 }
  0x2d   : > { %v4545_v27 = vpack.c.bf16 %v664_v1, %v663_v58  ;;  %3795 = vmatpush3.bf16.msra.mxu0 %v4315_v4  ;;  %v4167_v4 = vld [vmem:[%s5468_s3 + $0x10] sm:$0xff]   ;;  %v879_v46 = vor.u32 %v878_v35, %v769_v14  ;;  %v665_v58 = vmax.f32 %v633_v45, 0.0  ;;  %v666_v1 = vmax.f32 %v634_v50, 0.0  ;;  %v3368_v35 = vld [vmem:[%s4391_s27 + $0x78] sm:$0xff]   ;;  %v4172_v50 = vld [vmem:[%s5468_s3 + $0x68] sm:$0xff]  }
  0x2e   : > { %3796 = vmatprep.subr.bf16.mxu0 %v4327_v7  ;;  %3523 = vmatpush3.bf16.msra.mxu1 %v4165_v60  ;;  %v3224_v60 = vunpack.c.l.bf16 %v3356_v34  ;;  %v668_v48 = vmax.f32 %v636_v30, 0.0  ;;  %v3272_v2 = vunpack.c.l.bf16 %v3368_v35  ;;  %v3273_v30 = vunpack.c.h.bf16 %v3368_v35 }
  0x2f   : > { %v776_v40 = vshrl.u32 %v4545_v27, 16  ;;  %v779_v42 = vshll.u32 %v4545_v27, 16  ;;  %3524 = vmatprep.subr.bf16.mxu1 %v4166_v21  ;;  %v4582_v63 = vsel %vm4481_vm5, %v879_v46, 0  ;;  %v4597_v21 = vpack.c.bf16 %v666_v1, %v665_v58 }
  0x30   : > { %1213 = vmatmul.mubr.bf16.gmra.mrb[4].mxu0 %v4556_v36  ;;  %3828 = vmatprep.mubr.bf16.mxu1 %v4582_v63  ;;  %v583_v20 = vmul.f32 %v3224_v60, %v4403_v22  ;;  %v3269_v58 = vunpack.c.h.bf16 %v3367_v32 }
  0x31   : > { %v880_v55 = vrot.slane %v779_v42, 1  ;;  %3797 = vmatpush3.bf16.msra.mxu0 %v4327_v7  ;;  %v635_v7 = vadd.f32 %v4418_v31, %v603_v59  ;;  %1220 = vmatprep.mubr.bf16.mxu0 %v4584_v0  ;;  %v783_v45 = vshrl.u32 %v4597_v21, 16  ;;  %v786_v46 = vshll.u32 %v4597_v21, 16 }
  0x32   : > { %3798 = vmatprep.subr.bf16.mxu0 %v4340_v10  ;;  %3525 = vmatpush3.bf16.msra.mxu1 %v4167_v4  ;;  %v584_v4 = vmul.f32 %v3225_v8, %v4403_v22  ;;  %v615_v43 = vadd.f32 %v4418_v31, %v583_v20  ;;  %v606_v20 = vmul.f32 %v3269_v58, %v4403_v22 }
  0x33   : > { %v881_v5 = vor.u32 %v880_v55, %v776_v40  ;;  %3526 = vmatprep.subr.bf16.mxu1 %v4168_v47  ;;  %v667_v34 = vmax.f32 %v635_v7, 0.0  ;;  %v715_v47 = vrot.slane %v5474_v26, 7  ;;  %v3268_v55 = vunpack.c.l.bf16 %v3367_v32 }
  0x34   : > { %v647_v52 = vmax.f32 %v615_v43, 0.0  ;;  %v882_v59 = vrot.slane %v786_v46, 1  ;;  %v4174_v43 = vld [vmem:[%s5468_s3 + $0x70] sm:$0xff]  }
  0x35   : > { %v4606_v37 = vsel %vm4481_vm5, %v881_v5, 0  ;;  %3799 = vmatpush3.bf16.msra.mxu0 %v4340_v10  ;;  %v616_v10 = vadd.f32 %v4418_v31, %v584_v4  ;;  %v718_v60 = vor.u32 %v5477_v28, %v715_v47  ;;  %v4628_v1 = vpack.c.bf16 %v668_v48, %v667_v34  ;;  %v4173_v5 = vld [vmem:[%s5468_s3 + $0x28] sm:$0xff]  }
  0x36   : > { %3829 = vmatmul.mubr.bf16.gmra.mrb[4].mxu1 %v4606_v37  ;;  %3800 = vmatprep.subr.bf16.mxu0 %v4354_v13  ;;  %v605_v8 = vmul.f32 %v3268_v55, %v4403_v22  ;;  %v883_v32 = vor.u32 %v882_v59, %v783_v45  ;;  %v638_v47 = vadd.f32 %v4418_v31, %v606_v20  ;;  %v4175_v20 = vld [vmem:[%s5468_s3 + $0x30] sm:$0xff]  }
  0x37   : > { %3527 = vmatpush3.bf16.msra.mxu1 %v4169_v57  ;;  %v3357_v57 = vld [vmem:[%s4391_s27 + $0x20] sm:$0xff]   ;;  %v648_v7 = vmax.f32 %v616_v10, 0.0  ;;  %v790_v34 = vshrl.u32 %v4628_v1, 16  ;;  %v793_v4 = vshll.u32 %v4628_v1, 16  ;;  %v3358_v10 = vld [vmem:[%s4391_s27 + $0x28] sm:$0xff]   ;;  %v607_v59 = vmul.f32 %v3272_v2, %v4403_v22 }
  0x38   : > { %3528 = vmatprep.subr.bf16.mxu1 %v4170_v6  ;;  %v4641_v6 = vsel %vm4430_vm4, 0, %v718_v60  ;;  %v637_v35 = vadd.f32 %v4418_v31, %v605_v8  ;;  %v3228_v48 = vunpack.c.l.bf16 %v3357_v57  ;;  %v4657_v55 = vsel %vm4481_vm5, %v883_v32, 0 }
  0x39   : > { %3801 = vmatpush3.bf16.msra.mxu0 %v4354_v13  ;;  %v4650_v13 = vpack.c.bf16 %v648_v7, %v647_v52  ;;  %v884_v58 = vrot.slane %v793_v4, 1  ;;  %3832 = vmatprep.mubr.bf16.mxu1 %v4657_v55  ;;  %v670_v60 = vmax.f32 %v638_v47, 0.0  ;;  %v639_v2 = vadd.f32 %v4418_v31, %v607_v59 }
  0x3a   : > { %3802 = vmatprep.subr.bf16.mxu0 %v4370_v16  ;;  %1221 = vmatmul.mubr.bf16.gmra.mrb[8].mxu0 %v4641_v6  ;;  %v669_v52 = vmax.f32 %v637_v35, 0.0  ;;  %v3229_v32 = vunpack.c.h.bf16 %v3357_v57  ;;  %v3232_v26 = vunpack.c.l.bf16 %v3358_v10 }
  0x3b   : > { %3529 = vmatpush3.bf16.msra.mxu1 %v4171_v38  ;;  %v608_v38 = vmul.f32 %v3273_v30, %v4403_v22  ;;  %1228 = vmatprep.mubr.bf16.mxu0 %v4650_v13  ;;  %v5475_v7 = vshrl.u32 %v4650_v13, 16  ;;  %v5478_v8 = vshll.u32 %v4650_v13, 16 }
  0x3c   : > { %3530 = vmatprep.subr.bf16.mxu1 %v4172_v50  ;;  %v885_v50 = vor.u32 %v884_v58, %v790_v34  ;;  %v4675_v35 = vpack.c.bf16 %v670_v60, %v669_v52  ;;  %v585_v58 = vmul.f32 %v3228_v48, %v4403_v22  ;;  %v586_v59 = vmul.f32 %v3229_v32, %v4403_v22 }
  0x3d   : > { %v640_v30 = vadd.f32 %v4418_v31, %v608_v38  ;;  %3803 = vmatpush3.bf16.msra.mxu0 %v4370_v16  ;;  %v722_v47 = vrot.slane %v5475_v7, 7  ;;  %v671_v16 = vmax.f32 %v639_v2, 0.0  ;;  %v3359_v38 = vld [vmem:[%s4391_s27 + $0x30] sm:$0xff]   ;;  %v3233_v32 = vunpack.c.h.bf16 %v3358_v10  ;;  %v4185_v10 = vld [vmem:[%s5468_s3 + $0x1c0] sm:$0xff]  }
  0x3e   : > { %3804 = vmatprep.subr.bf16.mxu0 %v4384_v19  ;;  %v4686_v57 = vsel %vm4481_vm5, %v885_v50, 0  ;;  %v797_v52 = vshrl.u32 %v4675_v35, 16  ;;  %v5481_v48 = vshll.u32 %v4675_v35, 16  ;;  %v4177_v50 = vld [vmem:[%s5468_s3 + $0x38] sm:$0xff]   ;;  %v617_v2 = vadd.f32 %v4418_v31, %v585_v58 }
  0x3f   : > { %3531 = vmatpush3.bf16.msra.mxu1 %v4173_v5  ;;  %v672_v5 = vmax.f32 %v640_v30, 0.0  ;;  %v725_v60 = vor.u32 %v5478_v8, %v722_v47  ;;  %v587_v7 = vmul.f32 %v3232_v26, %v4403_v22  ;;  %v3236_v58 = vunpack.c.l.bf16 %v3359_v38 }
  0x40   : > { %3532 = vmatprep.subr.bf16.mxu1 %v4174_v43  ;;  %3833 = vmatmul.mubr.bf16.gmra.mrb[8].mxu1 %v4686_v57  ;;  %v618_v43 = vadd.f32 %v4418_v31, %v586_v59  ;;  %v886_v28 = vrot.slane %v5481_v48, 1  ;;  %v649_v8 = vmax.f32 %v617_v2, 0.0  ;;  %v4724_v59 = vld [vmem:[%s5468_s3 + $0x80] sm:$0xff]   ;;  %v3237_v2 = vunpack.c.h.bf16 %v3359_v38 }
  0x41   : > { %v4699_v30 = vpack.c.bf16 %v672_v5, %v671_v16  ;;  %3805 = vmatpush3.bf16.msra.mxu0 %v4384_v19  ;;  %v4709_v47 = vsel %vm4430_vm4, 0, %v725_v60  ;;  %v588_v5 = vmul.f32 %v3233_v32, %v4403_v22  ;;  %v619_v60 = vadd.f32 %v4418_v31, %v587_v7 }
  0x42   : > { %3806 = vmatprep.subr.bf16.mxu0 %v4410_v24  ;;  %1229 = vmatmul.mubr.bf16.gmra.mrb[12].mxu0 %v4709_v47  ;;  %v650_v16 = vmax.f32 %v618_v43, 0.0  ;;  %v589_v53 = vmul.f32 %v3236_v58, %v4403_v22  ;;  %v3240_v32 = vunpack.c.l.bf16 %v3360_v9  ;;  %v590_v7 = vmul.f32 %v3237_v2, %v4403_v22 }
  0x43   : > { %3533 = vmatpush3.bf16.msra.mxu1 %v4175_v20  ;;  %v804_v19 = vshrl.u32 %v4699_v30, 16  ;;  %v807_v26 = vshll.u32 %v4699_v30, 16  ;;  %v887_v20 = vor.u32 %v886_v28, %v797_v52  ;;  %v620_v43 = vadd.f32 %v4418_v31, %v588_v5 }
  0x44   : > { %3534 = vmatprep.subr.bf16.mxu1 %v4176_v29  ;;  %v4730_v29 = vpack.c.bf16 %v650_v16, %v649_v8  ;;  %v651_v48 = vmax.f32 %v619_v60, 0.0  ;;  %v621_v38 = vadd.f32 %v4418_v31, %v589_v53  ;;  %v591_v53 = vmul.f32 %v3240_v32, %v4403_v22 }
  0x45   : > { %v888_v11 = vrot.slane %v807_v26, 1  ;;  %3807 = vmatpush3.bf16.msra.mxu0 %v4410_v24  ;;  %v4736_v28 = vsel %vm4481_vm5, %v887_v20, 0  ;;  %v652_v16 = vmax.f32 %v620_v43, 0.0  ;;  %v3241_v20 = vunpack.c.h.bf16 %v3360_v9 }
  0x46   : > { %3656 = vmatprep.subr.bf16.mxu0 %v4185_v10  ;;  %3836 = vmatprep.mubr.bf16.mxu1 %v4736_v28  ;;  %v727_v24 = vshrl.u32 %v4730_v29, 16  ;;  %v730_v58 = vshll.u32 %v4730_v29, 16  ;;  %v653_v5 = vmax.f32 %v621_v38, 0.0  ;;  %v757_v2 = vrot.slane %v755_v15, 7 }
  0x47   : > { %3535 = vmatpush3.bf16.msra.mxu1 %v4177_v50  ;;  %v889_v8 = vor.u32 %v888_v11, %v804_v19  ;;  %1236 = vmatprep.mubr.bf16.mxu0 %v4730_v29  ;;  %v622_v50 = vadd.f32 %v4418_v31, %v590_v7  ;;  %v4755_v60 = vpack.c.bf16 %v652_v16, %v651_v48  ;;  %v764_v32 = vrot.slane %v762_v23, 7 }
  0x48   : > { %3840 = vmatprep.subr.bf16.mxu1 %v4724_v59  ;;  %v729_v11 = vrot.slane %v727_v24, 7  ;;  %v592_v7 = vmul.f32 %v3241_v20, %v4403_v22  ;;  %v623_v9 = vadd.f32 %v4418_v31, %v591_v53  ;;  %v5482_v38 = vmov 0.0|0.0  }
  0x49   : > { %v4751_v10 = vsel %vm4481_vm5, %v889_v8, 0  ;;  %v654_v43 = vmax.f32 %v622_v50, 0.0  ;;  %v734_v8 = vshrl.u32 %v4755_v60, 16  ;;  %v737_v15 = vshll.u32 %v4755_v60, 16 }
  0x4a   : > { %3837 = vmatmul.mubr.bf16.gmra.mrb[12].mxu1 %v4751_v10  ;;  %v732_v48 = vor.u32 %v730_v58, %v729_v11  ;;  %v760_v16 = vor.u32 %v758_v17, %v757_v2  ;;  %v624_v22 = vadd.f32 %v4418_v31, %v592_v7  ;;  %v655_v20 = vmax.f32 %v623_v9, 0.0 }
  0x4b   : > { %1670 = vmatprep.mubr.bf16.mxu1 %v5482_v38  ;;  %v4771_v50 = vpack.c.bf16 %v654_v43, %v653_v5  ;;  %v767_v23 = vor.u32 %v765_v25, %v764_v32  ;;  %v736_v11 = vrot.slane %v734_v8, 7  ;;  %v771_v17 = vrot.slane %v769_v14, 7 }
  0x4c   : > { %v4778_v53 = vsel %vm4430_vm4, 0, %v732_v48  ;;  %v4784_v38 = vsel %vm4430_vm4, 0, %v760_v16  ;;  %v656_v5 = vmax.f32 %v624_v22, 0.0  ;;  %v778_v14 = vrot.slane %v776_v40, 7  ;;  %v4179_v48 = vld [vmem:[%s5468_s3 + $0x88] sm:$0xff]  }
  0x4d   : > { %1237 = vmatmul.mubr.bf16.gmra.mrb[16].mxu0 %v4778_v53  ;;  %v5483_v31 = vshrl.u32 %v4771_v50, 16  ;;  %v744_v25 = vshll.u32 %v4771_v50, 16  ;;  %v4793_v2 = vsel %vm4430_vm4, 0, %v767_v23  ;;  %v739_v43 = vor.u32 %v737_v15, %v736_v11 }
  0x4e   : > { %1244 = vmatprep.mubr.bf16.mxu0 %v4755_v60  ;;  %v774_v7 = vor.u32 %v772_v18, %v771_v17  ;;  %v785_v9 = vrot.slane %v783_v45, 7  ;;  %v4807_v16 = vpack.c.bf16 %v656_v5, %v655_v20  ;;  %v792_v22 = vrot.slane %v790_v34, 7 }
  0x4f   : > { %v743_v32 = vrot.slane %v5483_v31, 7  ;;  %v799_v18 = vrot.slane %v797_v52, 7  ;;  %v860_v40 = vrot.slane %v709_v54, 1  ;;  %v781_v23 = vor.u32 %v779_v42, %v778_v14 }
  0x50   : > { %v4817_v45 = vsel %vm4430_vm4, 0, %v774_v7  ;;  %v788_v20 = vor.u32 %v786_v46, %v785_v9  ;;  %v4826_v34 = vsel %vm4430_vm4, 0, %v739_v43  ;;  %v795_v52 = vor.u32 %v793_v4, %v792_v22 }
  0x51   : > { %v4834_v54 = vsel %vm4430_vm4, 0, %v781_v23  ;;  %v5488_v46 = vshll.u32 %v4675_v35, 16  ;;  %v806_v17 = vrot.slane %v804_v19, 7  ;;  %v746_v5 = vor.u32 %v744_v25, %v743_v32 }
  0x52   : > { %1671 = vmatmul.mubr.bf16.vlgmr.msra.gmra.mrb[16].mxu1 %v4448_v51  ;;  %v4838_v42 = vsel %vm4430_vm4, 0, %v788_v20  ;;  %v748_v4 = vshrl.u32 %v4807_v16, 16  ;;  %v4850_v43 = vsel %vm4430_vm4, 0, %v795_v52  ;;  %v5489_v7 = vshll.u32 %v4454_v62, 16 }
  0x53   : > { %3841 = vmatpush3.bf16.msra.mxu1 %v4724_v59  ;;  %1678 = vmatprep.mubr.bf16.mxu1 %v4454_v62  ;;  %v802_v11 = vor.u32 %v5488_v46, %v799_v18  ;;  %v4180_v59 = vld [vmem:[%s5468_s3 + $0x90] sm:$0xff]   ;;  %v809_v19 = vor.u32 %v807_v26, %v806_v17  ;;  %v5490_v32 = vshrl.u32 %v4492_v39, 16  ;;  %v5491_v18 = vshll.u32 %v4584_v0, 16 }
  0x54   : > { %3842 = vmatprep.subr.bf16.mxu1 %v4179_v48  ;;  %v858_v14 = vrot.slane %v5489_v7, 1  ;;  %v751_v20 = vshll.u32 %v4807_v16, 16  ;;  %v5492_v52 = vshrl.u32 %v4454_v62, 16  ;;  %v5493_v7 = vshll.u32 %v4650_v13, 16 }
  0x55   : > { %v4856_v9 = vsel %vm4430_vm4, 0, %v802_v11  ;;  %v861_v22 = vor.u32 %v860_v40, %v5490_v32  ;;  %v862_v23 = vrot.slane %v5491_v18, 1  ;;  %1245 = vmatmul.mubr.bf16.gmra.mrb[20].mxu0 %v4826_v34  ;;  %v866_v31 = vrot.slane %v730_v58, 1  ;;  %v4181_v58 = vld [vmem:[%s5468_s3 + $0x98] sm:$0xff]  }
  0x56   : > { %v859_v46 = vor.u32 %v858_v14, %v5492_v52  ;;  %v864_v11 = vrot.slane %v5493_v7, 1  ;;  %1252 = vmatprep.mubr.bf16.mxu0 %v4771_v50  ;;  %v4875_v26 = vsel %vm4430_vm4, 0, %v809_v19  ;;  %v5494_v62 = vshrl.u32 %v4584_v0, 16 }
  0x57   : > { %3843 = vmatpush3.bf16.msra.mxu1 %v4179_v48  ;;  %v4879_v40 = vsel %vm4481_vm5, %v861_v22, 0  ;;  %v868_v14 = vrot.slane %v737_v15, 1  ;;  %v5495_v19 = vshrl.u32 %v4650_v13, 16  ;;  %v867_v22 = vor.u32 %v866_v31, %v727_v24 }
  0x58   : > { %v863_v17 = vor.u32 %v862_v23, %v5494_v62  ;;  %3844 = vmatprep.subr.bf16.mxu1 %v4180_v59  ;;  %v4888_v48 = vsel %vm4481_vm5, %v859_v46, 0  ;;  %v870_v23 = vrot.slane %v744_v25, 1  ;;  %v872_v52 = vrot.slane %v751_v20, 1 }
  0x59   : > { %v865_v32 = vor.u32 %v864_v11, %v5495_v19  ;;  %v869_v15 = vor.u32 %v868_v14, %v734_v8  ;;  %v4903_v46 = vsel %vm4430_vm4, 0, %v746_v5  ;;  %v4911_v24 = vsel %vm4481_vm5, %v867_v22, 0  ;;  %v4182_v11 = vld [vmem:[%s5468_s3 + $0xa0] sm:$0xff]   ;;  %v4188_v22 = vld [vmem:[%s5468_s3 + $0x188] sm:$0xff]  }
  0x5a   : > { %v4896_v18 = vsel %vm4481_vm5, %v863_v17, 0  ;;  %1679 = vmatmul.mubr.bf16.gmra.mrb[20].mxu1 %v4498_v44  ;;  %v750_v31 = vrot.slane %v748_v4, 7  ;;  %v5496_v44 = vshrl.u32 %v4771_v50, 16  ;;  %v873_v5 = vor.u32 %v872_v52, %v748_v4  ;;  %v4183_v4 = vld [vmem:[%s5468_s3 + $0xa8] sm:$0xff]   ;;  %v4186_v19 = vld [vmem:[%s5468_s3 + $0x180] sm:$0xff]   ;;  %v4191_v52 = vld [vmem:[%s5468_s3 + $0x1d8] sm:$0xff]  }
  0x5b   : > { %v4907_v7 = vsel %vm4481_vm5, %v865_v32, 0  ;;  %1686 = vmatprep.mubr.bf16.mxu1 %v4492_v39  ;;  %3845 = vmatpush3.bf16.msra.mxu1 %v4180_v59  ;;  %v4916_v8 = vsel %vm4481_vm5, %v869_v15, 0  ;;  %v4187_v32 = vld [vmem:[%s5468_s3 + $0x1c8] sm:$0xff]   ;;  %v4189_v15 = vld [vmem:[%s5468_s3 + $0x1d0] sm:$0xff]  }
  0x5c   : > { %v871_v25 = vor.u32 %v870_v23, %v5496_v44  ;;  %3846 = vmatprep.subr.bf16.mxu1 %v4181_v58  ;;  %v4929_v59 = vsel %vm4481_vm5, %v873_v5, 0  ;;  %v753_v17 = vor.u32 %v751_v20, %v750_v31  ;;  %v4184_v20 = vld [vmem:[%s5468_s3 + $0xb0] sm:$0xff]   ;;  %v4192_v31 = vld [vmem:[%s5468_s3 + $0x198] sm:$0xff]   ;;  %v4194_v44 = vld [vmem:[%s5468_s3 + $0x1e0] sm:$0xff]  }
  0x5d   : > { %1253 = vmatmul.mubr.bf16.gmra.mrb[24].mxu0 %v4903_v46  ;;  %v4190_v23 = vld [vmem:[%s5468_s3 + $0x190] sm:$0xff]   ;;  %v4196_v5 = vld [vmem:[%s5468_s3 + $0x1e8] sm:$0xff]  }
  0x5e   : > { %v4925_v62 = vsel %vm4481_vm5, %v871_v25, 0  ;;  %1260 = vmatprep.mubr.bf16.mxu0 %v4807_v16  ;;  %v4940_v14 = vsel %vm4430_vm4, 0, %v753_v17  ;;  %v4195_v25 = vld [vmem:[%s5468_s3 + $0x1a0] sm:$0xff]   ;;  %v4198_v17 = vld [vmem:[%s5468_s3 + $0x1f0] sm:$0xff]  }
  0x5f   : > { %3847 = vmatpush3.bf16.msra.mxu1 %v4181_v58  ;;  %v4193_v58 = vld [vmem:[%s5468_s3 + $0xb8] sm:$0xff]  }
  0x60   : > { %3848 = vmatprep.subr.bf16.mxu1 %v4182_v11 }
  0x62   : > { %1687 = vmatmul.mubr.bf16.gmra.mrb[24].mxu1 %v4556_v36 }
  0x63   : > { %1694 = vmatprep.mubr.bf16.mxu1 %v4584_v0  ;;  %3849 = vmatpush3.bf16.msra.mxu1 %v4182_v11  ;;  %v4197_v11 = vld [vmem:[%s5468_s3 + $0x1a8] sm:$0xff]  }
  0x64   : > { %3850 = vmatprep.subr.bf16.mxu1 %v4183_v4 }
  0x65   : > { %1261 = vmatmul.mubr.bf16.gmra.mrb[28].mxu0 %v4940_v14 }
  0x66   : > { %1268 = vmatprep.mubr.bf16.mxu0 %v4458_v3 }
  0x67   : > { %3851 = vmatpush3.bf16.msra.mxu1 %v4183_v4  ;;  %v4199_v4 = vld [vmem:[%s5468_s3 + $0x1b0] sm:$0xff]  }
  0x68   : > { %3852 = vmatprep.subr.bf16.mxu1 %v4184_v20 }
  0x6a   : > { %1695 = vmatmul.mubr.bf16.gmra.mrb[28].mxu1 %v4641_v6 }
  0x6b   : > { %1702 = vmatprep.mubr.bf16.mxu1 %v4650_v13  ;;  %3853 = vmatpush3.bf16.msra.mxu1 %v4184_v20  ;;  %v4200_v20 = vld [vmem:[%s5468_s3 + $0x1f8] sm:$0xff]  }
  0x6c   : > { %3854 = vmatprep.subr.bf16.mxu1 %v4193_v58 }
  0x6d   : > { %1269 = vmatmul.mubr.bf16.gmra.mrb[32].mxu0 %v4784_v38 }
  0x6e   : > { %1276 = vmatprep.mubr.bf16.mxu0 %v4464_v12 }
  0x6f   : > { %3855 = vmatpush3.bf16.msra.mxu1 %v4193_v58  ;;  %v5497_v58 = vmov 0  }
  0x70   : > { %3888 = vmatprep.subr.bf16.mxu1 %v4955_v41 }
  0x72   : > { %1703 = vmatmul.mubr.bf16.gmra.mrb[32].mxu1 %v4709_v47 }
  0x73   : > { %1710 = vmatprep.mubr.bf16.mxu1 %v4730_v29 }
  0x75   : > { %1277 = vmatmul.mubr.bf16.gmra.mrb[36].mxu0 %v4793_v2 }
  0x76   : > { %1284 = vmatprep.mubr.bf16.mxu0 %v4530_v61 }
  0x7a   : > { %1711 = vmatmul.mubr.bf16.gmra.mrb[36].mxu1 %v4778_v53 }
  0x7b   : > { %1718 = vmatprep.mubr.bf16.mxu1 %v4755_v60 }
  0x7d   : > { %1285 = vmatmul.mubr.bf16.gmra.mrb[40].mxu0 %v4817_v45 }
  0x7e   : > { %1292 = vmatprep.mubr.bf16.mxu0 %v4545_v27 }
  0x82   : > { %1719 = vmatmul.mubr.bf16.gmra.mrb[40].mxu1 %v4826_v34 }
  0x83   : > { %1726 = vmatprep.mubr.bf16.mxu1 %v4771_v50 }
  0x85   : > { %1293 = vmatmul.mubr.bf16.gmra.mrb[44].mxu0 %v4834_v54 }
  0x86   : > { %1300 = vmatprep.mubr.bf16.mxu0 %v4597_v21 }
  0x8a   : > { %1727 = vmatmul.mubr.bf16.gmra.mrb[44].mxu1 %v4903_v46 }
  0x8b   : > { %1734 = vmatprep.mubr.bf16.mxu1 %v4807_v16 }
  0x8d   : > { %1301 = vmatmul.mubr.bf16.gmra.mrb[48].mxu0 %v4838_v42 }
  0x8e   : > { %1308 = vmatprep.mubr.bf16.mxu0 %v4628_v1 }
  0x92   : > { %1735 = vmatmul.mubr.bf16.gmra.mrb[48].mxu1 %v4940_v14 }
  0x93   : > { %1742 = vmatprep.mubr.bf16.mxu1 %v4458_v3 }
  0x95   : > { %1309 = vmatmul.mubr.bf16.gmra.mrb[52].mxu0 %v4850_v43 }
  0x96   : > { %1316 = vmatprep.mubr.bf16.mxu0 %v4675_v35 }
  0x9a   : > { %1743 = vmatmul.mubr.bf16.gmra.mrb[52].mxu1 %v4784_v38 }
  0x9b   : > { %1750 = vmatprep.mubr.bf16.mxu1 %v4464_v12 }
  0x9d   : > { %1317 = vmatmul.mubr.bf16.gmra.mrb[56].mxu0 %v4856_v9 }
  0x9e   : > { %1324 = vmatprep.mubr.bf16.mxu0 %v4699_v30 }
  0xa2   : > { %1751 = vmatmul.mubr.bf16.gmra.mrb[56].mxu1 %v4793_v2 }
  0xa3   : > { %1758 = vmatprep.mubr.bf16.mxu1 %v4530_v61 }
  0xa5   : > { %1325 = vmatmul.mubr.bf16.gmra.mrb[60].mxu0 %v4875_v26 }
  0xa6   : > { %3808 = vmatprep.mubr.bf16.mxu0 %v4888_v48 }
  0xaa   : > { %1759 = vmatmul.mubr.bf16.gmra.mrb[60].mxu1 %v4817_v45 }
  0xab   : > { %1766 = vmatprep.mubr.bf16.mxu1 %v4545_v27 }
  0xad   : > { %3809 = vmatmul.mubr.bf16.vlgmr.msra.gmra.mrb[64].mxu0 %v4879_v40 }
  0xae   : > { %3657 = vmatpush3.bf16.msra.mxu0 %v4186_v19  ;;  %3812 = vmatprep.mubr.bf16.mxu0 %v4896_v18  ;;  %v856_v19 = vrot.slane %v5497_v58, 1 }
  0xaf   : > { %3658 = vmatprep.subr.bf16.mxu0 %v4187_v32  ;;  %v4201_v32 = vld [vmem:[%s5468_s3 + $0x1b8] sm:$0xff]  }
  0xb2   : > { %1767 = vmatmul.mubr.bf16.gmra.mrb[64].mxu1 %v4834_v54  ;;  %3659 = vmatpush3.bf16.msra.mxu0 %v4188_v22  ;;  %v5052_v22 = vsel %vm4481_vm5, %v856_v19, 0 }
  0xb3   : > { %1774 = vmatprep.mubr.bf16.mxu1 %v4597_v21  ;;  %3660 = vmatprep.subr.bf16.mxu0 %v4189_v15  ;;  %v4203_v15 = vld [vmem:[%s5468_s3 + $0x208] sm:$0xff]  }
  0xb5   : > { %3813 = vmatmul.mubr.bf16.gmra.mrb[68].mxu0 %v4907_v7 }
  0xb6   : > { %3661 = vmatpush3.bf16.msra.mxu0 %v4190_v23  ;;  %3816 = vmatprep.mubr.bf16.mxu0 %v4911_v24 }
  0xb7   : > { %3662 = vmatprep.subr.bf16.mxu0 %v4191_v52 }
  0xba   : > { %1775 = vmatmul.mubr.bf16.gmra.mrb[68].mxu1 %v4838_v42  ;;  %3663 = vmatpush3.bf16.msra.mxu0 %v4192_v31 }
  0xbb   : > { %1782 = vmatprep.mubr.bf16.mxu1 %v4628_v1  ;;  %3664 = vmatprep.subr.bf16.mxu0 %v4194_v44 }
  0xbd   : > { %3817 = vmatmul.mubr.bf16.gmra.mrb[72].mxu0 %v4916_v8 }
  0xbe   : > { %3665 = vmatpush3.bf16.msra.mxu0 %v4195_v25  ;;  %3820 = vmatprep.mubr.bf16.mxu0 %v4925_v62 }
  0xbf   : > { %3666 = vmatprep.subr.bf16.mxu0 %v4196_v5 }
  0xc2   : > { %1783 = vmatmul.mubr.bf16.gmra.mrb[72].mxu1 %v4850_v43  ;;  %3667 = vmatpush3.bf16.msra.mxu0 %v4197_v11 }
  0xc3   : > { %1790 = vmatprep.mubr.bf16.mxu1 %v4675_v35  ;;  %3668 = vmatprep.subr.bf16.mxu0 %v4198_v17 }
  0xc5   : > { %3821 = vmatmul.mubr.bf16.gmra.mrb[76].mxu0 %v4929_v59 }
  0xc6   : > { %3669 = vmatpush3.bf16.msra.mxu0 %v4199_v4  ;;  %2185 = vmatprep.mubr.bf16.mxu0 %v4492_v39  ;;  %v4205_v39 = vld [vmem:[%s5468_s3 + $0x218] sm:$0xff]  }
  0xc7   : > { %3670 = vmatprep.subr.bf16.mxu0 %v4200_v20 }
  0xca   : > { %1791 = vmatmul.mubr.bf16.gmra.mrb[76].mxu1 %v4856_v9  ;;  %3671 = vmatpush3.bf16.msra.mxu0 %v4201_v32 }
  0xcb   : > { %3856 = vmatprep.mubr.bf16.mxu1 %v5052_v22 }
  0xcd   : > { %2186 = vmatmul.mubr.bf16.vlgmr.msra.gmra.mrb[80].mxu0 %v4556_v36  ;;  %v4206_v36 = vld [vmem:[%s5468_s3 + $0x220] sm:$0xff]  }
  0xce   : > { %2193 = vmatprep.mubr.bf16.mxu0 %v4584_v0  ;;  %v4207_v0 = vld [vmem:[%s5468_s3 + $0x228] sm:$0xff]  }
  0xd2   : > { %3857 = vmatmul.mubr.bf16.vlgmr.msra.gmra.mrb[80].mxu1 %v4888_v48 }
  0xd3   : > { %3889 = vmatpush3.bf16.msra.mxu1 %v4955_v41  ;;  %3860 = vmatprep.mubr.bf16.mxu1 %v4879_v40 }
  0xd4   : > { %3890 = vmatprep.subr.bf16.mxu1 %v4203_v15 }
  0xd5   : > { %2194 = vmatmul.mubr.bf16.gmra.mrb[84].mxu0 %v4641_v6  ;;  %v4208_v6 = vld [vmem:[%s5468_s3 + $0x230] sm:$0xff]  }
  0xd6   : > { %2201 = vmatprep.mubr.bf16.mxu0 %v4650_v13  ;;  %v4209_v13 = vld [vmem:[%s5468_s3 + $0x238] sm:$0xff]  }
  0xd7   : > { %3891 = vmatpush3.bf16.msra.mxu1 %v4203_v15 }
  0xd8   : > { %3892 = vmatprep.subr.bf16.mxu1 %v4204_v33 }
  0xda   : > { %3861 = vmatmul.mubr.bf16.gmra.mrb[84].mxu1 %v4896_v18 }
  0xdb   : > { %3864 = vmatprep.mubr.bf16.mxu1 %v4907_v7  ;;  %3893 = vmatpush3.bf16.msra.mxu1 %v4204_v33 }
  0xdc   : > { %3894 = vmatprep.subr.bf16.mxu1 %v4205_v39 }
  0xdd   : > { %2202 = vmatmul.mubr.bf16.gmra.mrb[88].mxu0 %v4709_v47 }
  0xde   : > { %2209 = vmatprep.mubr.bf16.mxu0 %v4730_v29 }
  0xdf   : > { %3895 = vmatpush3.bf16.msra.mxu1 %v4205_v39 }
  0xe0   : > { %3896 = vmatprep.subr.bf16.mxu1 %v4206_v36 }
  0xe2   : > { %3865 = vmatmul.mubr.bf16.gmra.mrb[88].mxu1 %v4911_v24 }
  0xe3   : > { %3868 = vmatprep.mubr.bf16.mxu1 %v4916_v8  ;;  %3897 = vmatpush3.bf16.msra.mxu1 %v4206_v36 }
  0xe4   : > { %3898 = vmatprep.subr.bf16.mxu1 %v4207_v0 }
  0xe5   : > { %2210 = vmatmul.mubr.bf16.gmra.mrb[92].mxu0 %v4778_v53 }
  0xe6   : > { %2217 = vmatprep.mubr.bf16.mxu0 %v4755_v60 }
  0xe7   : > { %3899 = vmatpush3.bf16.msra.mxu1 %v4207_v0 }
  0xe8   : > { %3900 = vmatprep.subr.bf16.mxu1 %v4208_v6 }
  0xea   : > { %3869 = vmatmul.mubr.bf16.gmra.mrb[92].mxu1 %v4925_v62 }
  0xeb   : > { %3872 = vmatprep.mubr.bf16.mxu1 %v4929_v59  ;;  %3901 = vmatpush3.bf16.msra.mxu1 %v4208_v6 }
  0xec   : > { %3902 = vmatprep.subr.bf16.mxu1 %v4209_v13 }
  0xed   : > { %2218 = vmatmul.mubr.bf16.gmra.mrb[96].mxu0 %v4826_v34 }
  0xee   : > { %2225 = vmatprep.mubr.bf16.mxu0 %v4771_v50 }
  0xef   : > { %3903 = vmatpush3.bf16.msra.mxu1 %v4209_v13 }
  0xf2   : > { %3873 = vmatmul.mubr.bf16.gmra.mrb[0].mxu1 %v4509_v49 }
  0xf3   : > { %3876 = vmatprep.mubr.bf16.mxu1 %v4521_v56 }
  0xf5   : > { %2226 = vmatmul.mubr.bf16.gmra.mrb[100].mxu0 %v4903_v46 }
  0xf6   : > { %2233 = vmatprep.mubr.bf16.mxu0 %v4807_v16 }
  0xfa   : > { %3877 = vmatmul.mubr.bf16.gmra.mrb[4].mxu1 %v4582_v63 }
  0xfb   : > { %v3400_v47 = vpop.f32.mrb[0].mxu0  ;;  %3880 = vmatprep.mubr.bf16.mxu1 %v4606_v37 }
  0xfc   : > { %v3401_v29 = vpop.f32.mrb[1].mxu0 }
  0xfd   : > { %v5102_v60 = vadd.f32 %v3401_v29, %v3400_v47  ;;  %v3403_v53 = vpop.f32.mrb[2].mxu0  ;;  %2234 = vmatmul.mubr.bf16.gmra.mrb[104].mxu0 %v4940_v14 }
  0xfe   : > { %v3404_v34 = vpop.f32.mrb[3].mxu0  ;;  %2241 = vmatprep.mubr.bf16.mxu0 %v4458_v3 }
  0xff   : > { %v5105_v50 = vadd.f32 %v3404_v34, %v3403_v53 }
 0x102   : > { %3881 = vmatmul.mubr.bf16.gmra.mrb[8].mxu1 %v4657_v55 }
 0x103   : > { %v3406_v48 = vpop.f32.mrb[4].mxu0  ;;  %3884 = vmatprep.mubr.bf16.mxu1 %v4686_v57 }
 0x104   : > { %v3407_v16 = vpop.f32.mrb[5].mxu0 }
 0x105   : > { %v5110_v46 = vadd.f32 %v3407_v16, %v3406_v48  ;;  %v3409_v41 = vpop.f32.mrb[6].mxu0  ;;  %2242 = vmatmul.mubr.bf16.gmra.mrb[108].mxu0 %v4784_v38 }
 0x106   : > { %v3410_v23 = vpop.f32.mrb[7].mxu0  ;;  %2249 = vmatprep.mubr.bf16.mxu0 %v4464_v12 }
 0x107   : > { %v5113_v52 = vadd.f32 %v3410_v23, %v3409_v41 }
 0x10a   : > { %3885 = vmatmul.mubr.bf16.gmra.mrb[12].mxu1 %v4736_v28 }
 0x10b   : > { %3904 = vmatprep.mubr.bf16.mxu1 %v4879_v40 }
 0x10d   : > { %v3412_v3 = vpop.f32.mrb[8].mxu0  ;;  %2250 = vmatmul.mubr.bf16.gmra.mrb[112].mxu0 %v4793_v2 }
 0x10e   : > { %v3413_v14 = vpop.f32.mrb[9].mxu0  ;;  %2257 = vmatprep.mubr.bf16.mxu0 %v4530_v61 }
 0x10f   : > { %v5119_v31 = vadd.f32 %v3413_v14, %v3412_v3  ;;  %v3415_v44 = vpop.f32.mrb[10].mxu0 }
 0x110   : > { %v3416_v25 = vpop.f32.mrb[11].mxu0 }
 0x111   : > { %v5122_v5 = vadd.f32 %v3416_v25, %v3415_v44 }
 0x112   : > { %3905 = vmatmul.mubr.bf16.vlgmr.msra.gmra.mrb[80].mxu1 %v4896_v18 }
 0x113   : > { %3908 = vmatprep.mubr.bf16.mxu1 %v4907_v7 }
 0x115   : > { %2258 = vmatmul.mubr.bf16.gmra.mrb[116].mxu0 %v4817_v45  ;;  %v3418_v12 = vpop.f32.mrb[12].mxu0 }
 0x116   : > { %v3419_v38 = vpop.f32.mrb[13].mxu0  ;;  %2265 = vmatprep.mubr.bf16.mxu0 %v4545_v27 }
 0x117   : > { %v5128_v2 = vadd.f32 %v3419_v38, %v3418_v12  ;;  %v3421_v40 = vpop.f32.mrb[14].mxu0  ;;  %v5498_v38 = vmov 0.0|0.0  }
 0x118   : > { %v3422_v11 = vpop.f32.mrb[15].mxu0 }
 0x119   : > { %v5131_v61 = vadd.f32 %v3422_v11, %v3421_v40 }
 0x11a   : > { %3909 = vmatmul.mubr.bf16.gmra.mrb[84].mxu1 %v4911_v24 }
 0x11b   : > { %3912 = vmatprep.mubr.bf16.mxu1 %v4916_v8 }
 0x11d   : > { %2266 = vmatmul.mubr.bf16.gmra.mrb[120].mxu0 %v4834_v54 }
 0x11e   : > { %2273 = vmatprep.mubr.bf16.mxu0 %v4597_v21 }
 0x120   : > { %v3424_v18 = vpop.f32.mrb[16].mxu0 }
 0x121   : > { %v3425_v45 = vpop.f32.mrb[17].mxu0 }
 0x122   : > { %3913 = vmatmul.mubr.bf16.gmra.mrb[88].mxu1 %v4925_v62  ;;  %v5137_v7 = vadd.f32 %v3425_v45, %v3424_v18  ;;  %v3427_v27 = vpop.f32.mrb[18].mxu0 }
 0x123   : > { %3916 = vmatprep.mubr.bf16.mxu1 %v4929_v59  ;;  %v3428_v17 = vpop.f32.mrb[19].mxu0 }
 0x124   : > { %v5140_v24 = vadd.f32 %v3428_v17, %v3427_v27 }
 0x125   : > { %v3536_v4 = vpop.f32.mrb[16].mxu1  ;;  %2274 = vmatmul.mubr.bf16.gmra.mrb[124].mxu0 %v4838_v42 }
 0x126   : > { %v3537_v20 = vpop.f32.mrb[17].mxu1  ;;  %2281 = vmatprep.mubr.bf16.mxu0 %v4628_v1 }
 0x127   : > { %v5143_v8 = vadd.f32 %v3537_v20, %v3536_v4  ;;  %v3539_v54 = vpop.f32.mrb[18].mxu1 }
 0x128   : > { %v3540_v21 = vpop.f32.mrb[19].mxu1  ;;  %v3430_v58 = vpop.f32.mrb[20].mxu0 }
 0x129   : > { %v5146_v62 = vadd.f32 %v3540_v21, %v3539_v54  ;;  %v3431_v19 = vpop.f32.mrb[21].mxu0 }
 0x12a   : > { %3917 = vmatmul.mubr.bf16.gmra.mrb[92].mxu1 %v4509_v49  ;;  %v5149_v59 = vadd.f32 %v3431_v19, %v3430_v58  ;;  %v3433_v32 = vpop.f32.mrb[22].mxu0 }
 0x12b   : > { %3920 = vmatprep.mubr.bf16.mxu1 %v4521_v56  ;;  %v3434_v15 = vpop.f32.mrb[23].mxu0 }
 0x12c   : > { %v5152_v42 = vadd.f32 %v3434_v15, %v3433_v32 }
 0x12d   : > { %v3542_v33 = vpop.f32.mrb[20].mxu1  ;;  %2282 = vmatmul.mubr.bf16.gmra.mrb[128].mxu0 %v4850_v43 }
 0x12e   : > { %v3543_v39 = vpop.f32.mrb[21].mxu1  ;;  %2289 = vmatprep.mubr.bf16.mxu0 %v4675_v35 }
 0x12f   : > { %v5155_v1 = vadd.f32 %v3543_v39, %v3542_v33  ;;  %v3545_v36 = vpop.f32.mrb[22].mxu1 }
 0x130   : > { %v3546_v0 = vpop.f32.mrb[23].mxu1  ;;  %v3436_v6 = vpop.f32.mrb[24].mxu0 }
 0x131   : > { %v5158_v49 = vadd.f32 %v3546_v0, %v3545_v36  ;;  %v3437_v13 = vpop.f32.mrb[25].mxu0 }
 0x132   : > { %3921 = vmatmul.mubr.bf16.gmra.mrb[0].mxu1 %v4582_v63  ;;  %v5161_v56 = vadd.f32 %v3437_v13, %v3436_v6  ;;  %v3439_v47 = vpop.f32.mrb[26].mxu0 }
 0x133   : > { %3924 = vmatprep.mubr.bf16.mxu1 %v4606_v37  ;;  %v3440_v29 = vpop.f32.mrb[27].mxu0 }
 0x134   : > { %v5164_v43 = vadd.f32 %v3440_v29, %v3439_v47 }
 0x135   : > { %v3548_v53 = vpop.f32.mrb[24].mxu1  ;;  %2290 = vmatmul.mubr.bf16.gmra.mrb[132].mxu0 %v4856_v9 }
 0x136   : > { %v3549_v34 = vpop.f32.mrb[25].mxu1  ;;  %2297 = vmatprep.mubr.bf16.mxu0 %v4699_v30 }
 0x137   : > { %v5167_v35 = vadd.f32 %v3549_v34, %v3548_v53  ;;  %v3551_v48 = vpop.f32.mrb[26].mxu1 }
 0x138   : > { %v3552_v16 = vpop.f32.mrb[27].mxu1  ;;  %v3442_v41 = vpop.f32.mrb[28].mxu0 }
 0x139   : > { %v5170_v63 = vadd.f32 %v3552_v16, %v3551_v48  ;;  %v3443_v23 = vpop.f32.mrb[29].mxu0 }
 0x13a   : > { %3925 = vmatmul.mubr.bf16.gmra.mrb[4].mxu1 %v4657_v55  ;;  %v5173_v37 = vadd.f32 %v3443_v23, %v3442_v41  ;;  %v3445_v3 = vpop.f32.mrb[30].mxu0 }
 0x13b   : > { %3928 = vmatprep.mubr.bf16.mxu1 %v4686_v57  ;;  %v3446_v14 = vpop.f32.mrb[31].mxu0 }
 0x13c   : > { %v5176_v9 = vadd.f32 %v3446_v14, %v3445_v3 }
 0x13d   : > { %v3554_v44 = vpop.f32.mrb[28].mxu1  ;;  %2298 = vmatmul.mubr.bf16.gmra.mrb[136].mxu0 %v4875_v26 }
 0x13e   : > { %v3555_v25 = vpop.f32.mrb[29].mxu1  ;;  %2305 = vmatprep.mubr.bf16.mxu0 %v5498_v38 }
 0x13f   : > { %v5179_v30 = vadd.f32 %v3555_v25, %v3554_v44  ;;  %v3557_v12 = vpop.f32.mrb[30].mxu1 }
 0x140   : > { %v3558_v40 = vpop.f32.mrb[31].mxu1  ;;  %v3448_v11 = vpop.f32.mrb[32].mxu0 }
 0x141   : > { %v5182_v55 = vadd.f32 %v3558_v40, %v3557_v12  ;;  %v3449_v18 = vpop.f32.mrb[33].mxu0 }
 0x142   : > { %3929 = vmatmul.mubr.bf16.gmra.mrb[8].mxu1 %v4736_v28  ;;  %v3450_v57 = vadd.f32 %v3449_v18, %v3448_v11  ;;  %v3451_v45 = vpop.f32.mrb[34].mxu0 }
 0x143   : > { %3932 = vmatprep.mubr.bf16.mxu1 %v4751_v10  ;;  %v3452_v27 = vpop.f32.mrb[35].mxu0 }
 0x144   : > { %v3453_v4 = vadd.f32 %v3452_v27, %v3451_v45 }
 0x145   : > { %v3560_v17 = vpop.f32.mrb[32].mxu1  ;;  %2306 = vmatmul.mubr.bf16.gmra.mrb[140].mxu0 %v4448_v51 }
 0x146   : > { %v3561_v26 = vpop.f32.mrb[33].mxu1 }
 0x147   : > { %v5187_v20 = vadd.f32 %v3561_v26, %v3560_v17  ;;  %v3563_v54 = vpop.f32.mrb[34].mxu1 }
 0x148   : > { %v3564_v21 = vpop.f32.mrb[35].mxu1  ;;  %v3454_v19 = vpop.f32.mrb[36].mxu0 }
 0x149   : > { %v5189_v58 = vadd.f32 %v3564_v21, %v3563_v54  ;;  %v3455_v28 = vpop.f32.mrb[37].mxu0 }
 0x14a   : > { %3933 = vmatmul.mubr.bf16.gmra.mrb[12].mxu1 %v5052_v22  ;;  %v3456_v32 = vadd.f32 %v3455_v28, %v3454_v19  ;;  %v3457_v15 = vpop.f32.mrb[38].mxu0 }
 0x14b   : > { %v3458_v33 = vpop.f32.mrb[39].mxu0 }
 0x14c   : > { %v3459_v39 = vadd.f32 %v3458_v33, %v3457_v15 }
 0x14d   : > { %v3566_v10 = vpop.f32.mrb[36].mxu1 }
 0x14e   : > { %v3567_v36 = vpop.f32.mrb[37].mxu1 }
 0x14f   : > { %v5192_v0 = vadd.f32 %v3567_v36, %v3566_v10  ;;  %v3569_v6 = vpop.f32.mrb[38].mxu1 }
 0x150   : > { %v3570_v51 = vpop.f32.mrb[39].mxu1  ;;  %v3460_v47 = vpop.f32.mrb[40].mxu0 }
 0x151   : > { %v5194_v13 = vadd.f32 %v3570_v51, %v3569_v6  ;;  %v3461_v29 = vpop.f32.mrb[41].mxu0 }
 0x152   : > { %v3462_v53 = vadd.f32 %v3461_v29, %v3460_v47  ;;  %v3463_v34 = vpop.f32.mrb[42].mxu0 }
 0x153   : > { %v3464_v48 = vpop.f32.mrb[43].mxu0 }
 0x154   : > { %v3465_v22 = vadd.f32 %v3464_v48, %v3463_v34 }
 0x155   : > { %v3572_v16 = vpop.f32.mrb[40].mxu1 }
 0x156   : > { %v3573_v41 = vpop.f32.mrb[41].mxu1 }
 0x157   : > { %v5196_v23 = vadd.f32 %v3573_v41, %v3572_v16  ;;  %v3575_v3 = vpop.f32.mrb[42].mxu1 }
 0x158   : > { %v3576_v14 = vpop.f32.mrb[43].mxu1  ;;  %v3466_v25 = vpop.f32.mrb[44].mxu0 }
 0x159   : > { %v5198_v44 = vadd.f32 %v3576_v14, %v3575_v3  ;;  %v3467_v12 = vpop.f32.mrb[45].mxu0 }
 0x15a   : > { %v5200_v38 = vadd.f32 %v3467_v12, %v3466_v25  ;;  %v3469_v40 = vpop.f32.mrb[46].mxu0 }
 0x15b   : > { %v3470_v11 = vpop.f32.mrb[47].mxu0 }
 0x15c   : > { %v5202_v45 = vadd.f32 %v3470_v11, %v3469_v40 }
 0x15d   : > { %v3578_v18 = vpop.f32.mrb[44].mxu1 }
 0x15e   : > { %v3579_v27 = vpop.f32.mrb[45].mxu1 }
 0x15f   : > { %v5204_v17 = vadd.f32 %v3579_v27, %v3578_v18  ;;  %v3581_v26 = vpop.f32.mrb[46].mxu1 }
 0x160   : > { %v3582_v54 = vpop.f32.mrb[47].mxu1  ;;  %v3472_v19 = vpop.f32.mrb[48].mxu0 }
 0x161   : > { %v5206_v21 = vadd.f32 %v3582_v54, %v3581_v26  ;;  %v3473_v28 = vpop.f32.mrb[49].mxu0 }
 0x162   : > { %v5208_v15 = vadd.f32 %v3473_v28, %v3472_v19  ;;  %v3475_v33 = vpop.f32.mrb[50].mxu0 }
 0x163   : > { %v3476_v10 = vpop.f32.mrb[51].mxu0 }
 0x164   : > { %v5210_v6 = vadd.f32 %v3476_v10, %v3475_v33 }
 0x165   : > { %v3584_v36 = vpop.f32.mrb[48].mxu1 }
 0x166   : > { %v3585_v51 = vpop.f32.mrb[49].mxu1 }
 0x167   : > { %v3586_v47 = vadd.f32 %v3585_v51, %v3584_v36  ;;  %v3587_v29 = vpop.f32.mrb[50].mxu1 }
 0x168   : > { %v3588_v34 = vpop.f32.mrb[51].mxu1  ;;  %v3478_v41 = vpop.f32.mrb[52].mxu0 }
 0x169   : > { %v5212_v48 = vadd.f32 %v3586_v47, %v3450_v57  ;;  %v3589_v16 = vadd.f32 %v3588_v34, %v3587_v29  ;;  %v3479_v3 = vpop.f32.mrb[53].mxu0 }
 0x16a   : > { %v5216_v25 = vadd.f32 %v3479_v3, %v3478_v41  ;;  %v3481_v12 = vpop.f32.mrb[54].mxu0 }
 0x16b   : > { %v5214_v14 = vadd.f32 %v3589_v16, %v3453_v4  ;;  %v3482_v40 = vpop.f32.mrb[55].mxu0 }
 0x16c   : > { %v5218_v18 = vadd.f32 %v3482_v40, %v3481_v12 }
 0x16d   : > { %v3590_v11 = vpop.f32.mrb[52].mxu1 }
 0x16e   : > { %v3591_v27 = vpop.f32.mrb[53].mxu1 }
 0x16f   : > { %v3592_v26 = vadd.f32 %v3591_v27, %v3590_v11  ;;  %v3593_v54 = vpop.f32.mrb[54].mxu1 }
 0x170   : > { %v3594_v19 = vpop.f32.mrb[55].mxu1  ;;  %v3484_v33 = vpop.f32.mrb[56].mxu0 }
 0x171   : > { %v5220_v28 = vadd.f32 %v3592_v26, %v3456_v32  ;;  %v3595_v57 = vadd.f32 %v3594_v19, %v3593_v54  ;;  %v3485_v10 = vpop.f32.mrb[57].mxu0 }
 0x172   : > { %v5224_v4 = vadd.f32 %v3485_v10, %v3484_v33  ;;  %v3487_v51 = vpop.f32.mrb[58].mxu0 }
 0x173   : > { %v5222_v36 = vadd.f32 %v3595_v57, %v3459_v39  ;;  %v3488_v47 = vpop.f32.mrb[59].mxu0 }
 0x174   : > { %v5226_v34 = vadd.f32 %v3488_v47, %v3487_v51 }
 0x175   : > { %v3596_v29 = vpop.f32.mrb[56].mxu1 }
 0x176   : > { %v3597_v16 = vpop.f32.mrb[57].mxu1 }
 0x177   : > { %v3598_v41 = vadd.f32 %v3597_v16, %v3596_v29  ;;  %v3599_v3 = vpop.f32.mrb[58].mxu1 }
 0x178   : > { %v3600_v12 = vpop.f32.mrb[59].mxu1  ;;  %v3490_v11 = vpop.f32.mrb[60].mxu0 }
 0x179   : > { %v5228_v40 = vadd.f32 %v3598_v41, %v3462_v53  ;;  %v3601_v32 = vadd.f32 %v3600_v12, %v3599_v3  ;;  %v3491_v27 = vpop.f32.mrb[61].mxu0 }
 0x17a   : > { %v5232_v39 = vadd.f32 %v3491_v27, %v3490_v11  ;;  %v3493_v54 = vpop.f32.mrb[62].mxu0 }
 0x17b   : > { %v5230_v26 = vadd.f32 %v3601_v32, %v3465_v22  ;;  %v3494_v19 = vpop.f32.mrb[63].mxu0 }
 0x17c   : > { %v5234_v33 = vadd.f32 %v3494_v19, %v3493_v54 }
 0x17d   : > { %v3602_v57 = vpop.f32.mrb[60].mxu1 }
 0x17e   : > { %v3603_v10 = vpop.f32.mrb[61].mxu1 }
 0x17f   : > { %v3604_v51 = vadd.f32 %v3603_v10, %v3602_v57  ;;  %v3605_v47 = vpop.f32.mrb[62].mxu1 }
 0x180   : > { %v3606_v29 = vpop.f32.mrb[63].mxu1  ;;  %v3810_v41 = vpop.f32.mrb[64].mxu0 }
 0x181   : > { %v5237_v16 = vadd.f32 %v3604_v51, %v5200_v38  ;;  %v3607_v53 = vadd.f32 %v3606_v29, %v3605_v47  ;;  %v1376_v3 = vadd.f32 %v3810_v41, %v5110_v46  ;;  %v1367_v22 = vpop.f32.mrb[65].mxu0 }
 0x182   : > { %v1368_v32 = vadd.f32 %v5102_v60, %v1367_v22  ;;  %v3811_v11 = vpop.f32.mrb[66].mxu0 }
 0x183   : > { %v5241_v12 = vadd.f32 %v3607_v53, %v5202_v45  ;;  %v5245_v27 = vadd.f32 %v5155_v1, %v1376_v3  ;;  %v1379_v54 = vadd.f32 %v3811_v11, %v5113_v52  ;;  %v1370_v19 = vpop.f32.mrb[67].mxu0 }
 0x184   : > { %v5249_v38 = vadd.f32 %v5143_v8, %v1368_v32  ;;  %v1371_v10 = vadd.f32 %v5105_v50, %v1370_v19 }
 0x185   : > { %v3608_v57 = vpop.f32.mrb[64].mxu1  ;;  %v5253_v51 = vadd.f32 %v5158_v49, %v1379_v54 }
 0x186   : > { %v3609_v46 = vpop.f32.mrb[65].mxu1  ;;  %v5256_v60 = vadd.f32 %v5146_v62, %v1371_v10 }
 0x187   : > { %v3610_v45 = vadd.f32 %v3609_v46, %v3608_v57  ;;  %v3611_v47 = vpop.f32.mrb[66].mxu1 }
 0x188   : > { %v3612_v1 = vpop.f32.mrb[67].mxu1  ;;  %v3814_v53 = vpop.f32.mrb[68].mxu0 }
 0x189   : > { %v5259_v29 = vadd.f32 %v3610_v45, %v5208_v15  ;;  %v3613_v52 = vadd.f32 %v3612_v1, %v3611_v47  ;;  %v1392_v8 = vadd.f32 %v3814_v53, %v5128_v2  ;;  %v1383_v41 = vpop.f32.mrb[69].mxu0 }
 0x18a   : > { %v1384_v49 = vadd.f32 %v5119_v31, %v1383_v41  ;;  %v3815_v3 = vpop.f32.mrb[70].mxu0 }
 0x18b   : > { %v5263_v50 = vadd.f32 %v3613_v52, %v5210_v6  ;;  %v5267_v22 = vadd.f32 %v5179_v30, %v1392_v8  ;;  %v1395_v62 = vadd.f32 %v3815_v3, %v5131_v61  ;;  %v1386_v32 = vpop.f32.mrb[71].mxu0 }
 0x18c   : > { %v5271_v15 = vadd.f32 %v5167_v35, %v1384_v49  ;;  %v1387_v54 = vadd.f32 %v5122_v5, %v1386_v32 }
 0x18d   : > { %v3614_v11 = vpop.f32.mrb[68].mxu1  ;;  %v5275_v19 = vadd.f32 %v5182_v55, %v1395_v62 }
 0x18e   : > { %v3615_v2 = vpop.f32.mrb[69].mxu1  ;;  %v5278_v31 = vadd.f32 %v5170_v63, %v1387_v54 }
 0x18f   : > { %v3616_v6 = vadd.f32 %v3615_v2, %v3614_v11  ;;  %v3617_v57 = vpop.f32.mrb[70].mxu1 }
 0x190   : > { %v3618_v30 = vpop.f32.mrb[71].mxu1  ;;  %v3818_v46 = vpop.f32.mrb[72].mxu0 }
 0x191   : > { %v5281_v10 = vadd.f32 %v3616_v6, %v5216_v25  ;;  %v3619_v61 = vadd.f32 %v3618_v30, %v3617_v57  ;;  %v1408_v35 = vadd.f32 %v3818_v46, %v5149_v59  ;;  %v1399_v45 = vpop.f32.mrb[73].mxu0 }
 0x192   : > { %v1400_v55 = vadd.f32 %v5137_v7, %v1399_v45  ;;  %v3819_v47 = vpop.f32.mrb[74].mxu0 }
 0x193   : > { %v5285_v5 = vadd.f32 %v3619_v61, %v5218_v18  ;;  %v5289_v1 = vadd.f32 %v5192_v0, %v1408_v35  ;;  %v1411_v63 = vadd.f32 %v3819_v47, %v5152_v42  ;;  %v1402_v52 = vpop.f32.mrb[75].mxu0 }
 0x194   : > { %v5293_v25 = vadd.f32 %v5187_v20, %v1400_v55  ;;  %v1403_v8 = vadd.f32 %v5140_v24, %v1402_v52 }
 0x195   : > { %v3620_v53 = vpop.f32.mrb[72].mxu1  ;;  %v5297_v41 = vadd.f32 %v5194_v13, %v1411_v63 }
 0x196   : > { %v3621_v59 = vpop.f32.mrb[73].mxu1  ;;  %v5300_v7 = vadd.f32 %v5189_v58, %v1403_v8 }
 0x197   : > { %v3622_v18 = vadd.f32 %v3621_v59, %v3620_v53  ;;  %v3623_v49 = vpop.f32.mrb[74].mxu1 }
 0x198   : > { %v3624_v0 = vpop.f32.mrb[75].mxu1  ;;  %v3822_v62 = vpop.f32.mrb[76].mxu0 }
 0x199   : > { %v5303_v3 = vadd.f32 %v3622_v18, %v5224_v4  ;;  %v3625_v42 = vadd.f32 %v3624_v0, %v3623_v49  ;;  %v1424_v20 = vadd.f32 %v3822_v62, %v5173_v37  ;;  %v1415_v32 = vpop.f32.mrb[77].mxu0 }
 0x19a   : > { %v1416_v13 = vadd.f32 %v5161_v56, %v1415_v32  ;;  %v3823_v11 = vpop.f32.mrb[78].mxu0 }
 0x19b   : > { %v5307_v24 = vadd.f32 %v3625_v42, %v5226_v34  ;;  %v5311_v54 = vadd.f32 %v5204_v17, %v1424_v20  ;;  %v1427_v58 = vadd.f32 %v3823_v11, %v5176_v9  ;;  %v1418_v2 = vpop.f32.mrb[79].mxu0 }
 0x19c   : > { %v5315_v4 = vadd.f32 %v5196_v23, %v1416_v13  ;;  %v1419_v57 = vadd.f32 %v5164_v43, %v1418_v2 }
 0x19d   : > { %v3626_v6 = vpop.f32.mrb[76].mxu1  ;;  %v5319_v30 = vadd.f32 %v5206_v21, %v1427_v58 }
 0x19e   : > { %v3627_v37 = vpop.f32.mrb[77].mxu1  ;;  %v1724_v56 = vadd.f32 %v5198_v44, %v1419_v57 }
 0x19f   : > { %v3628_v34 = vadd.f32 %v3627_v37, %v3626_v6  ;;  %v3629_v61 = vpop.f32.mrb[78].mxu1 }
 0x1a0   : > { %v3630_v46 = vpop.f32.mrb[79].mxu1  ;;  %v3672_v35 = vpop.f32.mrb[80].mxu0 }
 0x1a1   : > { %v5323_v17 = vadd.f32 %v3628_v34, %v5232_v39  ;;  %v3631_v9 = vadd.f32 %v3630_v46, %v3629_v61  ;;  %v3673_v45 = vpop.f32.mrb[81].mxu0 }
 0x1a2   : > { %v3674_v55 = vadd.f32 %v3673_v45, %v3672_v35  ;;  %v3675_v43 = vpop.f32.mrb[82].mxu0 }
 0x1a3   : > { %v5326_v23 = vadd.f32 %v3631_v9, %v5234_v33  ;;  %v3676_v47 = vpop.f32.mrb[83].mxu0 }
 0x1a4   : > { %v3677_v63 = vadd.f32 %v3676_v47, %v3675_v43  ;;  %v5329_v21 = vadd.f32 %v3674_v55, %v5249_v38 }
 0x1a6   : > { %v5332_v52 = vadd.f32 %v3677_v63, %v5256_v60 }
 0x1a8   : > { %v3678_v44 = vpop.f32.mrb[84].mxu0 }
 0x1a9   : > { %v3679_v53 = vpop.f32.mrb[85].mxu0 }
 0x1aa   : > { %v3680_v39 = vadd.f32 %v3679_v53, %v3678_v44  ;;  %v3681_v8 = vpop.f32.mrb[86].mxu0 }
 0x1ab   : > { %v3682_v59 = vpop.f32.mrb[87].mxu0 }
 0x1ac   : > { %v3683_v18 = vadd.f32 %v3682_v59, %v3681_v8  ;;  %v3954_v49 = vadd.f32 %v3680_v39, %v5245_v27 }
 0x1ae   : > { %v3962_v33 = vadd.f32 %v3683_v18, %v5253_v51 }
 0x1b0   : > { %v3684_v0 = vpop.f32.mrb[88].mxu0 }
 0x1b1   : > { %v3685_v42 = vpop.f32.mrb[89].mxu0 }
 0x1b2   : > { %v3686_v62 = vadd.f32 %v3685_v42, %v3684_v0  ;;  %v3687_v20 = vpop.f32.mrb[90].mxu0 }
 0x1b3   : > { %v3688_v32 = vpop.f32.mrb[91].mxu0 }
 0x1b4   : > { %v3689_v38 = vadd.f32 %v3688_v32, %v3687_v20  ;;  %v5337_v13 = vadd.f32 %v3686_v62, %v5271_v15 }
 0x1b6   : > { %v5340_v60 = vadd.f32 %v3689_v38, %v5278_v31 }
 0x1b8   : > { %v3690_v11 = vpop.f32.mrb[92].mxu0 }
 0x1b9   : > { %v3691_v58 = vpop.f32.mrb[93].mxu0 }
 0x1ba   : > { %v3692_v2 = vadd.f32 %v3691_v58, %v3690_v11  ;;  %v3693_v6 = vpop.f32.mrb[94].mxu0 }
 0x1bb   : > { %v3694_v57 = vpop.f32.mrb[95].mxu0 }
 0x1bc   : > { %v3695_v27 = vadd.f32 %v3694_v57, %v3693_v6  ;;  %v5343_v51 = vadd.f32 %v3692_v2, %v5267_v22 }
 0x1be   : > { %v5346_v37 = vadd.f32 %v3695_v27, %v5275_v19 }
 0x1c0   : > { %v3696_v34 = vpop.f32.mrb[96].mxu0 }
 0x1c1   : > { %v3697_v61 = vpop.f32.mrb[97].mxu0 }
 0x1c2   : > { %v3698_v46 = vadd.f32 %v3697_v61, %v3696_v34  ;;  %v3699_v15 = vpop.f32.mrb[98].mxu0 }
 0x1c3   : > { %v3700_v9 = vpop.f32.mrb[99].mxu0 }
 0x1c4   : > { %v3701_v35 = vadd.f32 %v3700_v9, %v3699_v15  ;;  %v5349_v31 = vadd.f32 %v3698_v46, %v5293_v25 }
 0x1c6   : > { %v5352_v45 = vadd.f32 %v3701_v35, %v5300_v7 }
 0x1c8   : > { %v3702_v55 = vpop.f32.mrb[100].mxu0 }
 0x1c9   : > { %v3703_v43 = vpop.f32.mrb[101].mxu0 }
 0x1ca   : > { %v3704_v47 = vadd.f32 %v3703_v43, %v3702_v55  ;;  %v3705_v22 = vpop.f32.mrb[102].mxu0 }
 0x1cb   : > { %v3706_v63 = vpop.f32.mrb[103].mxu0 }
 0x1cc   : > { %v3707_v44 = vadd.f32 %v3706_v63, %v3705_v22  ;;  %v5355_v19 = vadd.f32 %v3704_v47, %v5289_v1 }
 0x1ce   : > { %v5358_v53 = vadd.f32 %v3707_v44, %v5297_v41 }
 0x1d0   : > { %v3708_v39 = vpop.f32.mrb[104].mxu0 }
 0x1d1   : > { %v3709_v8 = vpop.f32.mrb[105].mxu0 }
 0x1d2   : > { %v3710_v59 = vadd.f32 %v3709_v8, %v3708_v39  ;;  %v3711_v25 = vpop.f32.mrb[106].mxu0 }
 0x1d3   : > { %v3712_v18 = vpop.f32.mrb[107].mxu0 }
 0x1d4   : > { %v3713_v0 = vadd.f32 %v3712_v18, %v3711_v25  ;;  %v5361_v7 = vadd.f32 %v3710_v59, %v5315_v4 }
 0x1d6   : > { %v5363_v42 = vadd.f32 %v3713_v0, %v1724_v56 }
 0x1d8   : > { %v3714_v62 = vpop.f32.mrb[108].mxu0 }
 0x1d9   : > { %v3715_v20 = vpop.f32.mrb[109].mxu0 }
 0x1da   : > { %v3716_v32 = vadd.f32 %v3715_v20, %v3714_v62  ;;  %v3717_v38 = vpop.f32.mrb[110].mxu0 }
 0x1db   : > { %v3718_v1 = vpop.f32.mrb[111].mxu0 }
 0x1dc   : > { %v3719_v11 = vadd.f32 %v3718_v1, %v3717_v38  ;;  %v5366_v41 = vadd.f32 %v3716_v32, %v5311_v54 }
 0x1de   : > { %v5369_v58 = vadd.f32 %v3719_v11, %v5319_v30 }
 0x1e0   : > { %v3720_v2 = vpop.f32.mrb[112].mxu0 }
 0x1e1   : > { %v3721_v6 = vpop.f32.mrb[113].mxu0 }
 0x1e2   : > { %v3722_v57 = vadd.f32 %v3721_v6, %v3720_v2  ;;  %v3723_v4 = vpop.f32.mrb[114].mxu0 }
 0x1e3   : > { %v3724_v27 = vpop.f32.mrb[115].mxu0 }
 0x1e4   : > { %v3725_v34 = vadd.f32 %v3724_v27, %v3723_v4  ;;  %v5372_v61 = vadd.f32 %v5212_v48, %v3722_v57 }
 0x1e5   : > { %v3906_v56 = vpop.f32.mrb[80].mxu1 }
 0x1e6   : > { %v3955_v46 = vadd.f32 %v3954_v49, %v3906_v56  ;;  %v2348_v15 = vpop.f32.mrb[81].mxu1  ;;  %v5376_v35 = vadd.f32 %v5214_v14, %v3725_v34 }
 0x1e7   : > { %v3959_v9 = vadd.f32 %v5329_v21, %v2348_v15  ;;  %v3907_v54 = vpop.f32.mrb[82].mxu1 }
 0x1e8   : > { %v3963_v30 = vadd.f32 %v3962_v33, %v3907_v54  ;;  %v2351_v55 = vpop.f32.mrb[83].mxu1  ;;  %v3726_v49 = vpop.f32.mrb[116].mxu0  ;;  %v2706_v39 = vmul.f32 %v3955_v46, %v3955_v46 }
 0x1e9   : > { %v3967_v48 = vadd.f32 %v5332_v52, %v2351_v55  ;;  %v2704_v43 = vmul.f32 %v3959_v9, %v3959_v9  ;;  %v3727_v21 = vpop.f32.mrb[117].mxu0 }
 0x1ea   : > { %v3282_v47 = vpack.c.bf16 %v3963_v30, %v3955_v46  ;;  %v3728_v44 = vadd.f32 %v3727_v21, %v3726_v49  ;;  %v3729_v33 = vpop.f32.mrb[118].mxu0  ;;  %v2707_v52 = vmul.f32 %v3963_v30, %v3963_v30 }
 0x1eb   : > { %v3277_v22 = vpack.c.bf16 %v3967_v48, %v3959_v9  ;;  %v2667_v63 = vadd.f32 %v3967_v48, %v3959_v9  ;;  %v2705_v14 = vmul.f32 %v3967_v48, %v3967_v48  ;;  %v3730_v8 = vpop.f32.mrb[119].mxu0 }
 0x1ec   : > { %3369 = vst [vmem:[%s5383_s17 + $0x8] sm:$0xff] %v3282_v47   ;;  %v3731_v0 = vadd.f32 %v3730_v8, %v3729_v33  ;;  %v5389_v62 = vadd.f32 %v5220_v28, %v3728_v44 }
 0x1ed   : > { %3278 = vst [vmem:[%s5383_s17] sm:$0xff] %v3277_v22   ;;  %v2668_v59 = vadd.f32 %v3955_v46, %v2667_v63  ;;  %v2736_v25 = vadd.f32 %v2705_v14, %v2704_v43  ;;  %v3910_v18 = vpop.f32.mrb[84].mxu1 }
 0x1ee   : > { %v3971_v20 = vadd.f32 %v5343_v51, %v3910_v18  ;;  %v2364_v32 = vpop.f32.mrb[85].mxu1  ;;  %v5394_v6 = vadd.f32 %v5222_v36, %v3731_v0 }
 0x1ef   : > { %v2737_v38 = vadd.f32 %v2736_v25, %v2706_v39  ;;  %v3975_v1 = vadd.f32 %v5337_v13, %v2364_v32  ;;  %v2669_v11 = vadd.f32 %v3963_v30, %v2668_v59  ;;  %v3911_v2 = vpop.f32.mrb[86].mxu1 }
 0x1f0   : > { %v3979_v57 = vadd.f32 %v5346_v37, %v3911_v2  ;;  %v2367_v4 = vpop.f32.mrb[87].mxu1  ;;  %v3732_v51 = vpop.f32.mrb[120].mxu0  ;;  %v2710_v49 = vmul.f32 %v3971_v20, %v3971_v20 }
 0x1f1   : > { %v2670_v27 = vadd.f32 %v3975_v1, %v2669_v11  ;;  %v2708_v28 = vmul.f32 %v3975_v1, %v3975_v1  ;;  %v2738_v56 = vadd.f32 %v2737_v38, %v2707_v52  ;;  %v3983_v34 = vadd.f32 %v5340_v60, %v2367_v4  ;;  %v3733_v15 = vpop.f32.mrb[121].mxu0 }
 0x1f2   : > { %v3292_v46 = vpack.c.bf16 %v3979_v57, %v3971_v20  ;;  %v3735_v55 = vpop.f32.mrb[122].mxu0  ;;  %v3734_v36 = vadd.f32 %v3733_v15, %v3732_v51  ;;  %v2711_v22 = vmul.f32 %v3979_v57, %v3979_v57 }
 0x1f3   : > { %v2739_v9 = vadd.f32 %v2738_v56, %v2708_v28  ;;  %v3287_v13 = vpack.c.bf16 %v3983_v34, %v3975_v1  ;;  %v2671_v54 = vadd.f32 %v3983_v34, %v2670_v27  ;;  %v2709_v30 = vmul.f32 %v3983_v34, %v3983_v34  ;;  %v3736_v48 = vpop.f32.mrb[123].mxu0 }
 0x1f4   : > { %3371 = vst [vmem:[%s5383_s17 + $0x18] sm:$0xff] %v3292_v46   ;;  %v3737_v21 = vadd.f32 %v3736_v48, %v3735_v55  ;;  %v5402_v14 = vadd.f32 %v5228_v40, %v3734_v36 }
 0x1f5   : > { %3370 = vst [vmem:[%s5383_s17 + $0x10] sm:$0xff] %v3287_v13   ;;  %v2672_v37 = vadd.f32 %v3971_v20, %v2671_v54  ;;  %v2740_v43 = vadd.f32 %v2739_v9, %v2709_v30  ;;  %v3914_v47 = vpop.f32.mrb[88].mxu1 }
 0x1f6   : > { %v3987_v60 = vadd.f32 %v5355_v19, %v3914_v47  ;;  %v2380_v63 = vpop.f32.mrb[89].mxu1  ;;  %v5406_v59 = vadd.f32 %v5230_v26, %v3737_v21 }
 0x1f7   : > { %v2741_v44 = vadd.f32 %v2740_v43, %v2710_v49  ;;  %v3991_v33 = vadd.f32 %v5349_v31, %v2380_v63  ;;  %v2673_v39 = vadd.f32 %v3979_v57, %v2672_v37  ;;  %v3915_v8 = vpop.f32.mrb[90].mxu1 }
 0x1f8   : > { %v3995_v25 = vadd.f32 %v5358_v53, %v3915_v8  ;;  %v2383_v18 = vpop.f32.mrb[91].mxu1  ;;  %v3738_v40 = vpop.f32.mrb[124].mxu0  ;;  %v2714_v27 = vmul.f32 %v3987_v60, %v3987_v60 }
 0x1f9   : > { %v2674_v0 = vadd.f32 %v3991_v33, %v2673_v39  ;;  %v2712_v52 = vmul.f32 %v3991_v33, %v3991_v33  ;;  %v2742_v19 = vadd.f32 %v2741_v44, %v2711_v22  ;;  %v3999_v20 = vadd.f32 %v5352_v45, %v2383_v18  ;;  %v3739_v38 = vpop.f32.mrb[125].mxu0 }
 0x1fa   : > { %v3302_v32 = vpack.c.bf16 %v3995_v25, %v3987_v60  ;;  %v3741_v57 = vpop.f32.mrb[126].mxu0  ;;  %v3740_v26 = vadd.f32 %v3739_v38, %v3738_v40  ;;  %v2715_v51 = vmul.f32 %v3995_v25, %v3995_v25 }
 0x1fb   : > { %v2743_v1 = vadd.f32 %v2742_v19, %v2712_v52  ;;  %v3297_v31 = vpack.c.bf16 %v3999_v20, %v3991_v33  ;;  %v2675_v11 = vadd.f32 %v3999_v20, %v2674_v0  ;;  %v2713_v2 = vmul.f32 %v3999_v20, %v3999_v20  ;;  %v3742_v4 = vpop.f32.mrb[127].mxu0 }
 0x1fc   : > { %3373 = vst [vmem:[%s5383_s17 + $0x28] sm:$0xff] %v3302_v32   ;;  %v3743_v34 = vadd.f32 %v3742_v4, %v3741_v57  ;;  %v4029_v15 = vadd.f32 %v5237_v16, %v3740_v26 }
 0x1fd   : > { %3372 = vst [vmem:[%s5383_s17 + $0x20] sm:$0xff] %v3297_v31   ;;  %v2676_v53 = vadd.f32 %v3987_v60, %v2675_v11  ;;  %v2744_v28 = vadd.f32 %v2743_v1, %v2713_v2  ;;  %v3918_v56 = vpop.f32.mrb[92].mxu1 }
 0x1fe   : > { %v4003_v45 = vadd.f32 %v5366_v41, %v3918_v56  ;;  %v2396_v46 = vpop.f32.mrb[93].mxu1  ;;  %v5416_v55 = vadd.f32 %v5241_v12, %v3743_v34 }
 0x1ff   : > { %v2745_v9 = vadd.f32 %v2744_v28, %v2714_v27  ;;  %v4007_v13 = vadd.f32 %v5361_v7, %v2396_v46  ;;  %v2677_v54 = vadd.f32 %v3995_v25, %v2676_v53  ;;  %v3919_v30 = vpop.f32.mrb[94].mxu1 }
 0x200   : > { %v4011_v36 = vadd.f32 %v5369_v58, %v3919_v30  ;;  %v2399_v48 = vpop.f32.mrb[95].mxu1  ;;  %v3744_v47 = vpop.f32.mrb[128].mxu0  ;;  %v2718_v39 = vmul.f32 %v4003_v45, %v4003_v45 }
 0x201   : > { %v2678_v49 = vadd.f32 %v4007_v13, %v2677_v54  ;;  %v2716_v37 = vmul.f32 %v4007_v13, %v4007_v13  ;;  %v2746_v43 = vadd.f32 %v2745_v9, %v2715_v51  ;;  %v4015_v41 = vadd.f32 %v5363_v42, %v2399_v48  ;;  %v3745_v21 = vpop.f32.mrb[129].mxu0 }
 0x202   : > { %v3312_v16 = vpack.c.bf16 %v4011_v36, %v4003_v45  ;;  %v3747_v44 = vpop.f32.mrb[130].mxu0  ;;  %v3746_v12 = vadd.f32 %v3745_v21, %v3744_v47  ;;  %v2719_v0 = vmul.f32 %v4011_v36, %v4011_v36 }
 0x203   : > { %v2747_v22 = vadd.f32 %v2746_v43, %v2716_v37  ;;  %v3307_v7 = vpack.c.bf16 %v4015_v41, %v4007_v13  ;;  %v2679_v60 = vadd.f32 %v4015_v41, %v2678_v49  ;;  %v2717_v63 = vmul.f32 %v4015_v41, %v4015_v41  ;;  %v3748_v33 = vpop.f32.mrb[131].mxu0 }
 0x204   : > { %3375 = vst [vmem:[%s5383_s17 + $0x38] sm:$0xff] %v3312_v16   ;;  %v3749_v18 = vadd.f32 %v3748_v33, %v3747_v44  ;;  %v5424_v19 = vadd.f32 %v5259_v29, %v3746_v12 }
 0x205   : > { %3374 = vst [vmem:[%s5383_s17 + $0x30] sm:$0xff] %v3307_v7   ;;  %v2680_v58 = vadd.f32 %v4003_v45, %v2679_v60  ;;  %v2748_v8 = vadd.f32 %v2747_v22, %v2717_v63  ;;  %v3922_v25 = vpop.f32.mrb[0].mxu1 }
 0x206   : > { %v4018_v42 = vadd.f32 %v5389_v62, %v3922_v25  ;;  %v2412_v52 = vpop.f32.mrb[1].mxu1  ;;  %v5428_v1 = vadd.f32 %v5263_v50, %v3749_v18 }
 0x207   : > { %v2749_v20 = vadd.f32 %v2748_v8, %v2718_v39  ;;  %v4021_v40 = vadd.f32 %v5372_v61, %v2412_v52  ;;  %v2681_v32 = vadd.f32 %v4011_v36, %v2680_v58  ;;  %v3923_v38 = vpop.f32.mrb[2].mxu1 }
 0x208   : > { %v4024_v31 = vadd.f32 %v5394_v6, %v3923_v38  ;;  %v2415_v11 = vpop.f32.mrb[3].mxu1  ;;  %v3750_v29 = vpop.f32.mrb[132].mxu0  ;;  %v2722_v45 = vmul.f32 %v4018_v42, %v4018_v42 }
 0x209   : > { %v2682_v2 = vadd.f32 %v4021_v40, %v2681_v32  ;;  %v2720_v57 = vmul.f32 %v4021_v40, %v4021_v40  ;;  %v2750_v62 = vadd.f32 %v2749_v20, %v2719_v0  ;;  %v4027_v26 = vadd.f32 %v5376_v35, %v2415_v11  ;;  %v3751_v27 = vpop.f32.mrb[133].mxu0 }
 0x20a   : > { %v3322_v4 = vpack.c.bf16 %v4024_v31, %v4018_v42  ;;  %v3753_v34 = vpop.f32.mrb[134].mxu0  ;;  %v3752_v50 = vadd.f32 %v3751_v27, %v3750_v29  ;;  %v2723_v54 = vmul.f32 %v4024_v31, %v4024_v31 }
 0x20b   : > { %v2751_v53 = vadd.f32 %v2750_v62, %v2720_v57  ;;  %v3317_v61 = vpack.c.bf16 %v4027_v26, %v4021_v40  ;;  %v2683_v28 = vadd.f32 %v4027_v26, %v2682_v2  ;;  %v2721_v56 = vmul.f32 %v4027_v26, %v4027_v26  ;;  %v3754_v51 = vpop.f32.mrb[135].mxu0 }
 0x20c   : > { %3377 = vst [vmem:[%s5383_s17 + $0x48] sm:$0xff] %v3322_v4   ;;  %v3755_v13 = vadd.f32 %v3754_v51, %v3753_v34  ;;  %v4041_v36 = vadd.f32 %v5281_v10, %v3752_v50 }
 0x20d   : > { %3376 = vst [vmem:[%s5383_s17 + $0x40] sm:$0xff] %v3317_v61   ;;  %v2684_v6 = vadd.f32 %v4018_v42, %v2683_v28  ;;  %v2752_v46 = vadd.f32 %v2751_v53, %v2721_v56  ;;  %v3926_v9 = vpop.f32.mrb[4].mxu1 }
 0x20e   : > { %v4030_v30 = vadd.f32 %v4029_v15, %v3926_v9  ;;  %v2428_v35 = vpop.f32.mrb[5].mxu1  ;;  %v4047_v41 = vadd.f32 %v5285_v5, %v3755_v13 }
 0x20f   : > { %v2753_v48 = vadd.f32 %v2752_v46, %v2722_v45  ;;  %v4033_v49 = vadd.f32 %v5402_v14, %v2428_v35  ;;  %v2685_v37 = vadd.f32 %v4024_v31, %v2684_v6  ;;  %v3927_v43 = vpop.f32.mrb[6].mxu1 }
 0x210   : > { %v4036_v47 = vadd.f32 %v5416_v55, %v3927_v43  ;;  %v2431_v16 = vpop.f32.mrb[7].mxu1  ;;  %v3756_v60 = vpop.f32.mrb[136].mxu0  ;;  %v2726_v8 = vmul.f32 %v4030_v30, %v4030_v30 }
 0x211   : > { %v2686_v21 = vadd.f32 %v4033_v49, %v2685_v37  ;;  %v2724_v22 = vmul.f32 %v4033_v49, %v4033_v49  ;;  %v2754_v7 = vadd.f32 %v2753_v48, %v2723_v54  ;;  %v4039_v15 = vadd.f32 %v5406_v59, %v2431_v16  ;;  %v3757_v10 = vpop.f32.mrb[137].mxu0 }
 0x212   : > { %v3332_v63 = vpack.c.bf16 %v4036_v47, %v4030_v30  ;;  %v3759_v39 = vpop.f32.mrb[138].mxu0  ;;  %v3758_v58 = vadd.f32 %v3757_v10, %v3756_v60  ;;  %v2727_v42 = vmul.f32 %v4036_v47, %v4036_v47 }
 0x213   : > { %v2755_v44 = vadd.f32 %v2754_v7, %v2724_v22  ;;  %v3327_v12 = vpack.c.bf16 %v4039_v15, %v4033_v49  ;;  %v2687_v14 = vadd.f32 %v4039_v15, %v2686_v21  ;;  %v2725_v33 = vmul.f32 %v4039_v15, %v4039_v15  ;;  %v3760_v5 = vpop.f32.mrb[139].mxu0 }
 0x214   : > { %3379 = vst [vmem:[%s5383_s17 + $0x58] sm:$0xff] %v3332_v63   ;;  %v3761_v0 = vadd.f32 %v3760_v5, %v3759_v39  ;;  %v4056_v20 = vadd.f32 %v5303_v3, %v3758_v58 }
 0x215   : > { %3378 = vst [vmem:[%s5383_s17 + $0x50] sm:$0xff] %v3327_v12   ;;  %v2688_v55 = vadd.f32 %v4030_v30, %v2687_v14  ;;  %v2756_v25 = vadd.f32 %v2755_v44, %v2725_v33  ;;  %v3930_v18 = vpop.f32.mrb[8].mxu1 }
 0x216   : > { %v4042_v52 = vadd.f32 %v4041_v36, %v3930_v18  ;;  %v2444_v59 = vpop.f32.mrb[9].mxu1  ;;  %v4062_v11 = vadd.f32 %v5307_v24, %v3761_v0 }
 0x217   : > { %v2757_v40 = vadd.f32 %v2756_v25, %v2726_v8  ;;  %v4045_v32 = vadd.f32 %v5424_v19, %v2444_v59  ;;  %v2689_v38 = vadd.f32 %v4036_v47, %v2688_v55  ;;  %v3931_v31 = vpop.f32.mrb[10].mxu1 }
 0x218   : > { %v4048_v2 = vadd.f32 %v4047_v41, %v3931_v31  ;;  %v2447_v57 = vpop.f32.mrb[11].mxu1  ;;  %v3762_v27 = vpop.f32.mrb[140].mxu0  ;;  %v2730_v24 = vmul.f32 %v4042_v52, %v4042_v52 }
 0x219   : > { %v2690_v62 = vadd.f32 %v4045_v32, %v2689_v38  ;;  %v2728_v26 = vmul.f32 %v4045_v32, %v4045_v32  ;;  %v2758_v29 = vadd.f32 %v2757_v40, %v2727_v42  ;;  %v4051_v4 = vadd.f32 %v5428_v1, %v2447_v57  ;;  %v3763_v61 = vpop.f32.mrb[141].mxu0 }
 0x21a   : > { %v3342_v53 = vpack.c.bf16 %v4048_v2, %v4042_v52  ;;  %v3765_v34 = vpop.f32.mrb[142].mxu0  ;;  %v3764_v50 = vadd.f32 %v3763_v61, %v3762_v27  ;;  %v2731_v13 = vmul.f32 %v4048_v2, %v4048_v2 }
 0x21b   : > { %v2759_v3 = vadd.f32 %v2758_v29, %v2728_v26  ;;  %v3337_v28 = vpack.c.bf16 %v4051_v4, %v4045_v32  ;;  %v2691_v56 = vadd.f32 %v4051_v4, %v2690_v62  ;;  %v2729_v19 = vmul.f32 %v4051_v4, %v4051_v4  ;;  %v3766_v51 = vpop.f32.mrb[143].mxu0 }
 0x21c   : > { %3381 = vst [vmem:[%s5383_s17 + $0x68] sm:$0xff] %v3342_v53   ;;  %v3767_v9 = vadd.f32 %v3766_v51, %v3765_v34  ;;  %v4053_v1 = vadd.f32 %v5323_v17, %v3764_v50 }
 0x21d   : > { %3380 = vst [vmem:[%s5383_s17 + $0x60] sm:$0xff] %v3337_v28   ;;  %v2692_v45 = vadd.f32 %v4042_v52, %v2691_v56  ;;  %v2760_v6 = vadd.f32 %v2759_v3, %v2729_v19  ;;  %v3934_v46 = vpop.f32.mrb[12].mxu1 }
 0x21e   : > { %v2460_v54 = vpop.f32.mrb[13].mxu1  ;;  %v4059_v49 = vadd.f32 %v5326_v23, %v3767_v9  ;;  %v4054_v37 = vadd.f32 %v4053_v1, %v3934_v46 }
 0x21f   : > { %v2761_v30 = vadd.f32 %v2760_v6, %v2730_v24  ;;  %v4057_v35 = vadd.f32 %v4056_v20, %v2460_v54  ;;  %v2693_v36 = vadd.f32 %v4048_v2, %v2692_v45  ;;  %v3935_v48 = vpop.f32.mrb[14].mxu1 }
 0x220   : > { %v2463_v43 = vpop.f32.mrb[15].mxu1  ;;  %v4060_v21 = vadd.f32 %v4059_v49, %v3935_v48  ;;  %v2734_v60 = vmul.f32 %v4054_v37, %v4054_v37 }
 0x221   : > { %v2694_v41 = vadd.f32 %v4057_v35, %v2693_v36  ;;  %v2732_v47 = vmul.f32 %v4057_v35, %v4057_v35  ;;  %v2762_v16 = vadd.f32 %v2761_v30, %v2731_v13  ;;  %v4063_v22 = vadd.f32 %v4062_v11, %v2463_v43 }
 0x222   : > { %v3352_v15 = vpack.c.bf16 %v4060_v21, %v4054_v37  ;;  %v2735_v44 = vmul.f32 %v4060_v21, %v4060_v21 }
 0x223   : > { %v2763_v7 = vadd.f32 %v2762_v16, %v2732_v47  ;;  %v3347_v17 = vpack.c.bf16 %v4063_v22, %v4057_v35  ;;  %v2695_v63 = vadd.f32 %v4063_v22, %v2694_v41  ;;  %v2733_v10 = vmul.f32 %v4063_v22, %v4063_v22 }
 0x224   : > { %3383 = vst [vmem:[%s5383_s17 + $0x78] sm:$0xff] %v3352_v15  }
 0x225   : > { %3382 = vst [vmem:[%s5383_s17 + $0x70] sm:$0xff] %v3347_v17   ;;  %v2696_v12 = vadd.f32 %v4054_v37, %v2695_v63  ;;  %v2764_v23 = vadd.f32 %v2763_v7, %v2733_v10 }
 0x227   : > { %v2697_v14 = vadd.f32 %v4060_v21, %v2696_v12  ;;  %v2765_v33 = vadd.f32 %v2764_v23, %v2734_v60 }
 0x229   : > { %v2698_v39 = vrot.slane %v2697_v14, 4  ;;  %v2766_v58 = vadd.f32 %v2765_v33, %v2735_v44 }
 0x22b   : > { %v2699_v5 = vadd.f32 %v2698_v39, %v2697_v14  ;;  %v2767_v8 = vrot.slane %v2766_v58, 4 }
 0x22d   : > { %v2700_v55 = vrot.slane %v2699_v5, 2  ;;  %v2768_v25 = vadd.f32 %v2767_v8, %v2766_v58 }
 0x22f   : > { %v2701_v18 = vadd.f32 %v2700_v55, %v2699_v5  ;;  %v2769_v0 = vrot.slane %v2768_v25, 2 }
 0x231   : > { %v2702_v42 = vrot.slane %v2701_v18, 1  ;;  %v2770_v52 = vadd.f32 %v2769_v0, %v2768_v25 }
 0x233   : > { %v2771_v59 = vrot.slane %v2770_v52, 1  ;;  %v2703_v20 = vadd.f32 %v2702_v42, %v2701_v18 }
 0x235   : > { %v2772_v40 = vadd.f32 %v2771_v59, %v2770_v52 }
 0x237   : > { %v2774_v32 = vsel %vm835_vm0, %v2703_v20, %v2772_v40 }
 0x238   : > { %2775 = vst [vmem:[%s465_s20] sm:$0x3] %v2774_v32 }
 0x239 PF: > { %s18_s2 = sadd.s32 1, %s4232_s2   ;;  %s5499_s23 = smov %s4228_s24 }
 0x23a   : > { %p15_p5 = scmp.ge.s32.totalorder %s18_s2, 4   ;;  %s5500_s24 = smov %s5502_s25 }
 0x23c   :  { %17 = sbr.rel (!%p15_p5) target bundleno = 2 (0x2), region = 94 }

</bundles_post_ra>
